<compile_context>
chip_gen: v5e
topology: v5e:2x2
jax: 0.10.0
libtpu: 0.0.40
codegen_flags: <defaults>
</compile_context>

<pallas_src>
import functools

import jax
import jax.numpy as jnp
from jax.experimental import pallas as pl
from jax.experimental.pallas import tpu as pltpu


_VMEM = pl.BlockSpec(memory_space=pltpu.MemorySpace.VMEM)


# ----------------------------------------------------------------------------
# Fused kernel: entire encode + decode recurrence in one invocation.
# ----------------------------------------------------------------------------
def _fused_lstm_kernel(seq_ref, fc_ref, lx_ref, ly_ref, nx_ref, ny_ref,
                       whh_ref, wih_ref, b_ref, wl_ref, bl_ref, out_ref,
                       *, seq_len, predict_len, gate_pad):
    """
    seq_ref : (T, B, F)      input sequence, already shifted by first_col
    fc_ref  : (B, 2)         first_col (frame offset)
    lx/ly   : (B, L)         per-batch lane-point x / y planes
    nx/ny   : (B, L)         per-batch lane-norm  x / y planes
    whh_ref : (GP, 4*GP)     hidden->gates weight, each gate padded to a full
                             128-lane block (GP = gate_pad)
    wih_ref : (F+4, 4*GP)    input[x|l|r]->gates weight (gate-padded)
    b_ref   : (1, 4*GP)      combined LSTM bias (gate-padded)
    wl_ref  : (GP, O)        linear head weight (rows >= hidden are zero)
    bl_ref  : (1, O)         linear head bias
    out_ref : (B, P*O)       decode outputs, already un-shifted (+ first_col)
    """
    GP = gate_pad
    T = seq_len
    P = predict_len
    B = fc_ref.shape[0]
    L = lx_ref.shape[1]
    O = bl_ref.shape[1]

    # ---- hoisted loads / broadcasts (reused by every time step) ----
    fc = fc_ref[...]
    lx = lx_ref[...]
    ly = ly_ref[...]
    nx = nx_ref[...]
    ny = ny_ref[...]
    whh = whh_ref[...]
    wih = wih_ref[...]
    wl = wl_ref[...]
    b_full = jnp.broadcast_to(b_ref[...], (B, 4 * GP))
    bl_full = jnp.broadcast_to(bl_ref[...], (B, O))

    def nearest_lr(q):
        # Nearest lane point + norm by squared L2 distance, first-index
        # tie-break (matches torch.argmin).  Works for q of shape (B, 2)
        # (decode, per step) or (T, B, 2) (encode, all steps at once);
        # lanes are per batch element.
        qx = q[..., 0:1]
        qy = q[..., 1:2]
        dx = lx - qx                                           # (..., B, L)
        dy = ly - qy
        dist = dx * dx + dy * dy
        iota = jax.lax.broadcasted_iota(jnp.int32, dist.shape, dist.ndim - 1)
        min_d = jnp.min(dist, axis=-1, keepdims=True)
        first_idx = jnp.min(jnp.where(dist <= min_d, iota, L),
                            axis=-1, keepdims=True)
        onehot = (iota == first_idx).astype(jnp.float32)
        nlx = jnp.sum(onehot * lx, axis=-1, keepdims=True)
        nly = jnp.sum(onehot * ly, axis=-1, keepdims=True)
        nnx = jnp.sum(onehot * nx, axis=-1, keepdims=True)
        nny = jnp.sum(onehot * ny, axis=-1, keepdims=True)
        nl = jnp.concatenate([nlx, nly], axis=-1)              # (..., B, 2)
        nn = jnp.concatenate([nnx, nny], axis=-1)
        lft = nl - 0.5 * nn - fc
        rgt = nl + 0.5 * nn - fc
        return lft, rgt

    def gate_nonlin(gates, c):
        # Lane-aligned gate slices (each gate sits on its own 128-lane block).
        i = jax.nn.sigmoid(gates[:, 0 * GP:1 * GP])
        f = jax.nn.sigmoid(gates[:, 1 * GP:2 * GP])
        g = jnp.tanh(gates[:, 2 * GP:3 * GP])
        o = jax.nn.sigmoid(gates[:, 3 * GP:4 * GP])
        c_new = f * c + i * g
        h_new = o * jnp.tanh(c_new)
        return h_new, c_new

    # -------- encode: input-side gate terms are independent of h ----------
    # One batched (T, B, L) lane lookup, then per-step [x|l|r] @ W_ih dots
    # that the scheduler can run off the recurrence critical path.
    seq = seq_ref[...]                                         # (T, B, F)
    lft_all, rgt_all = nearest_lr(seq[..., 0:2])               # (T, B, 2)
    gx = []
    for t in range(T):
        xlr_t = jnp.concatenate([seq[t], lft_all[t], rgt_all[t]], axis=1)
        gx.append(jnp.dot(xlr_t, wih, preferred_element_type=jnp.float32)
                  + b_full)

    h = jnp.zeros((B, GP), jnp.float32)
    c = jnp.zeros((B, GP), jnp.float32)

    # Recurrent chain: only h @ W_hh + precomputed input term per step.
    for t in range(T):
        gates = gx[t] + jnp.dot(h, whh, preferred_element_type=jnp.float32)
        h, c = gate_nonlin(gates, c)

    # -------- decode --------
    outs = []
    for _ in range(P):
        out = jnp.dot(h, wl, preferred_element_type=jnp.float32) + bl_full
        outs.append(out + fc)            # store in the original frame
        lft, rgt = nearest_lr(out[:, 0:2])
        xlr = jnp.concatenate([out, lft, rgt], axis=1)
        # h @ W_hh is independent of the linear/lane chain -> overlapping dots.
        gates = (jnp.dot(h, whh, preferred_element_type=jnp.float32)
                 + jnp.dot(xlr, wih, preferred_element_type=jnp.float32)
                 + b_full)
        h, c = gate_nonlin(gates, c)

    # One store of all decode outputs.
    out_ref[...] = jnp.concatenate(outs, axis=1)


# ----------------------------------------------------------------------------
# Forward pass wrapper (mirrors LSTM.forward of the PyTorch module)
# ----------------------------------------------------------------------------
def lstm_forward(params, input_seq, predict_len,
                 lanes_x, lanes_y, norms_x, norms_y):
    """input_seq: (B, T, F).  lanes_*/norms_*: (B, L) pre-gathered per batch."""
    B, T, _ = input_seq.shape
    GP = params["w_lin"].shape[0]                 # padded hidden width (128)
    O = params["b_lin"].shape[1]

    first_col = input_seq[:, 0, :2]                                   # (B, 2)
    seq_shifted = input_seq.at[:, :, :2].add(-first_col[:, None, :])
    seq_tbf = jnp.transpose(seq_shifted, (1, 0, 2))                   # (T, B, F)

    kernel = functools.partial(_fused_lstm_kernel, seq_len=T,
                               predict_len=predict_len, gate_pad=GP)
    out_flat = pl.pallas_call(
        kernel,
        out_shape=jax.ShapeDtypeStruct((B, predict_len * O), jnp.float32),
        in_specs=[_VMEM] * 11,
        out_specs=_VMEM,
    )(seq_tbf, first_col, lanes_x, lanes_y, norms_x, norms_y,
      params["w_hh"], params["w_ih"], params["b_comb"],
      params["w_lin"], params["b_lin"])

    # Un-shift (+first_col) already applied in-kernel; this reshape is free.
    return out_flat.reshape(B, predict_len, O)


# ----------------------------------------------------------------------------
# Deterministic parameter construction (PyTorch-equivalent params, packed into
# the padded layout consumed by the fused kernel).
# ----------------------------------------------------------------------------
def init_params(key, fea_len, hidden_dim, output_dim, gate_pad=128):
    input_dim = fea_len + 4                      # [x, l, r] as in the module
    k = 1.0 / jnp.sqrt(jnp.float32(hidden_dim))
    keys = jax.random.split(key, 6)
    u = functools.partial(jax.random.uniform, minval=-k, maxval=k,
                          dtype=jnp.float32)
    # PyTorch LSTMCell params (transposed for x @ W) + combined bias, gate
    # order i, f, g, o.
    w_ih = u(keys[0], (input_dim, 4 * hidden_dim))
    w_hh = u(keys[1], (hidden_dim, 4 * hidden_dim))
    b = u(keys[2], (1, 4 * hidden_dim)) + u(keys[3], (1, 4 * hidden_dim))
    w_lin = u(keys[4], (hidden_dim, output_dim))
    b_lin = u(keys[5], (1, output_dim))

    H, GP = hidden_dim, gate_pad

    def pad_gate_cols(m):
        # (rows, 4H) -> (rows, 4GP); gate g lands at columns [g*GP, g*GP+H).
        out = jnp.zeros((m.shape[0], 4 * GP), jnp.float32)
        for g in range(4):
            out = out.at[:, g * GP:g * GP + H].set(m[:, g * H:(g + 1) * H])
        return out

    w_hh_p = jnp.zeros((GP, 4 * GP), jnp.float32).at[:H].set(pad_gate_cols(w_hh))
    w_ih_p = pad_gate_cols(w_ih)                              # (input_dim, 4GP)
    b_comb = pad_gate_cols(b)                                 # (1, 4GP)
    w_lin_p = jnp.zeros((GP, output_dim), jnp.float32).at[:H].set(w_lin)
    return dict(w_hh=w_hh_p, w_ih=w_ih_p, b_comb=b_comb,
                w_lin=w_lin_p, b_lin=b_lin)


if __name__ == "__main__":
    # Small, shape-consistent configuration:
    #   fea_len = output_dim = 2 (x, y), so lstm input_dim = 2 + 2 + 2 = 6.
    batch_size = 4
    seq_len = 8
    predict_len = 4
    fea_len = 2
    output_dim = 2
    hidden_dim = 32
    num_lanes = 16
    scene_num = [2, 2]                       # two scenes, two agents each
    scene_of_batch = jnp.array([0, 0, 1, 1], dtype=jnp.int32)

    key = jax.random.PRNGKey(0)
    k_params, k_seq, k_lanes, k_norms = jax.random.split(key, 4)

    params = init_params(k_params, fea_len, hidden_dim, output_dim)

    input_seq = jax.random.normal(k_seq, (batch_size, seq_len, fea_len),
                                  dtype=jnp.float32)
    # Per-scene lane centerline points and norms: (num_scenes, L, 2)
    lanes = jax.random.normal(k_lanes, (len(scene_num), num_lanes, 2),
                              dtype=jnp.float32) * 3.0
    lane_norms = jax.random.normal(k_norms, (len(scene_num), num_lanes, 2),
                                   dtype=jnp.float32)

    # Pre-gather each agent's scene lanes (glue), split into x / y planes.
    lanes_b = jnp.take(lanes, scene_of_batch, axis=0)        # (B, L, 2)
    norms_b = jnp.take(lane_norms, scene_of_batch, axis=0)   # (B, L, 2)
    lanes_x, lanes_y = lanes_b[..., 0], lanes_b[..., 1]
    norms_x, norms_y = norms_b[..., 0], norms_b[..., 1]

    fwd = jax.jit(functools.partial(lstm_forward, predict_len=predict_len))
    out = fwd(params, input_seq, lanes_x=lanes_x, lanes_y=lanes_y,
              norms_x=norms_x, norms_y=norms_y)
    out = jax.block_until_ready(out)

    assert out.shape == (batch_size, predict_len, output_dim)
    assert bool(jnp.all(jnp.isfinite(out)))
    print("KERNEL_OK")
</pallas_src>

<mosaic_0001>
module attributes {stable_mosaic.version = 11 : i64} {
  func.func @_fused_lstm_kernel(%arg0: memref<8x4x2xf32, #tpu.memory_space<vmem>>, %arg1: memref<4x2xf32, #tpu.memory_space<vmem>>, %arg2: memref<4x16xf32, #tpu.memory_space<vmem>>, %arg3: memref<4x16xf32, #tpu.memory_space<vmem>>, %arg4: memref<4x16xf32, #tpu.memory_space<vmem>>, %arg5: memref<4x16xf32, #tpu.memory_space<vmem>>, %arg6: memref<128x512xf32, #tpu.memory_space<vmem>>, %arg7: memref<6x512xf32, #tpu.memory_space<vmem>>, %arg8: memref<1x512xf32, #tpu.memory_space<vmem>>, %arg9: memref<128x2xf32, #tpu.memory_space<vmem>>, %arg10: memref<1x2xf32, #tpu.memory_space<vmem>>, %arg11: memref<4x8xf32, #tpu.memory_space<vmem>>) attributes {dimension_semantics = [], scalar_prefetch = 0 : i64, scratch_operands = 0 : i64, tpu.core_type = #tpu.core_type<tc>} {
    %c0 = arith.constant 0 : index
    %c0_0 = arith.constant 0 : index
    %0 = vector.load %arg1[%c0, %c0_0] : memref<4x2xf32, #tpu.memory_space<vmem>>, vector<4x2xf32>
    %c0_1 = arith.constant 0 : index
    %c0_2 = arith.constant 0 : index
    %1 = vector.load %arg2[%c0_1, %c0_2] : memref<4x16xf32, #tpu.memory_space<vmem>>, vector<4x16xf32>
    %c0_3 = arith.constant 0 : index
    %c0_4 = arith.constant 0 : index
    %2 = vector.load %arg3[%c0_3, %c0_4] : memref<4x16xf32, #tpu.memory_space<vmem>>, vector<4x16xf32>
    %c0_5 = arith.constant 0 : index
    %c0_6 = arith.constant 0 : index
    %3 = vector.load %arg4[%c0_5, %c0_6] : memref<4x16xf32, #tpu.memory_space<vmem>>, vector<4x16xf32>
    %c0_7 = arith.constant 0 : index
    %c0_8 = arith.constant 0 : index
    %4 = vector.load %arg5[%c0_7, %c0_8] : memref<4x16xf32, #tpu.memory_space<vmem>>, vector<4x16xf32>
    %c0_9 = arith.constant 0 : index
    %c0_10 = arith.constant 0 : index
    %5 = vector.load %arg6[%c0_9, %c0_10] : memref<128x512xf32, #tpu.memory_space<vmem>>, vector<128x512xf32>
    %c0_11 = arith.constant 0 : index
    %c0_12 = arith.constant 0 : index
    %6 = vector.load %arg7[%c0_11, %c0_12] : memref<6x512xf32, #tpu.memory_space<vmem>>, vector<6x512xf32>
    %c0_13 = arith.constant 0 : index
    %c0_14 = arith.constant 0 : index
    %7 = vector.load %arg9[%c0_13, %c0_14] : memref<128x2xf32, #tpu.memory_space<vmem>>, vector<128x2xf32>
    %c0_15 = arith.constant 0 : index
    %c0_16 = arith.constant 0 : index
    %8 = vector.load %arg8[%c0_15, %c0_16] : memref<1x512xf32, #tpu.memory_space<vmem>>, vector<1x512xf32>
    %9 = vector.shape_cast %8 : vector<1x512xf32> to vector<1x512xf32>
    %10 = vector.broadcast %9 : vector<1x512xf32> to vector<4x512xf32>
    %c0_17 = arith.constant 0 : index
    %c0_18 = arith.constant 0 : index
    %11 = vector.load %arg10[%c0_17, %c0_18] : memref<1x2xf32, #tpu.memory_space<vmem>>, vector<1x2xf32>
    %12 = vector.shape_cast %11 : vector<1x2xf32> to vector<1x2xf32>
    %13 = vector.broadcast %12 : vector<1x2xf32> to vector<4x2xf32>
    %c0_19 = arith.constant 0 : index
    %c0_20 = arith.constant 0 : index
    %c0_21 = arith.constant 0 : index
    %14 = vector.load %arg0[%c0_19, %c0_20, %c0_21] : memref<8x4x2xf32, #tpu.memory_space<vmem>>, vector<8x4x2xf32>
    %15 = vector.extract_strided_slice %14 {offsets = [0, 0, 0], sizes = [8, 4, 1], strides = [1, 1, 1]} : vector<8x4x2xf32> to vector<8x4x1xf32>
    %16 = vector.extract_strided_slice %14 {offsets = [0, 0, 1], sizes = [8, 4, 1], strides = [1, 1, 1]} : vector<8x4x2xf32> to vector<8x4x1xf32>
    %17 = vector.shape_cast %1 : vector<4x16xf32> to vector<1x4x16xf32>
    %18 = vector.broadcast %17 : vector<1x4x16xf32> to vector<8x4x16xf32>
    %19 = vector.broadcast %15 : vector<8x4x1xf32> to vector<8x4x16xf32>
    %20 = arith.subf %18, %19 : vector<8x4x16xf32>
    %21 = vector.shape_cast %2 : vector<4x16xf32> to vector<1x4x16xf32>
    %22 = vector.broadcast %21 : vector<1x4x16xf32> to vector<8x4x16xf32>
    %23 = vector.broadcast %16 : vector<8x4x1xf32> to vector<8x4x16xf32>
    %24 = arith.subf %22, %23 : vector<8x4x16xf32>
    %25 = arith.mulf %20, %20 : vector<8x4x16xf32>
    %26 = arith.mulf %24, %24 : vector<8x4x16xf32>
    %27 = arith.addf %25, %26 : vector<8x4x16xf32>
    %28 = tpu.iota {dimensions = array<i32: 2>} : vector<8x4x16xi32>
    %cst = arith.constant dense<0x7F800000> : vector<8x4xf32>
    %29 = vector.multi_reduction <minimumf>, %27, %cst [2] : vector<8x4x16xf32> to vector<8x4xf32>
    %30 = vector.shape_cast %29 : vector<8x4xf32> to vector<8x4x1xf32>
    %31 = vector.broadcast %30 : vector<8x4x1xf32> to vector<8x4x16xf32>
    %32 = arith.cmpf ole, %27, %31 : vector<8x4x16xf32>
    %c16_i32 = arith.constant 16 : i32
    %33 = vector.broadcast %c16_i32 : i32 to vector<8x4x16xi32>
    %34 = arith.select %32, %28, %33 : vector<8x4x16xi1>, vector<8x4x16xi32>
    %cst_22 = arith.constant dense<2147483647> : vector<8x4xi32>
    %35 = vector.multi_reduction <minsi>, %34, %cst_22 [2] : vector<8x4x16xi32> to vector<8x4xi32>
    %36 = vector.shape_cast %35 : vector<8x4xi32> to vector<8x4x1xi32>
    %37 = vector.broadcast %36 : vector<8x4x1xi32> to vector<8x4x16xi32>
    %38 = arith.cmpi eq, %28, %37 : vector<8x4x16xi32>
    %39 = arith.extui %38 : vector<8x4x16xi1> to vector<8x4x16xi32>
    %40 = arith.sitofp %39 : vector<8x4x16xi32> to vector<8x4x16xf32>
    %41 = vector.shape_cast %1 : vector<4x16xf32> to vector<1x4x16xf32>
    %42 = vector.broadcast %41 : vector<1x4x16xf32> to vector<8x4x16xf32>
    %43 = arith.mulf %40, %42 : vector<8x4x16xf32>
    %cst_23 = arith.constant dense<0.000000e+00> : vector<8x4xf32>
    %44 = vector.multi_reduction <add>, %43, %cst_23 [2] : vector<8x4x16xf32> to vector<8x4xf32>
    %45 = vector.shape_cast %44 : vector<8x4xf32> to vector<8x4x1xf32>
    %46 = vector.shape_cast %2 : vector<4x16xf32> to vector<1x4x16xf32>
    %47 = vector.broadcast %46 : vector<1x4x16xf32> to vector<8x4x16xf32>
    %48 = arith.mulf %40, %47 : vector<8x4x16xf32>
    %cst_24 = arith.constant dense<0.000000e+00> : vector<8x4xf32>
    %49 = vector.multi_reduction <add>, %48, %cst_24 [2] : vector<8x4x16xf32> to vector<8x4xf32>
    %50 = vector.shape_cast %49 : vector<8x4xf32> to vector<8x4x1xf32>
    %51 = vector.shape_cast %3 : vector<4x16xf32> to vector<1x4x16xf32>
    %52 = vector.broadcast %51 : vector<1x4x16xf32> to vector<8x4x16xf32>
    %53 = arith.mulf %40, %52 : vector<8x4x16xf32>
    %cst_25 = arith.constant dense<0.000000e+00> : vector<8x4xf32>
    %54 = vector.multi_reduction <add>, %53, %cst_25 [2] : vector<8x4x16xf32> to vector<8x4xf32>
    %55 = vector.shape_cast %54 : vector<8x4xf32> to vector<8x4x1xf32>
    %56 = vector.shape_cast %4 : vector<4x16xf32> to vector<1x4x16xf32>
    %57 = vector.broadcast %56 : vector<1x4x16xf32> to vector<8x4x16xf32>
    %58 = arith.mulf %40, %57 : vector<8x4x16xf32>
    %cst_26 = arith.constant dense<0.000000e+00> : vector<8x4xf32>
    %59 = vector.multi_reduction <add>, %58, %cst_26 [2] : vector<8x4x16xf32> to vector<8x4xf32>
    %60 = vector.shape_cast %59 : vector<8x4xf32> to vector<8x4x1xf32>
    %61 = tpu.concatenate %45, %50 in 2 : vector<8x4x1xf32>, vector<8x4x1xf32> -> vector<8x4x2xf32>
    %62 = tpu.concatenate %55, %60 in 2 : vector<8x4x1xf32>, vector<8x4x1xf32> -> vector<8x4x2xf32>
    %cst_27 = arith.constant 5.000000e-01 : f32
    %63 = vector.broadcast %cst_27 : f32 to vector<8x4x2xf32>
    %64 = arith.mulf %63, %62 : vector<8x4x2xf32>
    %65 = arith.subf %61, %64 : vector<8x4x2xf32>
    %66 = vector.shape_cast %0 : vector<4x2xf32> to vector<1x4x2xf32>
    %67 = vector.broadcast %66 : vector<1x4x2xf32> to vector<8x4x2xf32>
    %68 = arith.subf %65, %67 : vector<8x4x2xf32>
    %cst_28 = arith.constant 5.000000e-01 : f32
    %69 = vector.broadcast %cst_28 : f32 to vector<8x4x2xf32>
    %70 = arith.mulf %69, %62 : vector<8x4x2xf32>
    %71 = arith.addf %61, %70 : vector<8x4x2xf32>
    %72 = vector.shape_cast %0 : vector<4x2xf32> to vector<1x4x2xf32>
    %73 = vector.broadcast %72 : vector<1x4x2xf32> to vector<8x4x2xf32>
    %74 = arith.subf %71, %73 : vector<8x4x2xf32>
    %75 = vector.extract_strided_slice %14 {offsets = [0, 0, 0], sizes = [1, 4, 2], strides = [1, 1, 1]} : vector<8x4x2xf32> to vector<1x4x2xf32>
    %76 = vector.shape_cast %75 : vector<1x4x2xf32> to vector<4x2xf32>
    %77 = vector.extract_strided_slice %68 {offsets = [0, 0, 0], sizes = [1, 4, 2], strides = [1, 1, 1]} : vector<8x4x2xf32> to vector<1x4x2xf32>
    %78 = vector.shape_cast %77 : vector<1x4x2xf32> to vector<4x2xf32>
    %79 = vector.extract_strided_slice %74 {offsets = [0, 0, 0], sizes = [1, 4, 2], strides = [1, 1, 1]} : vector<8x4x2xf32> to vector<1x4x2xf32>
    %80 = vector.shape_cast %79 : vector<1x4x2xf32> to vector<4x2xf32>
    %81 = tpu.concatenate %76, %78, %80 in 1 : vector<4x2xf32>, vector<4x2xf32>, vector<4x2xf32> -> vector<4x6xf32>
    %cst_29 = arith.constant dense<0.000000e+00> : vector<4x512xf32>
    %82 = tpu.matmul %81, %6, %cst_29 {dimension_numbers = #tpu.dot_dimension_numbers<[1], [0], [0], [1], [0, 0, 1, 1], [], []>} : vector<4x6xf32>, vector<6x512xf32>, vector<4x512xf32> -> vector<4x512xf32>
    %83 = arith.addf %82, %10 : vector<4x512xf32>
    %84 = vector.extract_strided_slice %14 {offsets = [1, 0, 0], sizes = [1, 4, 2], strides = [1, 1, 1]} : vector<8x4x2xf32> to vector<1x4x2xf32>
    %85 = vector.shape_cast %84 : vector<1x4x2xf32> to vector<4x2xf32>
    %86 = vector.extract_strided_slice %68 {offsets = [1, 0, 0], sizes = [1, 4, 2], strides = [1, 1, 1]} : vector<8x4x2xf32> to vector<1x4x2xf32>
    %87 = vector.shape_cast %86 : vector<1x4x2xf32> to vector<4x2xf32>
    %88 = vector.extract_strided_slice %74 {offsets = [1, 0, 0], sizes = [1, 4, 2], strides = [1, 1, 1]} : vector<8x4x2xf32> to vector<1x4x2xf32>
    %89 = vector.shape_cast %88 : vector<1x4x2xf32> to vector<4x2xf32>
    %90 = tpu.concatenate %85, %87, %89 in 1 : vector<4x2xf32>, vector<4x2xf32>, vector<4x2xf32> -> vector<4x6xf32>
    %cst_30 = arith.constant dense<0.000000e+00> : vector<4x512xf32>
    %91 = tpu.matmul %90, %6, %cst_30 {dimension_numbers = #tpu.dot_dimension_numbers<[1], [0], [0], [1], [0, 0, 1, 1], [], []>} : vector<4x6xf32>, vector<6x512xf32>, vector<4x512xf32> -> vector<4x512xf32>
    %92 = arith.addf %91, %10 : vector<4x512xf32>
    %93 = vector.extract_strided_slice %14 {offsets = [2, 0, 0], sizes = [1, 4, 2], strides = [1, 1, 1]} : vector<8x4x2xf32> to vector<1x4x2xf32>
    %94 = vector.shape_cast %93 : vector<1x4x2xf32> to vector<4x2xf32>
    %95 = vector.extract_strided_slice %68 {offsets = [2, 0, 0], sizes = [1, 4, 2], strides = [1, 1, 1]} : vector<8x4x2xf32> to vector<1x4x2xf32>
    %96 = vector.shape_cast %95 : vector<1x4x2xf32> to vector<4x2xf32>
    %97 = vector.extract_strided_slice %74 {offsets = [2, 0, 0], sizes = [1, 4, 2], strides = [1, 1, 1]} : vector<8x4x2xf32> to vector<1x4x2xf32>
    %98 = vector.shape_cast %97 : vector<1x4x2xf32> to vector<4x2xf32>
    %99 = tpu.concatenate %94, %96, %98 in 1 : vector<4x2xf32>, vector<4x2xf32>, vector<4x2xf32> -> vector<4x6xf32>
    %cst_31 = arith.constant dense<0.000000e+00> : vector<4x512xf32>
    %100 = tpu.matmul %99, %6, %cst_31 {dimension_numbers = #tpu.dot_dimension_numbers<[1], [0], [0], [1], [0, 0, 1, 1], [], []>} : vector<4x6xf32>, vector<6x512xf32>, vector<4x512xf32> -> vector<4x512xf32>
    %101 = arith.addf %100, %10 : vector<4x512xf32>
    %102 = vector.extract_strided_slice %14 {offsets = [3, 0, 0], sizes = [1, 4, 2], strides = [1, 1, 1]} : vector<8x4x2xf32> to vector<1x4x2xf32>
    %103 = vector.shape_cast %102 : vector<1x4x2xf32> to vector<4x2xf32>
    %104 = vector.extract_strided_slice %68 {offsets = [3, 0, 0], sizes = [1, 4, 2], strides = [1, 1, 1]} : vector<8x4x2xf32> to vector<1x4x2xf32>
    %105 = vector.shape_cast %104 : vector<1x4x2xf32> to vector<4x2xf32>
    %106 = vector.extract_strided_slice %74 {offsets = [3, 0, 0], sizes = [1, 4, 2], strides = [1, 1, 1]} : vector<8x4x2xf32> to vector<1x4x2xf32>
    %107 = vector.shape_cast %106 : vector<1x4x2xf32> to vector<4x2xf32>
    %108 = tpu.concatenate %103, %105, %107 in 1 : vector<4x2xf32>, vector<4x2xf32>, vector<4x2xf32> -> vector<4x6xf32>
    %cst_32 = arith.constant dense<0.000000e+00> : vector<4x512xf32>
    %109 = tpu.matmul %108, %6, %cst_32 {dimension_numbers = #tpu.dot_dimension_numbers<[1], [0], [0], [1], [0, 0, 1, 1], [], []>} : vector<4x6xf32>, vector<6x512xf32>, vector<4x512xf32> -> vector<4x512xf32>
    %110 = arith.addf %109, %10 : vector<4x512xf32>
    %111 = vector.extract_strided_slice %14 {offsets = [4, 0, 0], sizes = [1, 4, 2], strides = [1, 1, 1]} : vector<8x4x2xf32> to vector<1x4x2xf32>
    %112 = vector.shape_cast %111 : vector<1x4x2xf32> to vector<4x2xf32>
    %113 = vector.extract_strided_slice %68 {offsets = [4, 0, 0], sizes = [1, 4, 2], strides = [1, 1, 1]} : vector<8x4x2xf32> to vector<1x4x2xf32>
    %114 = vector.shape_cast %113 : vector<1x4x2xf32> to vector<4x2xf32>
    %115 = vector.extract_strided_slice %74 {offsets = [4, 0, 0], sizes = [1, 4, 2], strides = [1, 1, 1]} : vector<8x4x2xf32> to vector<1x4x2xf32>
    %116 = vector.shape_cast %115 : vector<1x4x2xf32> to vector<4x2xf32>
    %117 = tpu.concatenate %112, %114, %116 in 1 : vector<4x2xf32>, vector<4x2xf32>, vector<4x2xf32> -> vector<4x6xf32>
    %cst_33 = arith.constant dense<0.000000e+00> : vector<4x512xf32>
    %118 = tpu.matmul %117, %6, %cst_33 {dimension_numbers = #tpu.dot_dimension_numbers<[1], [0], [0], [1], [0, 0, 1, 1], [], []>} : vector<4x6xf32>, vector<6x512xf32>, vector<4x512xf32> -> vector<4x512xf32>
    %119 = arith.addf %118, %10 : vector<4x512xf32>
    %120 = vector.extract_strided_slice %14 {offsets = [5, 0, 0], sizes = [1, 4, 2], strides = [1, 1, 1]} : vector<8x4x2xf32> to vector<1x4x2xf32>
    %121 = vector.shape_cast %120 : vector<1x4x2xf32> to vector<4x2xf32>
    %122 = vector.extract_strided_slice %68 {offsets = [5, 0, 0], sizes = [1, 4, 2], strides = [1, 1, 1]} : vector<8x4x2xf32> to vector<1x4x2xf32>
    %123 = vector.shape_cast %122 : vector<1x4x2xf32> to vector<4x2xf32>
    %124 = vector.extract_strided_slice %74 {offsets = [5, 0, 0], sizes = [1, 4, 2], strides = [1, 1, 1]} : vector<8x4x2xf32> to vector<1x4x2xf32>
    %125 = vector.shape_cast %124 : vector<1x4x2xf32> to vector<4x2xf32>
    %126 = tpu.concatenate %121, %123, %125 in 1 : vector<4x2xf32>, vector<4x2xf32>, vector<4x2xf32> -> vector<4x6xf32>
    %cst_34 = arith.constant dense<0.000000e+00> : vector<4x512xf32>
    %127 = tpu.matmul %126, %6, %cst_34 {dimension_numbers = #tpu.dot_dimension_numbers<[1], [0], [0], [1], [0, 0, 1, 1], [], []>} : vector<4x6xf32>, vector<6x512xf32>, vector<4x512xf32> -> vector<4x512xf32>
    %128 = arith.addf %127, %10 : vector<4x512xf32>
    %129 = vector.extract_strided_slice %14 {offsets = [6, 0, 0], sizes = [1, 4, 2], strides = [1, 1, 1]} : vector<8x4x2xf32> to vector<1x4x2xf32>
    %130 = vector.shape_cast %129 : vector<1x4x2xf32> to vector<4x2xf32>
    %131 = vector.extract_strided_slice %68 {offsets = [6, 0, 0], sizes = [1, 4, 2], strides = [1, 1, 1]} : vector<8x4x2xf32> to vector<1x4x2xf32>
    %132 = vector.shape_cast %131 : vector<1x4x2xf32> to vector<4x2xf32>
    %133 = vector.extract_strided_slice %74 {offsets = [6, 0, 0], sizes = [1, 4, 2], strides = [1, 1, 1]} : vector<8x4x2xf32> to vector<1x4x2xf32>
    %134 = vector.shape_cast %133 : vector<1x4x2xf32> to vector<4x2xf32>
    %135 = tpu.concatenate %130, %132, %134 in 1 : vector<4x2xf32>, vector<4x2xf32>, vector<4x2xf32> -> vector<4x6xf32>
    %cst_35 = arith.constant dense<0.000000e+00> : vector<4x512xf32>
    %136 = tpu.matmul %135, %6, %cst_35 {dimension_numbers = #tpu.dot_dimension_numbers<[1], [0], [0], [1], [0, 0, 1, 1], [], []>} : vector<4x6xf32>, vector<6x512xf32>, vector<4x512xf32> -> vector<4x512xf32>
    %137 = arith.addf %136, %10 : vector<4x512xf32>
    %138 = vector.extract_strided_slice %14 {offsets = [7, 0, 0], sizes = [1, 4, 2], strides = [1, 1, 1]} : vector<8x4x2xf32> to vector<1x4x2xf32>
    %139 = vector.shape_cast %138 : vector<1x4x2xf32> to vector<4x2xf32>
    %140 = vector.extract_strided_slice %68 {offsets = [7, 0, 0], sizes = [1, 4, 2], strides = [1, 1, 1]} : vector<8x4x2xf32> to vector<1x4x2xf32>
    %141 = vector.shape_cast %140 : vector<1x4x2xf32> to vector<4x2xf32>
    %142 = vector.extract_strided_slice %74 {offsets = [7, 0, 0], sizes = [1, 4, 2], strides = [1, 1, 1]} : vector<8x4x2xf32> to vector<1x4x2xf32>
    %143 = vector.shape_cast %142 : vector<1x4x2xf32> to vector<4x2xf32>
    %144 = tpu.concatenate %139, %141, %143 in 1 : vector<4x2xf32>, vector<4x2xf32>, vector<4x2xf32> -> vector<4x6xf32>
    %cst_36 = arith.constant dense<0.000000e+00> : vector<4x512xf32>
    %145 = tpu.matmul %144, %6, %cst_36 {dimension_numbers = #tpu.dot_dimension_numbers<[1], [0], [0], [1], [0, 0, 1, 1], [], []>} : vector<4x6xf32>, vector<6x512xf32>, vector<4x512xf32> -> vector<4x512xf32>
    %146 = arith.addf %145, %10 : vector<4x512xf32>
    %cst_37 = arith.constant 0.000000e+00 : f32
    %147 = vector.broadcast %cst_37 : f32 to vector<4x128xf32>
    %cst_38 = arith.constant 0.000000e+00 : f32
    %148 = vector.broadcast %cst_38 : f32 to vector<4x128xf32>
    %cst_39 = arith.constant dense<0.000000e+00> : vector<4x512xf32>
    %149 = tpu.matmul %147, %5, %cst_39 {dimension_numbers = #tpu.dot_dimension_numbers<[1], [0], [0], [1], [0, 0, 1, 1], [], []>} : vector<4x128xf32>, vector<128x512xf32>, vector<4x512xf32> -> vector<4x512xf32>
    %150 = arith.addf %83, %149 : vector<4x512xf32>
    %151 = vector.extract_strided_slice %150 {offsets = [0, 0], sizes = [4, 128], strides = [1, 1]} : vector<4x512xf32> to vector<4x128xf32>
    %152 = arith.negf %151 : vector<4x128xf32>
    %153 = math.exp %152 : vector<4x128xf32>
    %cst_40 = arith.constant 1.000000e+00 : f32
    %154 = vector.broadcast %cst_40 : f32 to vector<4x128xf32>
    %155 = arith.addf %154, %153 : vector<4x128xf32>
    %156 = arith.divf %154, %155 : vector<4x128xf32>
    %157 = vector.extract_strided_slice %150 {offsets = [0, 128], sizes = [4, 128], strides = [1, 1]} : vector<4x512xf32> to vector<4x128xf32>
    %158 = arith.negf %157 : vector<4x128xf32>
    %159 = math.exp %158 : vector<4x128xf32>
    %cst_41 = arith.constant 1.000000e+00 : f32
    %160 = vector.broadcast %cst_41 : f32 to vector<4x128xf32>
    %161 = arith.addf %160, %159 : vector<4x128xf32>
    %162 = arith.divf %160, %161 : vector<4x128xf32>
    %163 = vector.extract_strided_slice %150 {offsets = [0, 256], sizes = [4, 128], strides = [1, 1]} : vector<4x512xf32> to vector<4x128xf32>
    %164 = math.tanh %163 : vector<4x128xf32>
    %165 = vector.extract_strided_slice %150 {offsets = [0, 384], sizes = [4, 128], strides = [1, 1]} : vector<4x512xf32> to vector<4x128xf32>
    %166 = arith.negf %165 : vector<4x128xf32>
    %167 = math.exp %166 : vector<4x128xf32>
    %cst_42 = arith.constant 1.000000e+00 : f32
    %168 = vector.broadcast %cst_42 : f32 to vector<4x128xf32>
    %169 = arith.addf %168, %167 : vector<4x128xf32>
    %170 = arith.divf %168, %169 : vector<4x128xf32>
    %171 = arith.mulf %162, %148 : vector<4x128xf32>
    %172 = arith.mulf %156, %164 : vector<4x128xf32>
    %173 = arith.addf %171, %172 : vector<4x128xf32>
    %174 = math.tanh %173 : vector<4x128xf32>
    %175 = arith.mulf %170, %174 : vector<4x128xf32>
    %cst_43 = arith.constant dense<0.000000e+00> : vector<4x512xf32>
    %176 = tpu.matmul %175, %5, %cst_43 {dimension_numbers = #tpu.dot_dimension_numbers<[1], [0], [0], [1], [0, 0, 1, 1], [], []>} : vector<4x128xf32>, vector<128x512xf32>, vector<4x512xf32> -> vector<4x512xf32>
    %177 = arith.addf %92, %176 : vector<4x512xf32>
    %178 = vector.extract_strided_slice %177 {offsets = [0, 0], sizes = [4, 128], strides = [1, 1]} : vector<4x512xf32> to vector<4x128xf32>
    %179 = arith.negf %178 : vector<4x128xf32>
    %180 = math.exp %179 : vector<4x128xf32>
    %cst_44 = arith.constant 1.000000e+00 : f32
    %181 = vector.broadcast %cst_44 : f32 to vector<4x128xf32>
    %182 = arith.addf %181, %180 : vector<4x128xf32>
    %183 = arith.divf %181, %182 : vector<4x128xf32>
    %184 = vector.extract_strided_slice %177 {offsets = [0, 128], sizes = [4, 128], strides = [1, 1]} : vector<4x512xf32> to vector<4x128xf32>
    %185 = arith.negf %184 : vector<4x128xf32>
    %186 = math.exp %185 : vector<4x128xf32>
    %cst_45 = arith.constant 1.000000e+00 : f32
    %187 = vector.broadcast %cst_45 : f32 to vector<4x128xf32>
    %188 = arith.addf %187, %186 : vector<4x128xf32>
    %189 = arith.divf %187, %188 : vector<4x128xf32>
    %190 = vector.extract_strided_slice %177 {offsets = [0, 256], sizes = [4, 128], strides = [1, 1]} : vector<4x512xf32> to vector<4x128xf32>
    %191 = math.tanh %190 : vector<4x128xf32>
    %192 = vector.extract_strided_slice %177 {offsets = [0, 384], sizes = [4, 128], strides = [1, 1]} : vector<4x512xf32> to vector<4x128xf32>
    %193 = arith.negf %192 : vector<4x128xf32>
    %194 = math.exp %193 : vector<4x128xf32>
    %cst_46 = arith.constant 1.000000e+00 : f32
    %195 = vector.broadcast %cst_46 : f32 to vector<4x128xf32>
    %196 = arith.addf %195, %194 : vector<4x128xf32>
    %197 = arith.divf %195, %196 : vector<4x128xf32>
    %198 = arith.mulf %189, %173 : vector<4x128xf32>
    %199 = arith.mulf %183, %191 : vector<4x128xf32>
    %200 = arith.addf %198, %199 : vector<4x128xf32>
    %201 = math.tanh %200 : vector<4x128xf32>
    %202 = arith.mulf %197, %201 : vector<4x128xf32>
    %cst_47 = arith.constant dense<0.000000e+00> : vector<4x512xf32>
    %203 = tpu.matmul %202, %5, %cst_47 {dimension_numbers = #tpu.dot_dimension_numbers<[1], [0], [0], [1], [0, 0, 1, 1], [], []>} : vector<4x128xf32>, vector<128x512xf32>, vector<4x512xf32> -> vector<4x512xf32>
    %204 = arith.addf %101, %203 : vector<4x512xf32>
    %205 = vector.extract_strided_slice %204 {offsets = [0, 0], sizes = [4, 128], strides = [1, 1]} : vector<4x512xf32> to vector<4x128xf32>
    %206 = arith.negf %205 : vector<4x128xf32>
    %207 = math.exp %206 : vector<4x128xf32>
    %cst_48 = arith.constant 1.000000e+00 : f32
    %208 = vector.broadcast %cst_48 : f32 to vector<4x128xf32>
    %209 = arith.addf %208, %207 : vector<4x128xf32>
    %210 = arith.divf %208, %209 : vector<4x128xf32>
    %211 = vector.extract_strided_slice %204 {offsets = [0, 128], sizes = [4, 128], strides = [1, 1]} : vector<4x512xf32> to vector<4x128xf32>
    %212 = arith.negf %211 : vector<4x128xf32>
    %213 = math.exp %212 : vector<4x128xf32>
    %cst_49 = arith.constant 1.000000e+00 : f32
    %214 = vector.broadcast %cst_49 : f32 to vector<4x128xf32>
    %215 = arith.addf %214, %213 : vector<4x128xf32>
    %216 = arith.divf %214, %215 : vector<4x128xf32>
    %217 = vector.extract_strided_slice %204 {offsets = [0, 256], sizes = [4, 128], strides = [1, 1]} : vector<4x512xf32> to vector<4x128xf32>
    %218 = math.tanh %217 : vector<4x128xf32>
    %219 = vector.extract_strided_slice %204 {offsets = [0, 384], sizes = [4, 128], strides = [1, 1]} : vector<4x512xf32> to vector<4x128xf32>
    %220 = arith.negf %219 : vector<4x128xf32>
    %221 = math.exp %220 : vector<4x128xf32>
    %cst_50 = arith.constant 1.000000e+00 : f32
    %222 = vector.broadcast %cst_50 : f32 to vector<4x128xf32>
    %223 = arith.addf %222, %221 : vector<4x128xf32>
    %224 = arith.divf %222, %223 : vector<4x128xf32>
    %225 = arith.mulf %216, %200 : vector<4x128xf32>
    %226 = arith.mulf %210, %218 : vector<4x128xf32>
    %227 = arith.addf %225, %226 : vector<4x128xf32>
    %228 = math.tanh %227 : vector<4x128xf32>
    %229 = arith.mulf %224, %228 : vector<4x128xf32>
    %cst_51 = arith.constant dense<0.000000e+00> : vector<4x512xf32>
    %230 = tpu.matmul %229, %5, %cst_51 {dimension_numbers = #tpu.dot_dimension_numbers<[1], [0], [0], [1], [0, 0, 1, 1], [], []>} : vector<4x128xf32>, vector<128x512xf32>, vector<4x512xf32> -> vector<4x512xf32>
    %231 = arith.addf %110, %230 : vector<4x512xf32>
    %232 = vector.extract_strided_slice %231 {offsets = [0, 0], sizes = [4, 128], strides = [1, 1]} : vector<4x512xf32> to vector<4x128xf32>
    %233 = arith.negf %232 : vector<4x128xf32>
    %234 = math.exp %233 : vector<4x128xf32>
    %cst_52 = arith.constant 1.000000e+00 : f32
    %235 = vector.broadcast %cst_52 : f32 to vector<4x128xf32>
    %236 = arith.addf %235, %234 : vector<4x128xf32>
    %237 = arith.divf %235, %236 : vector<4x128xf32>
    %238 = vector.extract_strided_slice %231 {offsets = [0, 128], sizes = [4, 128], strides = [1, 1]} : vector<4x512xf32> to vector<4x128xf32>
    %239 = arith.negf %238 : vector<4x128xf32>
    %240 = math.exp %239 : vector<4x128xf32>
    %cst_53 = arith.constant 1.000000e+00 : f32
    %241 = vector.broadcast %cst_53 : f32 to vector<4x128xf32>
    %242 = arith.addf %241, %240 : vector<4x128xf32>
    %243 = arith.divf %241, %242 : vector<4x128xf32>
    %244 = vector.extract_strided_slice %231 {offsets = [0, 256], sizes = [4, 128], strides = [1, 1]} : vector<4x512xf32> to vector<4x128xf32>
    %245 = math.tanh %244 : vector<4x128xf32>
    %246 = vector.extract_strided_slice %231 {offsets = [0, 384], sizes = [4, 128], strides = [1, 1]} : vector<4x512xf32> to vector<4x128xf32>
    %247 = arith.negf %246 : vector<4x128xf32>
    %248 = math.exp %247 : vector<4x128xf32>
    %cst_54 = arith.constant 1.000000e+00 : f32
    %249 = vector.broadcast %cst_54 : f32 to vector<4x128xf32>
    %250 = arith.addf %249, %248 : vector<4x128xf32>
    %251 = arith.divf %249, %250 : vector<4x128xf32>
    %252 = arith.mulf %243, %227 : vector<4x128xf32>
    %253 = arith.mulf %237, %245 : vector<4x128xf32>
    %254 = arith.addf %252, %253 : vector<4x128xf32>
    %255 = math.tanh %254 : vector<4x128xf32>
    %256 = arith.mulf %251, %255 : vector<4x128xf32>
    %cst_55 = arith.constant dense<0.000000e+00> : vector<4x512xf32>
    %257 = tpu.matmul %256, %5, %cst_55 {dimension_numbers = #tpu.dot_dimension_numbers<[1], [0], [0], [1], [0, 0, 1, 1], [], []>} : vector<4x128xf32>, vector<128x512xf32>, vector<4x512xf32> -> vector<4x512xf32>
    %258 = arith.addf %119, %257 : vector<4x512xf32>
    %259 = vector.extract_strided_slice %258 {offsets = [0, 0], sizes = [4, 128], strides = [1, 1]} : vector<4x512xf32> to vector<4x128xf32>
    %260 = arith.negf %259 : vector<4x128xf32>
    %261 = math.exp %260 : vector<4x128xf32>
    %cst_56 = arith.constant 1.000000e+00 : f32
    %262 = vector.broadcast %cst_56 : f32 to vector<4x128xf32>
    %263 = arith.addf %262, %261 : vector<4x128xf32>
    %264 = arith.divf %262, %263 : vector<4x128xf32>
    %265 = vector.extract_strided_slice %258 {offsets = [0, 128], sizes = [4, 128], strides = [1, 1]} : vector<4x512xf32> to vector<4x128xf32>
    %266 = arith.negf %265 : vector<4x128xf32>
    %267 = math.exp %266 : vector<4x128xf32>
    %cst_57 = arith.constant 1.000000e+00 : f32
    %268 = vector.broadcast %cst_57 : f32 to vector<4x128xf32>
    %269 = arith.addf %268, %267 : vector<4x128xf32>
    %270 = arith.divf %268, %269 : vector<4x128xf32>
    %271 = vector.extract_strided_slice %258 {offsets = [0, 256], sizes = [4, 128], strides = [1, 1]} : vector<4x512xf32> to vector<4x128xf32>
    %272 = math.tanh %271 : vector<4x128xf32>
    %273 = vector.extract_strided_slice %258 {offsets = [0, 384], sizes = [4, 128], strides = [1, 1]} : vector<4x512xf32> to vector<4x128xf32>
    %274 = arith.negf %273 : vector<4x128xf32>
    %275 = math.exp %274 : vector<4x128xf32>
    %cst_58 = arith.constant 1.000000e+00 : f32
    %276 = vector.broadcast %cst_58 : f32 to vector<4x128xf32>
    %277 = arith.addf %276, %275 : vector<4x128xf32>
    %278 = arith.divf %276, %277 : vector<4x128xf32>
    %279 = arith.mulf %270, %254 : vector<4x128xf32>
    %280 = arith.mulf %264, %272 : vector<4x128xf32>
    %281 = arith.addf %279, %280 : vector<4x128xf32>
    %282 = math.tanh %281 : vector<4x128xf32>
    %283 = arith.mulf %278, %282 : vector<4x128xf32>
    %cst_59 = arith.constant dense<0.000000e+00> : vector<4x512xf32>
    %284 = tpu.matmul %283, %5, %cst_59 {dimension_numbers = #tpu.dot_dimension_numbers<[1], [0], [0], [1], [0, 0, 1, 1], [], []>} : vector<4x128xf32>, vector<128x512xf32>, vector<4x512xf32> -> vector<4x512xf32>
    %285 = arith.addf %128, %284 : vector<4x512xf32>
    %286 = vector.extract_strided_slice %285 {offsets = [0, 0], sizes = [4, 128], strides = [1, 1]} : vector<4x512xf32> to vector<4x128xf32>
    %287 = arith.negf %286 : vector<4x128xf32>
    %288 = math.exp %287 : vector<4x128xf32>
    %cst_60 = arith.constant 1.000000e+00 : f32
    %289 = vector.broadcast %cst_60 : f32 to vector<4x128xf32>
    %290 = arith.addf %289, %288 : vector<4x128xf32>
    %291 = arith.divf %289, %290 : vector<4x128xf32>
    %292 = vector.extract_strided_slice %285 {offsets = [0, 128], sizes = [4, 128], strides = [1, 1]} : vector<4x512xf32> to vector<4x128xf32>
    %293 = arith.negf %292 : vector<4x128xf32>
    %294 = math.exp %293 : vector<4x128xf32>
    %cst_61 = arith.constant 1.000000e+00 : f32
    %295 = vector.broadcast %cst_61 : f32 to vector<4x128xf32>
    %296 = arith.addf %295, %294 : vector<4x128xf32>
    %297 = arith.divf %295, %296 : vector<4x128xf32>
    %298 = vector.extract_strided_slice %285 {offsets = [0, 256], sizes = [4, 128], strides = [1, 1]} : vector<4x512xf32> to vector<4x128xf32>
    %299 = math.tanh %298 : vector<4x128xf32>
    %300 = vector.extract_strided_slice %285 {offsets = [0, 384], sizes = [4, 128], strides = [1, 1]} : vector<4x512xf32> to vector<4x128xf32>
    %301 = arith.negf %300 : vector<4x128xf32>
    %302 = math.exp %301 : vector<4x128xf32>
    %cst_62 = arith.constant 1.000000e+00 : f32
    %303 = vector.broadcast %cst_62 : f32 to vector<4x128xf32>
    %304 = arith.addf %303, %302 : vector<4x128xf32>
    %305 = arith.divf %303, %304 : vector<4x128xf32>
    %306 = arith.mulf %297, %281 : vector<4x128xf32>
    %307 = arith.mulf %291, %299 : vector<4x128xf32>
    %308 = arith.addf %306, %307 : vector<4x128xf32>
    %309 = math.tanh %308 : vector<4x128xf32>
    %310 = arith.mulf %305, %309 : vector<4x128xf32>
    %cst_63 = arith.constant dense<0.000000e+00> : vector<4x512xf32>
    %311 = tpu.matmul %310, %5, %cst_63 {dimension_numbers = #tpu.dot_dimension_numbers<[1], [0], [0], [1], [0, 0, 1, 1], [], []>} : vector<4x128xf32>, vector<128x512xf32>, vector<4x512xf32> -> vector<4x512xf32>
    %312 = arith.addf %137, %311 : vector<4x512xf32>
    %313 = vector.extract_strided_slice %312 {offsets = [0, 0], sizes = [4, 128], strides = [1, 1]} : vector<4x512xf32> to vector<4x128xf32>
    %314 = arith.negf %313 : vector<4x128xf32>
    %315 = math.exp %314 : vector<4x128xf32>
    %cst_64 = arith.constant 1.000000e+00 : f32
    %316 = vector.broadcast %cst_64 : f32 to vector<4x128xf32>
    %317 = arith.addf %316, %315 : vector<4x128xf32>
    %318 = arith.divf %316, %317 : vector<4x128xf32>
    %319 = vector.extract_strided_slice %312 {offsets = [0, 128], sizes = [4, 128], strides = [1, 1]} : vector<4x512xf32> to vector<4x128xf32>
    %320 = arith.negf %319 : vector<4x128xf32>
    %321 = math.exp %320 : vector<4x128xf32>
    %cst_65 = arith.constant 1.000000e+00 : f32
    %322 = vector.broadcast %cst_65 : f32 to vector<4x128xf32>
    %323 = arith.addf %322, %321 : vector<4x128xf32>
    %324 = arith.divf %322, %323 : vector<4x128xf32>
    %325 = vector.extract_strided_slice %312 {offsets = [0, 256], sizes = [4, 128], strides = [1, 1]} : vector<4x512xf32> to vector<4x128xf32>
    %326 = math.tanh %325 : vector<4x128xf32>
    %327 = vector.extract_strided_slice %312 {offsets = [0, 384], sizes = [4, 128], strides = [1, 1]} : vector<4x512xf32> to vector<4x128xf32>
    %328 = arith.negf %327 : vector<4x128xf32>
    %329 = math.exp %328 : vector<4x128xf32>
    %cst_66 = arith.constant 1.000000e+00 : f32
    %330 = vector.broadcast %cst_66 : f32 to vector<4x128xf32>
    %331 = arith.addf %330, %329 : vector<4x128xf32>
    %332 = arith.divf %330, %331 : vector<4x128xf32>
    %333 = arith.mulf %324, %308 : vector<4x128xf32>
    %334 = arith.mulf %318, %326 : vector<4x128xf32>
    %335 = arith.addf %333, %334 : vector<4x128xf32>
    %336 = math.tanh %335 : vector<4x128xf32>
    %337 = arith.mulf %332, %336 : vector<4x128xf32>
    %cst_67 = arith.constant dense<0.000000e+00> : vector<4x512xf32>
    %338 = tpu.matmul %337, %5, %cst_67 {dimension_numbers = #tpu.dot_dimension_numbers<[1], [0], [0], [1], [0, 0, 1, 1], [], []>} : vector<4x128xf32>, vector<128x512xf32>, vector<4x512xf32> -> vector<4x512xf32>
    %339 = arith.addf %146, %338 : vector<4x512xf32>
    %340 = vector.extract_strided_slice %339 {offsets = [0, 0], sizes = [4, 128], strides = [1, 1]} : vector<4x512xf32> to vector<4x128xf32>
    %341 = arith.negf %340 : vector<4x128xf32>
    %342 = math.exp %341 : vector<4x128xf32>
    %cst_68 = arith.constant 1.000000e+00 : f32
    %343 = vector.broadcast %cst_68 : f32 to vector<4x128xf32>
    %344 = arith.addf %343, %342 : vector<4x128xf32>
    %345 = arith.divf %343, %344 : vector<4x128xf32>
    %346 = vector.extract_strided_slice %339 {offsets = [0, 128], sizes = [4, 128], strides = [1, 1]} : vector<4x512xf32> to vector<4x128xf32>
    %347 = arith.negf %346 : vector<4x128xf32>
    %348 = math.exp %347 : vector<4x128xf32>
    %cst_69 = arith.constant 1.000000e+00 : f32
    %349 = vector.broadcast %cst_69 : f32 to vector<4x128xf32>
    %350 = arith.addf %349, %348 : vector<4x128xf32>
    %351 = arith.divf %349, %350 : vector<4x128xf32>
    %352 = vector.extract_strided_slice %339 {offsets = [0, 256], sizes = [4, 128], strides = [1, 1]} : vector<4x512xf32> to vector<4x128xf32>
    %353 = math.tanh %352 : vector<4x128xf32>
    %354 = vector.extract_strided_slice %339 {offsets = [0, 384], sizes = [4, 128], strides = [1, 1]} : vector<4x512xf32> to vector<4x128xf32>
    %355 = arith.negf %354 : vector<4x128xf32>
    %356 = math.exp %355 : vector<4x128xf32>
    %cst_70 = arith.constant 1.000000e+00 : f32
    %357 = vector.broadcast %cst_70 : f32 to vector<4x128xf32>
    %358 = arith.addf %357, %356 : vector<4x128xf32>
    %359 = arith.divf %357, %358 : vector<4x128xf32>
    %360 = arith.mulf %351, %335 : vector<4x128xf32>
    %361 = arith.mulf %345, %353 : vector<4x128xf32>
    %362 = arith.addf %360, %361 : vector<4x128xf32>
    %363 = math.tanh %362 : vector<4x128xf32>
    %364 = arith.mulf %359, %363 : vector<4x128xf32>
    %cst_71 = arith.constant dense<0.000000e+00> : vector<4x2xf32>
    %365 = tpu.matmul %364, %7, %cst_71 {dimension_numbers = #tpu.dot_dimension_numbers<[1], [0], [0], [1], [0, 0, 1, 1], [], []>} : vector<4x128xf32>, vector<128x2xf32>, vector<4x2xf32> -> vector<4x2xf32>
    %366 = arith.addf %365, %13 : vector<4x2xf32>
    %367 = arith.addf %366, %0 : vector<4x2xf32>
    %368 = vector.extract_strided_slice %366 {offsets = [0, 0], sizes = [4, 1], strides = [1, 1]} : vector<4x2xf32> to vector<4x1xf32>
    %369 = vector.extract_strided_slice %366 {offsets = [0, 1], sizes = [4, 1], strides = [1, 1]} : vector<4x2xf32> to vector<4x1xf32>
    %370 = vector.broadcast %368 : vector<4x1xf32> to vector<4x16xf32>
    %371 = arith.subf %1, %370 : vector<4x16xf32>
    %372 = vector.broadcast %369 : vector<4x1xf32> to vector<4x16xf32>
    %373 = arith.subf %2, %372 : vector<4x16xf32>
    %374 = arith.mulf %371, %371 : vector<4x16xf32>
    %375 = arith.mulf %373, %373 : vector<4x16xf32>
    %376 = arith.addf %374, %375 : vector<4x16xf32>
    %377 = tpu.iota {dimensions = array<i32: 1>} : vector<4x16xi32>
    %cst_72 = arith.constant dense<0x7F800000> : vector<4xf32>
    %378 = vector.multi_reduction <minimumf>, %376, %cst_72 [1] : vector<4x16xf32> to vector<4xf32>
    %379 = vector.shape_cast %378 : vector<4xf32> to vector<4x1xf32>
    %380 = vector.broadcast %379 : vector<4x1xf32> to vector<4x16xf32>
    %381 = arith.cmpf ole, %376, %380 : vector<4x16xf32>
    %c16_i32_73 = arith.constant 16 : i32
    %382 = vector.broadcast %c16_i32_73 : i32 to vector<4x16xi32>
    %383 = arith.select %381, %377, %382 : vector<4x16xi1>, vector<4x16xi32>
    %cst_74 = arith.constant dense<2147483647> : vector<4xi32>
    %384 = vector.multi_reduction <minsi>, %383, %cst_74 [1] : vector<4x16xi32> to vector<4xi32>
    %385 = vector.shape_cast %384 : vector<4xi32> to vector<4x1xi32>
    %386 = vector.broadcast %385 : vector<4x1xi32> to vector<4x16xi32>
    %387 = arith.cmpi eq, %377, %386 : vector<4x16xi32>
    %388 = arith.extui %387 : vector<4x16xi1> to vector<4x16xi32>
    %389 = arith.sitofp %388 : vector<4x16xi32> to vector<4x16xf32>
    %390 = arith.mulf %389, %1 : vector<4x16xf32>
    %cst_75 = arith.constant dense<0.000000e+00> : vector<4xf32>
    %391 = vector.multi_reduction <add>, %390, %cst_75 [1] : vector<4x16xf32> to vector<4xf32>
    %392 = vector.shape_cast %391 : vector<4xf32> to vector<4x1xf32>
    %393 = arith.mulf %389, %2 : vector<4x16xf32>
    %cst_76 = arith.constant dense<0.000000e+00> : vector<4xf32>
    %394 = vector.multi_reduction <add>, %393, %cst_76 [1] : vector<4x16xf32> to vector<4xf32>
    %395 = vector.shape_cast %394 : vector<4xf32> to vector<4x1xf32>
    %396 = arith.mulf %389, %3 : vector<4x16xf32>
    %cst_77 = arith.constant dense<0.000000e+00> : vector<4xf32>
    %397 = vector.multi_reduction <add>, %396, %cst_77 [1] : vector<4x16xf32> to vector<4xf32>
    %398 = vector.shape_cast %397 : vector<4xf32> to vector<4x1xf32>
    %399 = arith.mulf %389, %4 : vector<4x16xf32>
    %cst_78 = arith.constant dense<0.000000e+00> : vector<4xf32>
    %400 = vector.multi_reduction <add>, %399, %cst_78 [1] : vector<4x16xf32> to vector<4xf32>
    %401 = vector.shape_cast %400 : vector<4xf32> to vector<4x1xf32>
    %402 = tpu.concatenate %392, %395 in 1 : vector<4x1xf32>, vector<4x1xf32> -> vector<4x2xf32>
    %403 = tpu.concatenate %398, %401 in 1 : vector<4x1xf32>, vector<4x1xf32> -> vector<4x2xf32>
    %cst_79 = arith.constant 5.000000e-01 : f32
    %404 = vector.broadcast %cst_79 : f32 to vector<4x2xf32>
    %405 = arith.mulf %404, %403 : vector<4x2xf32>
    %406 = arith.subf %402, %405 : vector<4x2xf32>
    %407 = arith.subf %406, %0 : vector<4x2xf32>
    %cst_80 = arith.constant 5.000000e-01 : f32
    %408 = vector.broadcast %cst_80 : f32 to vector<4x2xf32>
    %409 = arith.mulf %408, %403 : vector<4x2xf32>
    %410 = arith.addf %402, %409 : vector<4x2xf32>
    %411 = arith.subf %410, %0 : vector<4x2xf32>
    %412 = tpu.concatenate %366, %407, %411 in 1 : vector<4x2xf32>, vector<4x2xf32>, vector<4x2xf32> -> vector<4x6xf32>
    %cst_81 = arith.constant dense<0.000000e+00> : vector<4x512xf32>
    %413 = tpu.matmul %364, %5, %cst_81 {dimension_numbers = #tpu.dot_dimension_numbers<[1], [0], [0], [1], [0, 0, 1, 1], [], []>} : vector<4x128xf32>, vector<128x512xf32>, vector<4x512xf32> -> vector<4x512xf32>
    %cst_82 = arith.constant dense<0.000000e+00> : vector<4x512xf32>
    %414 = tpu.matmul %412, %6, %cst_82 {dimension_numbers = #tpu.dot_dimension_numbers<[1], [0], [0], [1], [0, 0, 1, 1], [], []>} : vector<4x6xf32>, vector<6x512xf32>, vector<4x512xf32> -> vector<4x512xf32>
    %415 = arith.addf %413, %414 : vector<4x512xf32>
    %416 = arith.addf %415, %10 : vector<4x512xf32>
    %417 = vector.extract_strided_slice %416 {offsets = [0, 0], sizes = [4, 128], strides = [1, 1]} : vector<4x512xf32> to vector<4x128xf32>
    %418 = arith.negf %417 : vector<4x128xf32>
    %419 = math.exp %418 : vector<4x128xf32>
    %cst_83 = arith.constant 1.000000e+00 : f32
    %420 = vector.broadcast %cst_83 : f32 to vector<4x128xf32>
    %421 = arith.addf %420, %419 : vector<4x128xf32>
    %422 = arith.divf %420, %421 : vector<4x128xf32>
    %423 = vector.extract_strided_slice %416 {offsets = [0, 128], sizes = [4, 128], strides = [1, 1]} : vector<4x512xf32> to vector<4x128xf32>
    %424 = arith.negf %423 : vector<4x128xf32>
    %425 = math.exp %424 : vector<4x128xf32>
    %cst_84 = arith.constant 1.000000e+00 : f32
    %426 = vector.broadcast %cst_84 : f32 to vector<4x128xf32>
    %427 = arith.addf %426, %425 : vector<4x128xf32>
    %428 = arith.divf %426, %427 : vector<4x128xf32>
    %429 = vector.extract_strided_slice %416 {offsets = [0, 256], sizes = [4, 128], strides = [1, 1]} : vector<4x512xf32> to vector<4x128xf32>
    %430 = math.tanh %429 : vector<4x128xf32>
    %431 = vector.extract_strided_slice %416 {offsets = [0, 384], sizes = [4, 128], strides = [1, 1]} : vector<4x512xf32> to vector<4x128xf32>
    %432 = arith.negf %431 : vector<4x128xf32>
    %433 = math.exp %432 : vector<4x128xf32>
    %cst_85 = arith.constant 1.000000e+00 : f32
    %434 = vector.broadcast %cst_85 : f32 to vector<4x128xf32>
    %435 = arith.addf %434, %433 : vector<4x128xf32>
    %436 = arith.divf %434, %435 : vector<4x128xf32>
    %437 = arith.mulf %428, %362 : vector<4x128xf32>
    %438 = arith.mulf %422, %430 : vector<4x128xf32>
    %439 = arith.addf %437, %438 : vector<4x128xf32>
    %440 = math.tanh %439 : vector<4x128xf32>
    %441 = arith.mulf %436, %440 : vector<4x128xf32>
    %cst_86 = arith.constant dense<0.000000e+00> : vector<4x2xf32>
    %442 = tpu.matmul %441, %7, %cst_86 {dimension_numbers = #tpu.dot_dimension_numbers<[1], [0], [0], [1], [0, 0, 1, 1], [], []>} : vector<4x128xf32>, vector<128x2xf32>, vector<4x2xf32> -> vector<4x2xf32>
    %443 = arith.addf %442, %13 : vector<4x2xf32>
    %444 = arith.addf %443, %0 : vector<4x2xf32>
    %445 = vector.extract_strided_slice %443 {offsets = [0, 0], sizes = [4, 1], strides = [1, 1]} : vector<4x2xf32> to vector<4x1xf32>
    %446 = vector.extract_strided_slice %443 {offsets = [0, 1], sizes = [4, 1], strides = [1, 1]} : vector<4x2xf32> to vector<4x1xf32>
    %447 = vector.broadcast %445 : vector<4x1xf32> to vector<4x16xf32>
    %448 = arith.subf %1, %447 : vector<4x16xf32>
    %449 = vector.broadcast %446 : vector<4x1xf32> to vector<4x16xf32>
    %450 = arith.subf %2, %449 : vector<4x16xf32>
    %451 = arith.mulf %448, %448 : vector<4x16xf32>
    %452 = arith.mulf %450, %450 : vector<4x16xf32>
    %453 = arith.addf %451, %452 : vector<4x16xf32>
    %454 = tpu.iota {dimensions = array<i32: 1>} : vector<4x16xi32>
    %cst_87 = arith.constant dense<0x7F800000> : vector<4xf32>
    %455 = vector.multi_reduction <minimumf>, %453, %cst_87 [1] : vector<4x16xf32> to vector<4xf32>
    %456 = vector.shape_cast %455 : vector<4xf32> to vector<4x1xf32>
    %457 = vector.broadcast %456 : vector<4x1xf32> to vector<4x16xf32>
    %458 = arith.cmpf ole, %453, %457 : vector<4x16xf32>
    %c16_i32_88 = arith.constant 16 : i32
    %459 = vector.broadcast %c16_i32_88 : i32 to vector<4x16xi32>
    %460 = arith.select %458, %454, %459 : vector<4x16xi1>, vector<4x16xi32>
    %cst_89 = arith.constant dense<2147483647> : vector<4xi32>
    %461 = vector.multi_reduction <minsi>, %460, %cst_89 [1] : vector<4x16xi32> to vector<4xi32>
    %462 = vector.shape_cast %461 : vector<4xi32> to vector<4x1xi32>
    %463 = vector.broadcast %462 : vector<4x1xi32> to vector<4x16xi32>
    %464 = arith.cmpi eq, %454, %463 : vector<4x16xi32>
    %465 = arith.extui %464 : vector<4x16xi1> to vector<4x16xi32>
    %466 = arith.sitofp %465 : vector<4x16xi32> to vector<4x16xf32>
    %467 = arith.mulf %466, %1 : vector<4x16xf32>
    %cst_90 = arith.constant dense<0.000000e+00> : vector<4xf32>
    %468 = vector.multi_reduction <add>, %467, %cst_90 [1] : vector<4x16xf32> to vector<4xf32>
    %469 = vector.shape_cast %468 : vector<4xf32> to vector<4x1xf32>
    %470 = arith.mulf %466, %2 : vector<4x16xf32>
    %cst_91 = arith.constant dense<0.000000e+00> : vector<4xf32>
    %471 = vector.multi_reduction <add>, %470, %cst_91 [1] : vector<4x16xf32> to vector<4xf32>
    %472 = vector.shape_cast %471 : vector<4xf32> to vector<4x1xf32>
    %473 = arith.mulf %466, %3 : vector<4x16xf32>
    %cst_92 = arith.constant dense<0.000000e+00> : vector<4xf32>
    %474 = vector.multi_reduction <add>, %473, %cst_92 [1] : vector<4x16xf32> to vector<4xf32>
    %475 = vector.shape_cast %474 : vector<4xf32> to vector<4x1xf32>
    %476 = arith.mulf %466, %4 : vector<4x16xf32>
    %cst_93 = arith.constant dense<0.000000e+00> : vector<4xf32>
    %477 = vector.multi_reduction <add>, %476, %cst_93 [1] : vector<4x16xf32> to vector<4xf32>
    %478 = vector.shape_cast %477 : vector<4xf32> to vector<4x1xf32>
    %479 = tpu.concatenate %469, %472 in 1 : vector<4x1xf32>, vector<4x1xf32> -> vector<4x2xf32>
    %480 = tpu.concatenate %475, %478 in 1 : vector<4x1xf32>, vector<4x1xf32> -> vector<4x2xf32>
    %cst_94 = arith.constant 5.000000e-01 : f32
    %481 = vector.broadcast %cst_94 : f32 to vector<4x2xf32>
    %482 = arith.mulf %481, %480 : vector<4x2xf32>
    %483 = arith.subf %479, %482 : vector<4x2xf32>
    %484 = arith.subf %483, %0 : vector<4x2xf32>
    %cst_95 = arith.constant 5.000000e-01 : f32
    %485 = vector.broadcast %cst_95 : f32 to vector<4x2xf32>
    %486 = arith.mulf %485, %480 : vector<4x2xf32>
    %487 = arith.addf %479, %486 : vector<4x2xf32>
    %488 = arith.subf %487, %0 : vector<4x2xf32>
    %489 = tpu.concatenate %443, %484, %488 in 1 : vector<4x2xf32>, vector<4x2xf32>, vector<4x2xf32> -> vector<4x6xf32>
    %cst_96 = arith.constant dense<0.000000e+00> : vector<4x512xf32>
    %490 = tpu.matmul %441, %5, %cst_96 {dimension_numbers = #tpu.dot_dimension_numbers<[1], [0], [0], [1], [0, 0, 1, 1], [], []>} : vector<4x128xf32>, vector<128x512xf32>, vector<4x512xf32> -> vector<4x512xf32>
    %cst_97 = arith.constant dense<0.000000e+00> : vector<4x512xf32>
    %491 = tpu.matmul %489, %6, %cst_97 {dimension_numbers = #tpu.dot_dimension_numbers<[1], [0], [0], [1], [0, 0, 1, 1], [], []>} : vector<4x6xf32>, vector<6x512xf32>, vector<4x512xf32> -> vector<4x512xf32>
    %492 = arith.addf %490, %491 : vector<4x512xf32>
    %493 = arith.addf %492, %10 : vector<4x512xf32>
    %494 = vector.extract_strided_slice %493 {offsets = [0, 0], sizes = [4, 128], strides = [1, 1]} : vector<4x512xf32> to vector<4x128xf32>
    %495 = arith.negf %494 : vector<4x128xf32>
    %496 = math.exp %495 : vector<4x128xf32>
    %cst_98 = arith.constant 1.000000e+00 : f32
    %497 = vector.broadcast %cst_98 : f32 to vector<4x128xf32>
    %498 = arith.addf %497, %496 : vector<4x128xf32>
    %499 = arith.divf %497, %498 : vector<4x128xf32>
    %500 = vector.extract_strided_slice %493 {offsets = [0, 128], sizes = [4, 128], strides = [1, 1]} : vector<4x512xf32> to vector<4x128xf32>
    %501 = arith.negf %500 : vector<4x128xf32>
    %502 = math.exp %501 : vector<4x128xf32>
    %cst_99 = arith.constant 1.000000e+00 : f32
    %503 = vector.broadcast %cst_99 : f32 to vector<4x128xf32>
    %504 = arith.addf %503, %502 : vector<4x128xf32>
    %505 = arith.divf %503, %504 : vector<4x128xf32>
    %506 = vector.extract_strided_slice %493 {offsets = [0, 256], sizes = [4, 128], strides = [1, 1]} : vector<4x512xf32> to vector<4x128xf32>
    %507 = math.tanh %506 : vector<4x128xf32>
    %508 = vector.extract_strided_slice %493 {offsets = [0, 384], sizes = [4, 128], strides = [1, 1]} : vector<4x512xf32> to vector<4x128xf32>
    %509 = arith.negf %508 : vector<4x128xf32>
    %510 = math.exp %509 : vector<4x128xf32>
    %cst_100 = arith.constant 1.000000e+00 : f32
    %511 = vector.broadcast %cst_100 : f32 to vector<4x128xf32>
    %512 = arith.addf %511, %510 : vector<4x128xf32>
    %513 = arith.divf %511, %512 : vector<4x128xf32>
    %514 = arith.mulf %505, %439 : vector<4x128xf32>
    %515 = arith.mulf %499, %507 : vector<4x128xf32>
    %516 = arith.addf %514, %515 : vector<4x128xf32>
    %517 = math.tanh %516 : vector<4x128xf32>
    %518 = arith.mulf %513, %517 : vector<4x128xf32>
    %cst_101 = arith.constant dense<0.000000e+00> : vector<4x2xf32>
    %519 = tpu.matmul %518, %7, %cst_101 {dimension_numbers = #tpu.dot_dimension_numbers<[1], [0], [0], [1], [0, 0, 1, 1], [], []>} : vector<4x128xf32>, vector<128x2xf32>, vector<4x2xf32> -> vector<4x2xf32>
    %520 = arith.addf %519, %13 : vector<4x2xf32>
    %521 = arith.addf %520, %0 : vector<4x2xf32>
    %522 = vector.extract_strided_slice %520 {offsets = [0, 0], sizes = [4, 1], strides = [1, 1]} : vector<4x2xf32> to vector<4x1xf32>
    %523 = vector.extract_strided_slice %520 {offsets = [0, 1], sizes = [4, 1], strides = [1, 1]} : vector<4x2xf32> to vector<4x1xf32>
    %524 = vector.broadcast %522 : vector<4x1xf32> to vector<4x16xf32>
    %525 = arith.subf %1, %524 : vector<4x16xf32>
    %526 = vector.broadcast %523 : vector<4x1xf32> to vector<4x16xf32>
    %527 = arith.subf %2, %526 : vector<4x16xf32>
    %528 = arith.mulf %525, %525 : vector<4x16xf32>
    %529 = arith.mulf %527, %527 : vector<4x16xf32>
    %530 = arith.addf %528, %529 : vector<4x16xf32>
    %531 = tpu.iota {dimensions = array<i32: 1>} : vector<4x16xi32>
    %cst_102 = arith.constant dense<0x7F800000> : vector<4xf32>
    %532 = vector.multi_reduction <minimumf>, %530, %cst_102 [1] : vector<4x16xf32> to vector<4xf32>
    %533 = vector.shape_cast %532 : vector<4xf32> to vector<4x1xf32>
    %534 = vector.broadcast %533 : vector<4x1xf32> to vector<4x16xf32>
    %535 = arith.cmpf ole, %530, %534 : vector<4x16xf32>
    %c16_i32_103 = arith.constant 16 : i32
    %536 = vector.broadcast %c16_i32_103 : i32 to vector<4x16xi32>
    %537 = arith.select %535, %531, %536 : vector<4x16xi1>, vector<4x16xi32>
    %cst_104 = arith.constant dense<2147483647> : vector<4xi32>
    %538 = vector.multi_reduction <minsi>, %537, %cst_104 [1] : vector<4x16xi32> to vector<4xi32>
    %539 = vector.shape_cast %538 : vector<4xi32> to vector<4x1xi32>
    %540 = vector.broadcast %539 : vector<4x1xi32> to vector<4x16xi32>
    %541 = arith.cmpi eq, %531, %540 : vector<4x16xi32>
    %542 = arith.extui %541 : vector<4x16xi1> to vector<4x16xi32>
    %543 = arith.sitofp %542 : vector<4x16xi32> to vector<4x16xf32>
    %544 = arith.mulf %543, %1 : vector<4x16xf32>
    %cst_105 = arith.constant dense<0.000000e+00> : vector<4xf32>
    %545 = vector.multi_reduction <add>, %544, %cst_105 [1] : vector<4x16xf32> to vector<4xf32>
    %546 = vector.shape_cast %545 : vector<4xf32> to vector<4x1xf32>
    %547 = arith.mulf %543, %2 : vector<4x16xf32>
    %cst_106 = arith.constant dense<0.000000e+00> : vector<4xf32>
    %548 = vector.multi_reduction <add>, %547, %cst_106 [1] : vector<4x16xf32> to vector<4xf32>
    %549 = vector.shape_cast %548 : vector<4xf32> to vector<4x1xf32>
    %550 = arith.mulf %543, %3 : vector<4x16xf32>
    %cst_107 = arith.constant dense<0.000000e+00> : vector<4xf32>
    %551 = vector.multi_reduction <add>, %550, %cst_107 [1] : vector<4x16xf32> to vector<4xf32>
    %552 = vector.shape_cast %551 : vector<4xf32> to vector<4x1xf32>
    %553 = arith.mulf %543, %4 : vector<4x16xf32>
    %cst_108 = arith.constant dense<0.000000e+00> : vector<4xf32>
    %554 = vector.multi_reduction <add>, %553, %cst_108 [1] : vector<4x16xf32> to vector<4xf32>
    %555 = vector.shape_cast %554 : vector<4xf32> to vector<4x1xf32>
    %556 = tpu.concatenate %546, %549 in 1 : vector<4x1xf32>, vector<4x1xf32> -> vector<4x2xf32>
    %557 = tpu.concatenate %552, %555 in 1 : vector<4x1xf32>, vector<4x1xf32> -> vector<4x2xf32>
    %cst_109 = arith.constant 5.000000e-01 : f32
    %558 = vector.broadcast %cst_109 : f32 to vector<4x2xf32>
    %559 = arith.mulf %558, %557 : vector<4x2xf32>
    %560 = arith.subf %556, %559 : vector<4x2xf32>
    %561 = arith.subf %560, %0 : vector<4x2xf32>
    %cst_110 = arith.constant 5.000000e-01 : f32
    %562 = vector.broadcast %cst_110 : f32 to vector<4x2xf32>
    %563 = arith.mulf %562, %557 : vector<4x2xf32>
    %564 = arith.addf %556, %563 : vector<4x2xf32>
    %565 = arith.subf %564, %0 : vector<4x2xf32>
    %566 = tpu.concatenate %520, %561, %565 in 1 : vector<4x2xf32>, vector<4x2xf32>, vector<4x2xf32> -> vector<4x6xf32>
    %cst_111 = arith.constant dense<0.000000e+00> : vector<4x512xf32>
    %567 = tpu.matmul %518, %5, %cst_111 {dimension_numbers = #tpu.dot_dimension_numbers<[1], [0], [0], [1], [0, 0, 1, 1], [], []>} : vector<4x128xf32>, vector<128x512xf32>, vector<4x512xf32> -> vector<4x512xf32>
    %cst_112 = arith.constant dense<0.000000e+00> : vector<4x512xf32>
    %568 = tpu.matmul %566, %6, %cst_112 {dimension_numbers = #tpu.dot_dimension_numbers<[1], [0], [0], [1], [0, 0, 1, 1], [], []>} : vector<4x6xf32>, vector<6x512xf32>, vector<4x512xf32> -> vector<4x512xf32>
    %569 = arith.addf %567, %568 : vector<4x512xf32>
    %570 = arith.addf %569, %10 : vector<4x512xf32>
    %571 = vector.extract_strided_slice %570 {offsets = [0, 0], sizes = [4, 128], strides = [1, 1]} : vector<4x512xf32> to vector<4x128xf32>
    %572 = arith.negf %571 : vector<4x128xf32>
    %573 = math.exp %572 : vector<4x128xf32>
    %cst_113 = arith.constant 1.000000e+00 : f32
    %574 = vector.broadcast %cst_113 : f32 to vector<4x128xf32>
    %575 = arith.addf %574, %573 : vector<4x128xf32>
    %576 = arith.divf %574, %575 : vector<4x128xf32>
    %577 = vector.extract_strided_slice %570 {offsets = [0, 128], sizes = [4, 128], strides = [1, 1]} : vector<4x512xf32> to vector<4x128xf32>
    %578 = arith.negf %577 : vector<4x128xf32>
    %579 = math.exp %578 : vector<4x128xf32>
    %cst_114 = arith.constant 1.000000e+00 : f32
    %580 = vector.broadcast %cst_114 : f32 to vector<4x128xf32>
    %581 = arith.addf %580, %579 : vector<4x128xf32>
    %582 = arith.divf %580, %581 : vector<4x128xf32>
    %583 = vector.extract_strided_slice %570 {offsets = [0, 256], sizes = [4, 128], strides = [1, 1]} : vector<4x512xf32> to vector<4x128xf32>
    %584 = math.tanh %583 : vector<4x128xf32>
    %585 = vector.extract_strided_slice %570 {offsets = [0, 384], sizes = [4, 128], strides = [1, 1]} : vector<4x512xf32> to vector<4x128xf32>
    %586 = arith.negf %585 : vector<4x128xf32>
    %587 = math.exp %586 : vector<4x128xf32>
    %cst_115 = arith.constant 1.000000e+00 : f32
    %588 = vector.broadcast %cst_115 : f32 to vector<4x128xf32>
    %589 = arith.addf %588, %587 : vector<4x128xf32>
    %590 = arith.divf %588, %589 : vector<4x128xf32>
    %591 = arith.mulf %582, %516 : vector<4x128xf32>
    %592 = arith.mulf %576, %584 : vector<4x128xf32>
    %593 = arith.addf %591, %592 : vector<4x128xf32>
    %594 = math.tanh %593 : vector<4x128xf32>
    %595 = arith.mulf %590, %594 : vector<4x128xf32>
    %cst_116 = arith.constant dense<0.000000e+00> : vector<4x2xf32>
    %596 = tpu.matmul %595, %7, %cst_116 {dimension_numbers = #tpu.dot_dimension_numbers<[1], [0], [0], [1], [0, 0, 1, 1], [], []>} : vector<4x128xf32>, vector<128x2xf32>, vector<4x2xf32> -> vector<4x2xf32>
    %597 = arith.addf %596, %13 : vector<4x2xf32>
    %598 = arith.addf %597, %0 : vector<4x2xf32>
    %599 = tpu.concatenate %367, %444, %521, %598 in 1 : vector<4x2xf32>, vector<4x2xf32>, vector<4x2xf32>, vector<4x2xf32> -> vector<4x8xf32>
    %c0_117 = arith.constant 0 : index
    %c0_118 = arith.constant 0 : index
    %600 = vector.load %arg11[%c0_117, %c0_118] : memref<4x8xf32, #tpu.memory_space<vmem>>, vector<4x8xf32>
    tpu.vector_store %arg11[%c0_117, %c0_118], %599 {strides = array<i32>} : memref<4x8xf32, #tpu.memory_space<vmem>>, vector<4x8xf32>,
    return
  }
}

</mosaic_0001>

<bundles_post_ra>
// kernel: lstm_forward.1
= control target key start
LH: loop header
LB: loop body
LE: loop exit
PB: predicated region body
PF: predicated region fallthrough
CT: control target
= control target key end

     0   :  { %16 = vsyncpa [#allocation3], 0  ;;  %s4113_s20 = smov [#allocation2]   ;;  %s4114_s22 = smov 512   ;;  %s6218_s0 = inlined_call_operand.vmem [shape: f32[8,4,2], index: 0, kind: input, shape index: {}]   ;;  %s6219_s1 = inlined_call_operand.vmem [shape: f32[4,2], index: 1, kind: input, shape index: {}]   ;;  %s6220_s2 = inlined_call_operand.vmem [shape: f32[4,16], index: 2, kind: input, shape index: {}]   ;;  %s6221_s3 = inlined_call_operand.vmem [shape: f32[4,16], index: 3, kind: input, shape index: {}]   ;;  %s6222_s4 = inlined_call_operand.vmem [shape: f32[4,16], index: 4, kind: input, shape index: {}]   ;;  %s6223_s5 = inlined_call_operand.vmem [shape: f32[4,16], index: 5, kind: input, shape index: {}]   ;;  %s6224_s6 = inlined_call_operand.hbm [shape: f32[128,512], index: 6, kind: input, shape index: {}]   ;;  %s6225_s7 = inlined_call_operand.vmem [shape: f32[6,512], index: 7, kind: input, shape index: {}]   ;;  %s6226_s8 = inlined_call_operand.vmem [shape: f32[1,512], index: 8, kind: input, shape index: {}]   ;;  %s6227_s9 = inlined_call_operand.vmem [shape: f32[128,2], index: 9, kind: input, shape index: {}]   ;;  %s6228_s10 = inlined_call_operand.vmem [shape: f32[1,2], index: 10, kind: input, shape index: {}]   ;;  %s6229_s11 = inlined_call_operand.vmem [shape: f32[4,8], index: 11, kind: output, shape index: {}]  }
   0x1   :  { %s33_s19 = sshll.u32 %s6224_s6, 4  ;;  %s35_s21 = sshll.u32 %s4113_s20, 4  ;;  %s34_s19 = int_to_ptr.hbm [resolvable:$true] %s33_s19  ;;  %s36_s21 = int_to_ptr.vmem [resolvable:$true] %s35_s21 }
   0x2   :  { %s4115_s23 = smov 32  }
   0x3   :  { %41 = dma.hbm_to_vmem [thread:$0]  %s34_s19, 8192, %s36_s21, [#allocation3], %s4114_s22, %s4114_s22, %s4115_s23  }
   0x4   :  { %4111 = dma.done.wait [#allocation3], 8192  }
   0x5   :  { %4112 = vsyncadd [#allocation3], 4294959104  ;;  %v4116_v0 = vmov 1   ;;  %v4117_v1 = vmov 0   ;;  %v4188_v2 = vld [vmem:[%s6218_s0 + $0x8] sm:$0xf] }
   0x6   :  { %3732 = vset.pattern.permute.xlu0 %v4116_v0  ;;  %3736 = vset.pattern.permute.xlu2 %v4117_v1  ;;  %v4193_v3 = vld [vmem:[%s6218_s0 + $0x4] sm:$0xf]  ;;  %v4198_v4 = vld [vmem:[%s6218_s0] sm:$0xf]  ;;  %v161_v5 = vld [vmem:[%s6218_s0 + $0x10] sm:$0xf] }
   0x7   :  { %3734 = vset.pattern.permute.xlu1 %v4117_v1  ;;  %177 = vperm.xlu2 %3736, %v4188_v2   ;;  %v4212_v6 = vld [vmem:[%s6218_s0 + $0xc] sm:$0xf]  ;;  %v163_v7 = vld [vmem:[%s6218_s0 + $0x18] sm:$0xf]  ;;  %v162_v8 = vld [vmem:[%s6218_s0 + $0x14] sm:$0xf] }
   0x8   :  { %172 = vperm.xlu1 %3734, %v4193_v3   ;;  %214 = vperm.xlu0 %3732, %v4198_v4   ;;  %v164_v9 = vld [vmem:[%s6218_s0 + $0x1c] sm:$0xf]  ;;  %v4228_v11 = vld [vmem:[%s6220_s2] sm:$0xf]  ;;  %vm279_vm0 = vcmask 125952   ;;  %s4119_s29 = smov 4  }
   0x9   :  { %v4234_v13 = vld [vmem:[%s6221_s3] sm:$0xf]  ;;  %s4120_s30 = smov 2  }
   0xf   :  { %3737 = vset.pattern.permute.xlu2 %v4116_v0 }
  0x10   :  { %3735 = vset.pattern.permute.xlu1 %v4116_v0  ;;  %3733 = vset.pattern.permute.xlu0 %v4117_v1 }
  0x11   :  { %222 = vperm.xlu2 %3737, %v4188_v2   ;;  %218 = vperm.xlu1 %3735, %v4193_v3  }
  0x12   :  { %167 = vperm.xlu0 %3733, %v4198_v4  }
  0x19   :  { %226 = vperm.xlu2 %3737, %v4212_v6   ;;  %3738 = vset.pattern.permute.xlu1 %v4117_v1 }
  0x1a   :  { %187 = vperm.xlu0 %3733, %v161_v5   ;;  %182 = vperm.xlu1 %3738, %v4212_v6  }
  0x21   :  { %238 = vperm.xlu2 %3737, %v163_v7  }
  0x22   :  { %197 = vperm.xlu0 %3733, %v163_v7   ;;  %3739 = vset.pattern.permute.xlu1 %v4116_v0 }
  0x23   :  { %230 = vperm.xlu1 %3739, %v161_v5  }
  0x29   :  { %3742 = vset.pattern.permute.xlu2 %v4117_v1 }
  0x2a   :  { %3741 = vset.pattern.permute.xlu0 %v4116_v0  ;;  %202 = vperm.xlu2 %3742, %v164_v9  }
  0x2b   :  { %234 = vperm.xlu0 %3741, %v162_v8   ;;  %3740 = vset.pattern.permute.xlu1 %v4117_v1 }
  0x2c   :  { %192 = vperm.xlu1 %3740, %v162_v8  }
  0x34   :  { %3743 = vset.pattern.permute.xlu1 %v4116_v0 }
  0x35   :  { %242 = vperm.xlu1 %3743, %v164_v9  }
  0x3d   :  { %3744 = vset.pattern.permute.xlu1 %v4117_v1 }
  0x61   :  { %v178_v10 = vpop.permute.xlu2 %177 }
  0x62   :  { %v207_v12 = vsub.f32 %v4228_v11, %v178_v10 }
  0x64   :  { %v255_v15 = vmul.f32 %v207_v12, %v207_v12 }
  0x6b   :  { %v223_v14 = vpop.permute.xlu2 %222 }
  0x6c   :  { %v247_v16 = vsub.f32 %v4234_v13, %v223_v14 }
  0x6e   :  { %v263_v17 = vmul.f32 %v247_v16, %v247_v16 }
  0x70   :  { %v4237_v18 = vadd.f32 %v263_v17, %v255_v15 }
  0x72   :  { %v286_v19 = vsel %vm279_vm0, %v4237_v18, inf }
  0x73   :  { %287 = vmin.xlane.f32.xlu0 %v286_v19  ;;  %v227_v24 = vpop.permute.xlu2 %226  ;;  %v277_v19 = vlaneseq }
  0x74   :  { %v248_v35 = vsub.f32 %v4234_v13, %v227_v24 }
  0x76   :  { %v264_v40 = vmul.f32 %v248_v35, %v248_v35 }
  0x7a   :  { %v173_v20 = vpop.permute.xlu1 %172  ;;  %v215_v21 = vpop.permute.xlu0 %214 }
  0x7b   :  { %v206_v22 = vsub.f32 %v4228_v11, %v173_v20  ;;  %v245_v23 = vsub.f32 %v4234_v13, %v215_v21  ;;  %v239_v42 = vpop.permute.xlu2 %238  ;;  %v4265_v20 = vand.u32 127, %v277_v19 }
  0x7c   :  { %v251_v44 = vsub.f32 %v4234_v13, %v239_v42 }
  0x7d   :  { %v254_v27 = vmul.f32 %v206_v22, %v206_v22  ;;  %v261_v30 = vmul.f32 %v245_v23, %v245_v23  ;;  %6416 = vst [vmem:[#allocation5_spill] sm:$0xff] %v4265_v20 }
  0x7e   :  { %v267_v49 = vmul.f32 %v251_v44, %v251_v44 }
  0x83   :  { %v219_v25 = vpop.permute.xlu1 %218 }
  0x84   :  { %v168_v26 = vpop.permute.xlu0 %167  ;;  %v246_v28 = vsub.f32 %v4234_v13, %v219_v25  ;;  %v203_v5 = vpop.permute.xlu2 %202 }
  0x85   :  { %v205_v29 = vsub.f32 %v4228_v11, %v168_v26  ;;  %v212_v8 = vsub.f32 %v4228_v11, %v203_v5 }
  0x86   :  { %v262_v31 = vmul.f32 %v246_v28, %v246_v28 }
  0x87   :  { %v253_v32 = vmul.f32 %v205_v29, %v205_v29  ;;  %v260_v12 = vmul.f32 %v212_v8, %v212_v8 }
  0x88   :  { %v270_v33 = vadd.f32 %v262_v31, %v254_v27 }
  0x89   :  { %v269_v34 = vadd.f32 %v261_v30, %v253_v32 }
  0x8a   :  { %v283_v36 = vsel %vm279_vm0, %v270_v33, inf }
  0x8b   :  { %v280_v37 = vsel %vm279_vm0, %v269_v34, inf  ;;  %284 = vmin.xlane.f32.xlu1 %v283_v36 }
  0x8c   :  { %v188_v38 = vpop.permute.xlu0 %187  ;;  %281 = vmin.xlane.f32.xlu2 %v280_v37  ;;  %v183_v39 = vpop.permute.xlu1 %182 }
  0x8d   :  { %v208_v41 = vsub.f32 %v4228_v11, %v183_v39  ;;  %v209_v48 = vsub.f32 %v4228_v11, %v188_v38 }
  0x8f   :  { %v256_v43 = vmul.f32 %v208_v41, %v208_v41  ;;  %v257_v54 = vmul.f32 %v209_v48, %v209_v48 }
  0x91   :  { %v272_v45 = vadd.f32 %v264_v40, %v256_v43 }
  0x93   :  { %v289_v47 = vsel %vm279_vm0, %v272_v45, inf }
  0x94   :  { %v198_v46 = vpop.permute.xlu0 %197  ;;  %290 = vmin.xlane.f32.xlu1 %v289_v47 }
  0x95   :  { %v211_v50 = vsub.f32 %v4228_v11, %v198_v46  ;;  %v231_v51 = vpop.permute.xlu1 %230 }
  0x96   :  { %v249_v53 = vsub.f32 %v4234_v13, %v231_v51 }
  0x97   :  { %v259_v52 = vmul.f32 %v211_v50, %v211_v50 }
  0x98   :  { %v265_v55 = vmul.f32 %v249_v53, %v249_v53 }
  0x99   :  { %v4254_v56 = vadd.f32 %v267_v49, %v259_v52 }
  0x9a   :  { %v273_v58 = vadd.f32 %v265_v55, %v257_v54 }
  0x9b   :  { %v298_v57 = vsel %vm279_vm0, %v4254_v56, inf }
  0x9c   :  { %299 = vmin.xlane.f32.xlu0 %v298_v57  ;;  %v292_v59 = vsel %vm279_vm0, %v273_v58, inf }
  0x9d   :  { %v235_v60 = vpop.permute.xlu0 %234  ;;  %293 = vmin.xlane.f32.xlu2 %v292_v59 }
  0x9e   :  { %v250_v61 = vsub.f32 %v4234_v13, %v235_v60  ;;  %v193_v62 = vpop.permute.xlu1 %192 }
  0x9f   :  { %v210_v63 = vsub.f32 %v4228_v11, %v193_v62 }
  0xa0   :  { %v266_v0 = vmul.f32 %v250_v61, %v250_v61 }
  0xa1   :  { %v258_v1 = vmul.f32 %v210_v63, %v210_v63 }
  0xa3   :  { %v274_v7 = vadd.f32 %v266_v0, %v258_v1 }
  0xa5   :  { %v295_v9 = vsel %vm279_vm0, %v274_v7, inf }
  0xa6   :  { %296 = vmin.xlane.f32.xlu1 %v295_v9 }
  0xa7   :  { %v243_v10 = vpop.permute.xlu1 %242 }
  0xa8   :  { %v252_v14 = vsub.f32 %v4234_v13, %v243_v10 }
  0xaa   :  { %v268_v15 = vmul.f32 %v252_v14, %v252_v14 }
  0xac   :  { %v276_v16 = vadd.f32 %v268_v15, %v260_v12 }
  0xae   :  { %v301_v17 = vsel %vm279_vm0, %v276_v16, inf }
  0xaf   :  { %302 = vmin.xlane.f32.xlu2 %v301_v17 }
  0xe6   :  { %v288_v27 = vpop.xlane.xlu0 %287 }
  0xe7   :  { %vm306_vm3 = vcmp.le.f32.partialorder %v4237_v18, %v288_v27 }
  0xe8   :  { %v314_v31 = vsel %vm306_vm3, %v4265_v20, 16 }
  0xfe   :  { %v285_v21 = vpop.xlane.xlu1 %284 }
  0xff   :  { %v282_v22 = vpop.xlane.xlu2 %281  ;;  %vm305_vm1 = vcmp.le.f32.partialorder %v270_v33, %v285_v21 }
 0x100   :  { %vm304_vm2 = vcmp.le.f32.partialorder %v269_v34, %v282_v22  ;;  %v313_v25 = vsel %vm305_vm1, %v4265_v20, 16  ;;  %v350_v34 = vsel %vm279_vm0, %v314_v31, 2147483647 }
 0x101   :  { %v312_v23 = vsel %vm304_vm2, %v4265_v20, 16  ;;  %v335_v29 = vsel %vm279_vm0, %v313_v25, 2147483647  ;;  %v352_v36 = vshra.s32 %v350_v34, 16  ;;  %v351_v8 = vand.u32 65535, %v350_v34 }
 0x102   :  { %v320_v24 = vsel %vm279_vm0, %v312_v23, 2147483647  ;;  %v337_v30 = vshra.s32 %v335_v29, 16  ;;  %v336_v0 = vand.u32 65535, %v335_v29 }
 0x103   :  { %v322_v26 = vshra.s32 %v320_v24, 16  ;;  %v354_v18 = vcvt.s32.f32 %v352_v36  ;;  %v321_v60 = vand.u32 65535, %v320_v24  ;;  %v353_v10 = vcvt.s32.f32 %v351_v8 }
 0x104   :  { %v339_v33 = vcvt.s32.f32 %v337_v30  ;;  %v338_v5 = vcvt.s32.f32 %v336_v0 }
 0x105   :  { %v324_v28 = vcvt.s32.f32 %v322_v26  ;;  %v323_v62 = vcvt.s32.f32 %v321_v60 }
 0x107   :  { %325 = vmin.xlane.f32.xlu0 %v324_v28  ;;  %v291_v32 = vpop.xlane.xlu1 %290 }
 0x108   :  { %vm307_vm4 = vcmp.le.f32.partialorder %v272_v45, %v291_v32 }
 0x109   :  { %v315_v37 = vsel %vm307_vm4, %v4265_v20, 16 }
 0x10a   :  { %v365_v42 = vsel %vm279_vm0, %v315_v37, 2147483647 }
 0x10b   :  { %v367_v44 = vshra.s32 %v365_v42, 16  ;;  %v366_v15 = vand.u32 65535, %v365_v42  ;;  %v4311_v42 = vld [vmem:[%s6223_s5] sm:$0xf] }
 0x10d   :  { %v369_v49 = vcvt.s32.f32 %v367_v44  ;;  %v368_v19 = vcvt.s32.f32 %v366_v15 }
 0x10f   :  { %340 = vmin.xlane.f32.xlu0 %v339_v33  ;;  %v300_v40 = vpop.xlane.xlu0 %299 }
 0x110   :  { %v294_v35 = vpop.xlane.xlu2 %293  ;;  %vm310_vm6 = vcmp.le.f32.partialorder %v4254_v56, %v300_v40 }
 0x111   :  { %vm308_vm5 = vcmp.le.f32.partialorder %v273_v58, %v294_v35  ;;  %v318_v46 = vsel %vm310_vm6, %v4265_v20, 16 }
 0x112   :  { %v316_v38 = vsel %vm308_vm5, %v4265_v20, 16  ;;  %v410_v50 = vsel %vm279_vm0, %v318_v46, 2147483647 }
 0x113   :  { %v380_v39 = vsel %vm279_vm0, %v316_v38, 2147483647  ;;  %v412_v53 = vshra.s32 %v410_v50, 16  ;;  %v411_v25 = vand.u32 65535, %v410_v50 }
 0x114   :  { %v382_v41 = vshra.s32 %v380_v39, 16 }
 0x115   :  { %v414_v56 = vcvt.s32.f32 %v412_v53 }
 0x116   :  { %v384_v43 = vcvt.s32.f32 %v382_v41  ;;  %v4306_v41 = vld [vmem:[%s6222_s4] sm:$0xf] }
 0x117   :  { %355 = vmin.xlane.f32.xlu0 %v354_v18 }
 0x118   :  { %385 = vmin.xlane.f32.xlu2 %v384_v43 }
 0x119   :  { %v297_v45 = vpop.xlane.xlu1 %296 }
 0x11a   :  { %vm309_vm7 = vcmp.le.f32.partialorder %v274_v7, %v297_v45 }
 0x11b   :  { %v317_v47 = vsel %vm309_vm7, %v4265_v20, 16 }
 0x11c   :  { %v395_v48 = vsel %vm279_vm0, %v317_v47, 2147483647 }
 0x11d   :  { %v397_v51 = vshra.s32 %v395_v48, 16  ;;  %v396_v26 = vand.u32 65535, %v395_v48 }
 0x11f   :  { %370 = vmin.xlane.f32.xlu0 %v369_v49  ;;  %v399_v52 = vcvt.s32.f32 %v397_v51  ;;  %v398_v29 = vcvt.s32.f32 %v396_v26 }
 0x121   :  { %400 = vmin.xlane.f32.xlu2 %v399_v52 }
 0x122   :  { %v303_v54 = vpop.xlane.xlu2 %302 }
 0x123   :  { %vm311_vm8 = vcmp.le.f32.partialorder %v276_v16, %v303_v54  ;;  %v381_v16 = vand.u32 65535, %v380_v39 }
 0x124   :  { %v319_v55 = vsel %vm311_vm8, %v4265_v20, 16 }
 0x125   :  { %v425_v57 = vsel %vm279_vm0, %v319_v55, 2147483647  ;;  %v383_v21 = vcvt.s32.f32 %v381_v16 }
 0x126   :  { %v427_v58 = vshra.s32 %v425_v57, 16  ;;  %v426_v32 = vand.u32 65535, %v425_v57 }
 0x127   :  { %415 = vmin.xlane.f32.xlu0 %v414_v56 }
 0x128   :  { %v429_v59 = vcvt.s32.f32 %v427_v58  ;;  %v428_v34 = vcvt.s32.f32 %v426_v32 }
 0x12f   :  { %430 = vmin.xlane.f32.xlu0 %v429_v59 }
 0x17a   :  { %v326_v61 = vpop.xlane.xlu0 %325 }
 0x17b   :  { %vm327_vm9 = vcmp.eq.f32.partialorder %v324_v28, %v326_v61  ;;  %v413_v28 = vcvt.s32.f32 %v411_v25  ;;  %v332_v36 = vcvt.f32.s32 %v326_v61 }
 0x17c   :  { %v328_v63 = vsel %vm327_vm9, %v323_v62, inf }
 0x17d   :  { %329 = vmin.xlane.f32.xlu0 %v328_v63  ;;  %v333_v38 = vshll.u32 %v332_v36, 16 }
 0x182   :  { %v341_v1 = vpop.xlane.xlu0 %340 }
 0x183   :  { %vm342_vm10 = vcmp.eq.f32.partialorder %v339_v33, %v341_v1 }
 0x184   :  { %v343_v7 = vsel %vm342_vm10, %v338_v5, inf  ;;  %vm592_vm10 = vcmask 7168  }
 0x185   :  { %344 = vmin.xlane.f32.xlu1 %v343_v7 }
 0x18a   :  { %v4285_v9 = vpop.xlane.xlu0 %355 }
 0x18b   :  { %vm357_vm11 = vcmp.eq.f32.partialorder %v354_v18, %v4285_v9  ;;  %v4288_v12 = vpop.xlane.xlu2 %385  ;;  %v347_v18 = vcvt.f32.s32 %v341_v1  ;;  %v362_v55 = vcvt.f32.s32 %v4285_v9 }
 0x18c   :  { %v358_v14 = vsel %vm357_vm11, %v353_v10, inf  ;;  %vm387_vm12 = vcmp.eq.f32.partialorder %v384_v43, %v4288_v12  ;;  %v6230_v43 = vmov 0.0   ;;  %v392_v7 = vcvt.f32.s32 %v4288_v12 }
 0x18d   :  { %359 = vmin.xlane.f32.xlu2 %v358_v14  ;;  %v388_v23 = vsel %vm387_vm12, %v383_v21, inf  ;;  %v348_v48 = vshll.u32 %v347_v18, 16  ;;  %v363_v60 = vshll.u32 %v362_v55, 16  ;;  %vm665_vm11 = vcmask 1045504  }
 0x18e   :  { %v393_v16 = vshll.u32 %v392_v7, 16  ;;  %vm657_vm12 = vcmask 15360  }
 0x192   :  { %v4291_v17 = vpop.xlane.xlu0 %370 }
 0x193   :  { %vm372_vm13 = vcmp.eq.f32.partialorder %v369_v49, %v4291_v17  ;;  %v377_v8 = vcvt.f32.s32 %v4291_v17 }
 0x194   :  { %v373_v22 = vsel %vm372_vm13, %v368_v19, inf  ;;  %v4294_v24 = vpop.xlane.xlu2 %400  ;;  %vm659_vm13 = vcmask 31744  }
 0x195   :  { %374 = vmin.xlane.f32.xlu1 %v373_v22  ;;  %389 = vmin.xlane.f32.xlu2 %v388_v23  ;;  %vm402_vm14 = vcmp.eq.f32.partialorder %v399_v52, %v4294_v24  ;;  %v378_v19 = vshll.u32 %v377_v8, 16 }
 0x196   :  { %v403_v31 = vsel %vm402_vm14, %v398_v29, inf  ;;  %vm661_vm14 = vcmask 48128  }
 0x19a   :  { %v4297_v27 = vpop.xlane.xlu0 %415 }
 0x19b   :  { %vm417_vm15 = vcmp.eq.f32.partialorder %v414_v56, %v4297_v27 }
 0x19c   :  { %v418_v30 = vsel %vm417_vm15, %v413_v28, inf }
 0x19d   :  { %419 = vmin.xlane.f32.xlu2 %v418_v30  ;;  %404 = vmin.xlane.f32.xlu1 %v403_v31  ;;  %v422_v30 = vcvt.f32.s32 %v4297_v27 }
 0x1a2   :  { %v4300_v33 = vpop.xlane.xlu0 %430 }
 0x1a3   :  { %vm432_vm1 = vcmp.eq.f32.partialorder %v429_v59, %v4300_v33 }
 0x1a4   :  { %v433_v35 = vsel %vm432_vm1, %v428_v34, inf }
 0x1a5   :  { %434 = vmin.xlane.f32.xlu2 %v433_v35 }
 0x1f0   :  { %v330_v37 = vpop.xlane.xlu0 %329 }
 0x1f1   :  { %v331_v39 = vcvt.f32.s32 %v330_v37  ;;  %v423_v37 = vshll.u32 %v422_v30, 16 }
 0x1f3   :  { %v334_v40 = vadd.s32 %v333_v38, %v331_v39 }
 0x1f5   :  { %vm440_vm2 = vcmp.eq.s32.totalorder %v4265_v20, %v334_v40 }
 0x1f6   :  { %v3591_v44 = vsel %vm440_vm2, 1.0, %v6230_v43 }
 0x1f7   :  { %v528_v45 = vmul.f32 %v3591_v44, %v4306_v41  ;;  %v560_v46 = vmul.f32 %v3591_v44, %v4311_v42  ;;  %v464_v47 = vmul.f32 %v3591_v44, %v4228_v11  ;;  %v496_v56 = vmul.f32 %v3591_v44, %v4234_v13 }
 0x1f8   :  { %v345_v49 = vpop.xlane.xlu1 %344 }
 0x1f9   :  { %v346_v50 = vcvt.f32.s32 %v345_v49  ;;  %v536_v51 = vsel %vm279_vm0, %v528_v45, 0.0  ;;  %v568_v52 = vsel %vm279_vm0, %v560_v46, 0.0  ;;  %v472_v53 = vsel %vm279_vm0, %v464_v47, 0.0 }
 0x1fa   :  { %537 = vadd.xlane.f32.xlu0 %v536_v51  ;;  %569 = vadd.xlane.f32.xlu2 %v568_v52  ;;  %v504_v63 = vsel %vm279_vm0, %v496_v56, 0.0  ;;  %v437_v45 = vcvt.f32.s32 %v4300_v33 }
 0x1fb   :  { %v349_v54 = vadd.s32 %v348_v48, %v346_v50  ;;  %473 = vadd.xlane.f32.xlu1 %v472_v53 }
 0x1fc   :  { %v438_v50 = vshll.u32 %v437_v45, 16 }
 0x1fd   :  { %vm441_vm3 = vcmp.eq.s32.totalorder %v4265_v20, %v349_v54 }
 0x1fe   :  { %v3592_v57 = vsel %vm441_vm3, 1.0, %v6230_v43 }
 0x1ff   :  { %v465_v58 = vmul.f32 %v3592_v57, %v4228_v11  ;;  %v529_v59 = vmul.f32 %v3592_v57, %v4306_v41  ;;  %v561_v9 = vmul.f32 %v3592_v57, %v4311_v42  ;;  %v497_v14 = vmul.f32 %v3592_v57, %v4234_v13 }
 0x200   :  { %v360_v61 = vpop.xlane.xlu2 %359 }
 0x201   :  { %v361_v62 = vcvt.f32.s32 %v360_v61  ;;  %v475_v0 = vsel %vm279_vm0, %v465_v58, 0.0  ;;  %v539_v1 = vsel %vm279_vm0, %v529_v59, 0.0  ;;  %v571_v12 = vsel %vm279_vm0, %v561_v9, 0.0 }
 0x202   :  { %505 = vadd.xlane.f32.xlu0 %v504_v63  ;;  %476 = vadd.xlane.f32.xlu2 %v475_v0  ;;  %v507_v26 = vsel %vm279_vm0, %v497_v14, 0.0  ;;  %v407_v59 = vcvt.f32.s32 %v4294_v24 }
 0x203   :  { %v364_v5 = vadd.s32 %v363_v60, %v361_v62  ;;  %540 = vadd.xlane.f32.xlu1 %v539_v1 }
 0x204   :  { %v408_v0 = vshll.u32 %v407_v59, 16 }
 0x205   :  { %vm442_vm4 = vcmp.eq.s32.totalorder %v4265_v20, %v364_v5 }
 0x206   :  { %v3593_v10 = vsel %vm442_vm4, 1.0, %v6230_v43 }
 0x207   :  { %v562_v15 = vmul.f32 %v3593_v10, %v4311_v42  ;;  %v530_v31 = vmul.f32 %v3593_v10, %v4306_v41  ;;  %v466_v34 = vmul.f32 %v3593_v10, %v4228_v11  ;;  %v498_v46 = vmul.f32 %v3593_v10, %v4234_v13 }
 0x208   :  { %v375_v21 = vpop.xlane.xlu1 %374  ;;  %v390_v22 = vpop.xlane.xlu2 %389 }
 0x209   :  { %v376_v23 = vcvt.f32.s32 %v375_v21  ;;  %v391_v25 = vcvt.f32.s32 %v390_v22  ;;  %v574_v17 = vsel %vm279_vm0, %v562_v15, 0.0  ;;  %v542_v40 = vsel %vm279_vm0, %v530_v31, 0.0 }
 0x20a   :  { %572 = vadd.xlane.f32.xlu0 %v571_v12  ;;  %575 = vadd.xlane.f32.xlu2 %v574_v17  ;;  %v478_v18 = vsel %vm279_vm0, %v466_v34, 0.0  ;;  %v510_v52 = vsel %vm279_vm0, %v498_v46, 0.0 }
 0x20b   :  { %v379_v28 = vadd.s32 %v378_v19, %v376_v23  ;;  %v394_v29 = vadd.s32 %v393_v16, %v391_v25  ;;  %508 = vadd.xlane.f32.xlu1 %v507_v26 }
 0x20d   :  { %vm443_vm5 = vcmp.eq.s32.totalorder %v4265_v20, %v379_v28  ;;  %vm444_vm6 = vcmp.eq.s32.totalorder %v4265_v20, %v394_v29 }
 0x20e   :  { %v3594_v32 = vsel %vm443_vm5, 1.0, %v6230_v43  ;;  %v3595_v27 = vsel %vm444_vm6, 1.0, %v6230_v43 }
 0x20f   :  { %v467_v35 = vmul.f32 %v3594_v32, %v4228_v11  ;;  %v564_v47 = vmul.f32 %v3595_v27, %v4311_v42  ;;  %v531_v48 = vmul.f32 %v3594_v32, %v4306_v41  ;;  %v563_v57 = vmul.f32 %v3594_v32, %v4311_v42 }
 0x210   :  { %v420_v36 = vpop.xlane.xlu2 %419  ;;  %v405_v56 = vpop.xlane.xlu1 %404  ;;  %v499_v60 = vmul.f32 %v3594_v32, %v4234_v13  ;;  %v532_v24 = vmul.f32 %v3595_v27, %v4306_v41  ;;  %v468_v9 = vmul.f32 %v3595_v27, %v4228_v11  ;;  %v500_v19 = vmul.f32 %v3595_v27, %v4234_v13 }
 0x211   :  { %v421_v38 = vcvt.f32.s32 %v420_v36  ;;  %v481_v39 = vsel %vm279_vm0, %v467_v35, 0.0  ;;  %v580_v53 = vsel %vm279_vm0, %v564_v47, 0.0  ;;  %v545_v33 = vsel %vm279_vm0, %v531_v48, 0.0  ;;  %v4404_v47 = vld [vmem:[%s6219_s1] sm:$0xf] }
 0x212   :  { %482 = vadd.xlane.f32.xlu2 %v481_v39  ;;  %543 = vadd.xlane.f32.xlu0 %v542_v40  ;;  %v406_v61 = vcvt.f32.s32 %v405_v56  ;;  %v577_v62 = vsel %vm279_vm0, %v563_v57, 0.0  ;;  %v513_v5 = vsel %vm279_vm0, %v499_v60, 0.0  ;;  %v548_v10 = vsel %vm279_vm0, %v532_v24, 0.0 }
 0x213   :  { %v424_v44 = vadd.s32 %v423_v37, %v421_v38  ;;  %479 = vadd.xlane.f32.xlu1 %v478_v18  ;;  %v484_v15 = vsel %vm279_vm0, %v468_v9, 0.0  ;;  %v516_v22 = vsel %vm279_vm0, %v500_v19, 0.0 }
 0x214   :  { %v409_v7 = vadd.s32 %v408_v0, %v406_v61 }
 0x215   :  { %vm446_vm7 = vcmp.eq.s32.totalorder %v4265_v20, %v424_v44 }
 0x216   :  { %v3597_v54 = vsel %vm446_vm7, 1.0, %v6230_v43  ;;  %vm445_vm9 = vcmp.eq.s32.totalorder %v4265_v20, %v409_v7 }
 0x217   :  { %v566_v58 = vmul.f32 %v3597_v54, %v4311_v42  ;;  %v3596_v16 = vsel %vm445_vm9, 1.0, %v6230_v43  ;;  %v502_v12 = vmul.f32 %v3597_v54, %v4234_v13  ;;  %v534_v32 = vmul.f32 %v3597_v54, %v4306_v41 }
 0x218   :  { %v435_v49 = vpop.xlane.xlu2 %434  ;;  %v533_v21 = vmul.f32 %v3596_v16, %v4306_v41  ;;  %v565_v25 = vmul.f32 %v3596_v16, %v4311_v42  ;;  %v469_v28 = vmul.f32 %v3596_v16, %v4228_v11  ;;  %v501_v30 = vmul.f32 %v3596_v16, %v4234_v13 }
 0x219   :  { %v436_v51 = vcvt.f32.s32 %v435_v49  ;;  %v586_v63 = vsel %vm279_vm0, %v566_v58, 0.0  ;;  %v522_v26 = vsel %vm279_vm0, %v502_v12, 0.0  ;;  %v554_v34 = vsel %vm279_vm0, %v534_v32, 0.0 }
 0x21a   :  { %511 = vadd.xlane.f32.xlu0 %v510_v52  ;;  %581 = vadd.xlane.f32.xlu2 %v580_v53  ;;  %v551_v23 = vsel %vm279_vm0, %v533_v21, 0.0  ;;  %v583_v17 = vsel %vm279_vm0, %v565_v25, 0.0  ;;  %v487_v29 = vsel %vm279_vm0, %v469_v28, 0.0  ;;  %v519_v31 = vsel %vm279_vm0, %v501_v30, 0.0 }
 0x21b   :  { %v439_v55 = vadd.s32 %v438_v50, %v436_v51  ;;  %546 = vadd.xlane.f32.xlu1 %v545_v33  ;;  %v470_v35 = vmul.f32 %v3597_v54, %v4228_v11 }
 0x21d   :  { %vm447_vm8 = vcmp.eq.s32.totalorder %v4265_v20, %v439_v55  ;;  %v490_v36 = vsel %vm279_vm0, %v470_v35, 0.0  ;;  %v4784_v20 = vld [vmem:[#allocation2 + $0x18] sm:$0xff] }
 0x21e   :  { %v4368_v1 = vsel %vm447_vm8, 1.0, %v6230_v43  ;;  %v4782_v43 = vld [vmem:[#allocation2 + $0x10] sm:$0xff]  ;;  %6442 = vst [vmem:[#allocation31_spill] sm:$0xff] %v4784_v20 }
 0x21f   :  { %v535_v8 = vmul.f32 %v4368_v1, %v4306_v41  ;;  %v567_v37 = vmul.f32 %v4368_v1, %v4311_v42  ;;  %6441 = vst [vmem:[#allocation30_spill] sm:$0xff] %v4782_v43 }
 0x221   :  { %v557_v14 = vsel %vm279_vm0, %v535_v8, 0.0  ;;  %v589_v38 = vsel %vm279_vm0, %v567_v37, 0.0 }
 0x222   :  { %578 = vadd.xlane.f32.xlu0 %v577_v62  ;;  %587 = vadd.xlane.f32.xlu2 %v586_v63 }
 0x223   :  { %514 = vadd.xlane.f32.xlu1 %v513_v5 }
 0x22a   :  { %549 = vadd.xlane.f32.xlu0 %v548_v10  ;;  %558 = vadd.xlane.f32.xlu2 %v557_v14 }
 0x22b   :  { %485 = vadd.xlane.f32.xlu1 %v484_v15 }
 0x232   :  { %517 = vadd.xlane.f32.xlu0 %v516_v22 }
 0x233   :  { %552 = vadd.xlane.f32.xlu1 %v551_v23 }
 0x23a   :  { %584 = vadd.xlane.f32.xlu0 %v583_v17 }
 0x23b   :  { %523 = vadd.xlane.f32.xlu1 %v522_v26 }
 0x242   :  { %488 = vadd.xlane.f32.xlu0 %v487_v29 }
 0x24a   :  { %520 = vadd.xlane.f32.xlu0 %v519_v31 }
 0x252   :  { %555 = vadd.xlane.f32.xlu0 %v554_v34 }
 0x25a   :  { %491 = vadd.xlane.f32.xlu0 %v490_v36 }
 0x262   :  { %590 = vadd.xlane.f32.xlu0 %v589_v38 }
 0x26d   :  { %v538_v39 = vpop.xlane.xlu0 %537  ;;  %v570_v27 = vpop.xlane.xlu2 %569 }
 0x26e   :  { %v474_v40 = vpop.xlane.xlu1 %473  ;;  %v601_v41 = vsel %vm592_vm10, %v538_v39, %v570_v27 }
 0x26f   :  { %v609_v18 = vmul.f32 0.5, %v601_v41 }
 0x275   :  { %v506_v44 = vpop.xlane.xlu0 %505  ;;  %v477_v54 = vpop.xlane.xlu2 %476 }
 0x276   :  { %v593_v45 = vsel %vm592_vm10, %v474_v40, %v506_v44  ;;  %v541_v46 = vpop.xlane.xlu1 %540 }
 0x277   :  { %v617_v42 = vsub.f32 %v593_v45, %v609_v18  ;;  %v633_v48 = vadd.f32 %v609_v18, %v593_v45 }
 0x279   :  { %v641_v49 = vsub.f32 %v633_v48, %v4404_v47  ;;  %v625_v50 = vsub.f32 %v617_v42, %v4404_v47 }
 0x27b   :  { %654 = vrot.lane.b32.xlu1 %v641_v49, %s4119_s29  ;;  %650 = vrot.lane.b32.xlu2 %v625_v50, %s4120_s30  ;;  %v471_v49 = vmul.f32 %v4368_v1, %v4228_v11  ;;  %v503_v50 = vmul.f32 %v4368_v1, %v4234_v13  ;;  %v4449_v13 = vld [vmem:[%s6225_s7] sm:$0x3f]  ;;  %v4454_v1 = vld [vmem:[%s6225_s7 + $0x8] sm:$0x3f] }
 0x27c   :  { %3599 = vmatpush.msk.msra.mxu0 %vm665_vm11, %v4449_v13  ;;  %3601 = vmatpush.msk.msra.mxu1 %vm665_vm11, %v4454_v1 }
 0x27d   :  { %v573_v51 = vpop.xlane.xlu0 %572  ;;  %v576_v62 = vpop.xlane.xlu2 %575 }
 0x27e   :  { %v602_v52 = vsel %vm592_vm10, %v541_v46, %v573_v51  ;;  %v509_v53 = vpop.xlane.xlu1 %508  ;;  %3609 = vmatpush.msk.msrb.mxu1 %vm665_vm11, %v4454_v1 }
 0x27f   :  { %v610_v33 = vmul.f32 0.5, %v602_v52  ;;  %v594_v55 = vsel %vm592_vm10, %v477_v54, %v509_v53  ;;  %v493_v52 = vsel %vm279_vm0, %v471_v49, 0.0  ;;  %v525_v53 = vsel %vm279_vm0, %v503_v50, 0.0 }
 0x281   :  { %v618_v56 = vsub.f32 %v594_v55, %v610_v33  ;;  %v634_v57 = vadd.f32 %v610_v33, %v594_v55 }
 0x283   :  { %v642_v58 = vsub.f32 %v634_v57, %v4404_v47  ;;  %v626_v59 = vsub.f32 %v618_v56, %v4404_v47 }
 0x285   :  { %v544_v60 = vpop.xlane.xlu0 %543  ;;  %763 = vrot.lane.b32.xlu1 %v642_v58, %s4119_s29  ;;  %759 = vrot.lane.b32.xlu2 %v626_v59, %s4120_s30  ;;  %v483_v19 = vpop.xlane.xlu2 %482  ;;  %v4463_v59 = vld [vmem:[%s6225_s7 + $0x18] sm:$0x3f] }
 0x286   :  { %v480_v61 = vpop.xlane.xlu1 %479  ;;  %v603_v63 = vsel %vm592_vm10, %v544_v60, %v576_v62  ;;  %3605 = vmatpush.msk.msra.mxu3 %vm665_vm11, %v4463_v59  ;;  %v4470_v60 = vld [vmem:[%s6225_s7 + $0x10] sm:$0x3f] }
 0x287   :  { %v611_v0 = vmul.f32 0.5, %v603_v63  ;;  %3603 = vmatpush.msk.msrb.mxu0 %vm665_vm11, %v4470_v60  ;;  %3619 = vmatpush.msk.msra.mxu2 %vm665_vm11, %v4470_v60 }
 0x288   :  { %3613 = vmatpush.msk.msrb.mxu3 %vm665_vm11, %v4463_v59 }
 0x289   :  { %3627 = vmatpush.msk.msrb.mxu2 %vm665_vm11, %v4470_v60 }
 0x28d   :  { %v512_v5 = vpop.xlane.xlu0 %511  ;;  %v582_v29 = vpop.xlane.xlu2 %581 }
 0x28e   :  { %v595_v7 = vsel %vm592_vm10, %v480_v61, %v512_v5  ;;  %v547_v24 = vpop.xlane.xlu1 %546 }
 0x28f   :  { %v619_v8 = vsub.f32 %v595_v7, %v611_v0  ;;  %v635_v10 = vadd.f32 %v611_v0, %v595_v7 }
 0x291   :  { %v627_v9 = vsub.f32 %v619_v8, %v4404_v47  ;;  %v643_v12 = vsub.f32 %v635_v10, %v4404_v47 }
 0x293   :  { %852 = vrot.lane.b32.xlu0 %v627_v9, %s4120_s30 }
 0x295   :  { %v579_v14 = vpop.xlane.xlu0 %578  ;;  %v588_v54 = vpop.xlane.xlu2 %587 }
 0x296   :  { %v604_v15 = vsel %vm592_vm10, %v547_v24, %v579_v14  ;;  %v515_v16 = vpop.xlane.xlu1 %514 }
 0x297   :  { %v612_v21 = vmul.f32 0.5, %v604_v15  ;;  %v596_v22 = vsel %vm592_vm10, %v483_v19, %v515_v16 }
 0x299   :  { %v620_v23 = vsub.f32 %v596_v22, %v612_v21  ;;  %v636_v25 = vadd.f32 %v612_v21, %v596_v22 }
 0x29b   :  { %856 = vrot.lane.b32.xlu0 %v643_v12, %s4119_s29  ;;  %v644_v17 = vsub.f32 %v636_v25, %v4404_v47  ;;  %v628_v26 = vsub.f32 %v620_v23, %v4404_v47 }
 0x29d   :  { %v550_v28 = vpop.xlane.xlu0 %549  ;;  %949 = vrot.lane.b32.xlu1 %v644_v17, %s4119_s29  ;;  %945 = vrot.lane.b32.xlu2 %v628_v26, %s4120_s30  ;;  %v4488_v7 = vpop.xlane.xlu2 %558  ;;  %v3922_v26 = vld [vmem:[%s6218_s0 + $0x10] sm:$0xf] }
 0x29e   :  { %v605_v30 = vsel %vm592_vm10, %v550_v28, %v582_v29  ;;  %v486_v32 = vpop.xlane.xlu1 %485 }
 0x29f   :  { %v613_v31 = vmul.f32 0.5, %v605_v30 }
 0x2a5   :  { %v518_v34 = vpop.xlane.xlu0 %517 }
 0x2a6   :  { %v597_v35 = vsel %vm592_vm10, %v486_v32, %v518_v34  ;;  %v553_v41 = vpop.xlane.xlu1 %552 }
 0x2a7   :  { %v621_v36 = vsub.f32 %v597_v35, %v613_v31  ;;  %v637_v38 = vadd.f32 %v613_v31, %v597_v35 }
 0x2a9   :  { %v629_v37 = vsub.f32 %v621_v36, %v4404_v47  ;;  %v645_v40 = vsub.f32 %v637_v38, %v4404_v47 }
 0x2ab   :  { %1038 = vrot.lane.b32.xlu0 %v629_v37, %s4120_s30 }
 0x2ad   :  { %v585_v39 = vpop.xlane.xlu0 %584 }
 0x2ae   :  { %v606_v18 = vsel %vm592_vm10, %v553_v41, %v585_v39  ;;  %v524_v55 = vpop.xlane.xlu1 %523 }
 0x2af   :  { %v614_v44 = vmul.f32 0.5, %v606_v18 }
 0x2b3   :  { %1042 = vrot.lane.b32.xlu0 %v645_v40, %s4119_s29  ;;  %v3923_v40 = vld [vmem:[%s6218_s0 + $0x14] sm:$0xf] }
 0x2b5   :  { %v489_v27 = vpop.xlane.xlu0 %488 }
 0x2bd   :  { %v521_v45 = vpop.xlane.xlu0 %520 }
 0x2be   :  { %v598_v46 = vsel %vm592_vm10, %v489_v27, %v521_v45 }
 0x2bf   :  { %v622_v42 = vsub.f32 %v598_v46, %v614_v44  ;;  %v638_v62 = vadd.f32 %v614_v44, %v598_v46 }
 0x2c1   :  { %v630_v48 = vsub.f32 %v622_v42, %v4404_v47  ;;  %v646_v0 = vsub.f32 %v638_v62, %v4404_v47  ;;  %v4646_v62 = vld [vmem:[#allocation2 + $0x160] sm:$0xff] }
 0x2c3   :  { %1131 = vrot.lane.b32.xlu0 %v630_v48, %s4120_s30  ;;  %v3924_v48 = vld [vmem:[%s6218_s0 + $0x18] sm:$0xf] }
 0x2c5   :  { %v556_v51 = vpop.xlane.xlu0 %555 }
 0x2c6   :  { %494 = vadd.xlane.f32.xlu2 %v493_v52  ;;  %v607_v33 = vsel %vm592_vm10, %v556_v51, %v588_v54  ;;  %v4602_v51 = vld [vmem:[#allocation2 + $0x1e8] sm:$0xff]  ;;  %v4604_v52 = vld [vmem:[#allocation2 + $0x1f0] sm:$0xff]  ;;  %v4610_v54 = vld [vmem:[#allocation2 + $0x1c0] sm:$0xff] }
 0x2c7   :  { %526 = vadd.xlane.f32.xlu1 %v525_v53  ;;  %v615_v56 = vmul.f32 0.5, %v607_v33  ;;  %v4608_v53 = vld [vmem:[#allocation2 + $0x1f8] sm:$0xff]  ;;  %v4612_v33 = vld [vmem:[#allocation2 + $0x1c8] sm:$0xff] }
 0x2cd   :  { %v492_v57 = vpop.xlane.xlu0 %491 }
 0x2ce   :  { %v599_v11 = vsel %vm592_vm10, %v492_v57, %v524_v55  ;;  %v4616_v55 = vld [vmem:[#allocation2 + $0x1d0] sm:$0xff]  ;;  %v4620_v57 = vld [vmem:[#allocation2 + $0x1a0] sm:$0xff] }
 0x2cf   :  { %v639_v58 = vadd.f32 %v615_v56, %v599_v11  ;;  %v623_v63 = vsub.f32 %v599_v11, %v615_v56  ;;  %v4618_v56 = vld [vmem:[#allocation2 + $0x1d8] sm:$0xff]  ;;  %v4624_v11 = vld [vmem:[#allocation2 + $0x1a8] sm:$0xff] }
 0x2d1   :  { %v647_v61 = vsub.f32 %v639_v58, %v4404_v47  ;;  %v631_v5 = vsub.f32 %v623_v63, %v4404_v47  ;;  %v4636_v58 = vld [vmem:[#allocation2 + $0x180] sm:$0xff]  ;;  %v4648_v63 = vld [vmem:[#allocation2 + $0x168] sm:$0xff] }
 0x2d3   :  { %1228 = vrot.lane.b32.xlu0 %v647_v61, %s4119_s29  ;;  %v4644_v61 = vld [vmem:[#allocation2 + $0x198] sm:$0xff] }
 0x2d5   :  { %v651_v24 = vpop.permute.xlu2 %650  ;;  %v591_v19 = vpop.xlane.xlu0 %590 }
 0x2d6   :  { %v658_v8 = vsel %vm657_vm12, %v4198_v4, %v651_v24  ;;  %v608_v31 = vsel %vm592_vm10, %v4488_v7, %v591_v19  ;;  %v4656_v7 = vld [vmem:[#allocation2 + $0x140] sm:$0xff]  ;;  %v4660_v24 = vld [vmem:[#allocation2 + $0x148] sm:$0xff] }
 0x2d7   :  { %v616_v34 = vmul.f32 0.5, %v608_v31  ;;  %v4684_v19 = vld [vmem:[#allocation2 + $0x108] sm:$0xff]  ;;  %v4724_v31 = vld [vmem:[#allocation2 + $0xb8] sm:$0xff] }
 0x2d8   :  { %6422 = vst [vmem:[#allocation11_spill] sm:$0xff] %v4724_v31 }
 0x2de   :  { %1135 = vrot.lane.b32.xlu2 %v646_v0, %s4119_s29  ;;  %v4652_v0 = vld [vmem:[#allocation2 + $0x170] sm:$0xff] }
 0x2df   :  { %v760_v14 = vpop.permute.xlu2 %759 }
 0x2e0   :  { %1224 = vrot.lane.b32.xlu1 %v631_v5, %s4120_s30  ;;  %v766_v4 = vsel %vm657_vm12, %v4193_v3, %v760_v14  ;;  %v4654_v5 = vld [vmem:[#allocation2 + $0x178] sm:$0xff]  ;;  %v4670_v14 = vld [vmem:[#allocation2 + $0x128] sm:$0xff] }
 0x2ed   :  { %v655_v9 = vpop.permute.xlu1 %654 }
 0x2ee   :  { %v660_v10 = vsel %vm659_vm13, %v658_v8, %v655_v9  ;;  %v4662_v8 = vld [vmem:[#allocation2 + $0x150] sm:$0xff]  ;;  %v4664_v9 = vld [vmem:[#allocation2 + $0x158] sm:$0xff] }
 0x2ef   :  { %3600 = vmatmul.msk.f32.vlgmr.msra.gmra.mxu0 %vm661_vm14, %v660_v10  ;;  %3602 = vmatmul.msk.f32.vlgmr.msra.gmra.mxu1 %vm661_vm14, %v660_v10 }
 0x2f0   :  { %3606 = vmatmul.msk.f32.vlgmr.msra.gmra.mxu3 %vm661_vm14, %v660_v10  ;;  %3607 = vmatpush.msk.msra.mxu0 %vm665_vm11, %v4449_v13 }
 0x2f1   :  { %3611 = vmatpush.msk.msra.mxu1 %vm665_vm11, %v4470_v60  ;;  %3621 = vmatpush.msk.msra.mxu3 %vm665_vm11, %v4463_v59 }
 0x2f7   :  { %v764_v15 = vpop.permute.xlu1 %763  ;;  %3604 = vmatmul.msk.f32.vlgmr.msrb.gmra.mxu0 %vm661_vm14, %v660_v10  ;;  %v946_v25 = vpop.permute.xlu2 %945  ;;  %v4668_v10 = vld [vmem:[#allocation2 + $0x120] sm:$0xff] }
 0x2f8   :  { %v767_v16 = vsel %vm659_vm13, %v766_v4, %v764_v15  ;;  %3615 = vmatpush.msk.msrb.mxu0 %vm665_vm11, %v4449_v13  ;;  %v952_v12 = vsel %vm657_vm12, %v4212_v6, %v946_v25  ;;  %v4674_v4 = vld [vmem:[#allocation2 + $0x130] sm:$0xff]  ;;  %v4676_v15 = vld [vmem:[#allocation2 + $0x138] sm:$0xff] }
 0x2f9   :  { %3610 = vmatmul.msk.f32.vlgmr.msrb.gmra.mxu1 %vm661_vm14, %v767_v16  ;;  %3614 = vmatmul.msk.f32.vlgmr.msrb.gmra.mxu3 %vm661_vm14, %v767_v16  ;;  %6417 = vst [vmem:[#allocation6_spill] sm:$0xff] %v4676_v15  ;;  %v4698_v25 = vld [vmem:[#allocation2 + $0xf0] sm:$0xff] }
 0x2fa   :  { %3617 = vmatpush.msk.msrb.mxu1 %vm665_vm11, %v4454_v1  ;;  %3629 = vmatpush.msk.msrb.mxu3 %vm665_vm11, %v4463_v59 }
 0x2ff   :  { %3608 = vmatmul.msk.f32.vlgmr.msra.gmra.mxu0 %vm661_vm14, %v767_v16 }
 0x300   :  { %3623 = vmatpush.msk.msra.mxu0 %vm665_vm11, %v4449_v13 }
 0x301   :  { %3612 = vmatmul.msk.f32.vlgmr.msra.gmra.mxu1 %vm661_vm14, %v767_v16  ;;  %v4682_v16 = vld [vmem:[#allocation2 + $0x100] sm:$0xff] }
 0x302   :  { %3625 = vmatpush.msk.msra.mxu1 %vm665_vm11, %v4454_v1 }
 0x305   :  { %v853_v3 = vpop.permute.xlu0 %852 }
 0x306   :  { %v859_v21 = vsel %vm657_vm12, %v4188_v2, %v853_v3  ;;  %v4686_v3 = vld [vmem:[#allocation2 + $0x110] sm:$0xff] }
 0x30d   :  { %v857_v22 = vpop.permute.xlu0 %856 }
 0x30e   :  { %v860_v23 = vsel %vm659_vm13, %v859_v21, %v857_v22  ;;  %v4690_v21 = vld [vmem:[#allocation2 + $0x118] sm:$0xff]  ;;  %v4692_v22 = vld [vmem:[#allocation2 + $0xe0] sm:$0xff] }
 0x30f   :  { %3616 = vmatmul.msk.f32.vlgmr.msrb.gmra.mxu0 %vm661_vm14, %v860_v23  ;;  %3618 = vmatmul.msk.f32.vlgmr.msrb.gmra.mxu1 %vm661_vm14, %v860_v23  ;;  %v950_v2 = vpop.permute.xlu1 %949  ;;  %6418 = vst [vmem:[#allocation7_spill] sm:$0xff] %v4692_v22 }
 0x310   :  { %3620 = vmatmul.msk.f32.vlgmr.msra.gmra.mxu2 %vm661_vm14, %v860_v23  ;;  %3622 = vmatmul.msk.f32.vlgmr.msra.gmra.mxu3 %vm661_vm14, %v860_v23  ;;  %v953_v17 = vsel %vm659_vm13, %v952_v12, %v950_v2  ;;  %v4694_v23 = vld [vmem:[#allocation2 + $0xe8] sm:$0xff]  ;;  %v4700_v2 = vld [vmem:[#allocation2 + $0xf8] sm:$0xff]  ;;  %v4704_v12 = vld [vmem:[#allocation2 + $0xc0] sm:$0xff] }
 0x311   :  { %3631 = vmatpush.msk.msrb.mxu0 %vm665_vm11, %v4449_v13  ;;  %3633 = vmatpush.msk.msrb.mxu1 %vm665_vm11, %v4454_v1 }
 0x312   :  { %3635 = vmatpush.msk.msra.mxu2 %vm665_vm11, %v4470_v60  ;;  %3637 = vmatpush.msk.msra.mxu3 %vm665_vm11, %v4463_v59 }
 0x317   :  { %3624 = vmatmul.msk.f32.vlgmr.msra.gmra.mxu0 %vm661_vm14, %v953_v17  ;;  %3626 = vmatmul.msk.f32.vlgmr.msra.gmra.mxu1 %vm661_vm14, %v953_v17 }
 0x318   :  { %3628 = vmatmul.msk.f32.vlgmr.msrb.gmra.mxu2 %vm661_vm14, %v953_v17  ;;  %3630 = vmatmul.msk.f32.vlgmr.msrb.gmra.mxu3 %vm661_vm14, %v953_v17  ;;  %v4706_v17 = vld [vmem:[#allocation2 + $0xc8] sm:$0xff] }
 0x319   :  { %3639 = vmatpush.msk.msra.mxu0 %vm665_vm11, %v4449_v13  ;;  %3641 = vmatpush.msk.msra.mxu1 %vm665_vm11, %v4454_v1 }
 0x31a   :  { %3643 = vmatpush.msk.msrb.mxu2 %vm665_vm11, %v4470_v60  ;;  %3645 = vmatpush.msk.msrb.mxu3 %vm665_vm11, %v4463_v59 }
 0x31d   :  { %v1039_v6 = vpop.permute.xlu0 %1038 }
 0x31e   :  { %v1045_v28 = vsel %vm657_vm12, %v3922_v26, %v1039_v6  ;;  %v4710_v6 = vld [vmem:[#allocation2 + $0xd0] sm:$0xff]  ;;  %v4712_v26 = vld [vmem:[#allocation2 + $0xd8] sm:$0xff] }
 0x325   :  { %v1043_v29 = vpop.permute.xlu0 %1042 }
 0x326   :  { %v1046_v30 = vsel %vm659_vm13, %v1045_v28, %v1043_v29  ;;  %v4716_v28 = vld [vmem:[#allocation2 + $0xa0] sm:$0xff]  ;;  %v4718_v29 = vld [vmem:[#allocation2 + $0xa8] sm:$0xff] }
 0x327   :  { %3632 = vmatmul.msk.f32.vlgmr.msrb.gmra.mxu0 %vm661_vm14, %v1046_v30  ;;  %3634 = vmatmul.msk.f32.vlgmr.msrb.gmra.mxu1 %vm661_vm14, %v1046_v30  ;;  %6419 = vst [vmem:[#allocation8_spill] sm:$0xff] %v4716_v28 }
 0x328   :  { %3636 = vmatmul.msk.f32.vlgmr.msra.gmra.mxu2 %vm661_vm14, %v1046_v30  ;;  %3638 = vmatmul.msk.f32.vlgmr.msra.gmra.mxu3 %vm661_vm14, %v1046_v30  ;;  %6420 = vst [vmem:[#allocation9_spill] sm:$0xff] %v4718_v29  ;;  %v4722_v30 = vld [vmem:[#allocation2 + $0xb0] sm:$0xff] }
 0x329   :  { %3647 = vmatpush.msk.msrb.mxu0 %vm665_vm11, %v4449_v13  ;;  %3649 = vmatpush.msk.msrb.mxu1 %vm665_vm11, %v4454_v1  ;;  %6421 = vst [vmem:[#allocation10_spill] sm:$0xff] %v4722_v30 }
 0x32a   :  { %3651 = vmatpush.msk.msra.mxu2 %vm665_vm11, %v4470_v60  ;;  %3653 = vmatpush.msk.msra.mxu3 %vm665_vm11, %v4463_v59 }
 0x335   :  { %v1132_v38 = vpop.permute.xlu0 %1131 }
 0x336   :  { %v1138_v27 = vsel %vm657_vm12, %v3923_v40, %v1132_v38  ;;  %v4744_v38 = vld [vmem:[#allocation2 + $0x68] sm:$0xff]  ;;  %v4750_v40 = vld [vmem:[#allocation2 + $0x78] sm:$0xff] }
 0x337   :  { %6428 = vst [vmem:[#allocation17_spill] sm:$0xff] %v4744_v38 }
 0x338   :  { %6430 = vst [vmem:[#allocation19_spill] sm:$0xff] %v4750_v40 }
 0x339   :  { %v495_v32 = vpop.xlane.xlu2 %494 }
 0x33a   :  { %v527_v35 = vpop.xlane.xlu1 %526 }
 0x33b   :  { %v600_v36 = vsel %vm592_vm10, %v495_v32, %v527_v35  ;;  %v4730_v32 = vld [vmem:[#allocation2 + $0x80] sm:$0xff]  ;;  %v4734_v35 = vld [vmem:[#allocation2 + $0x90] sm:$0xff] }
 0x33c   :  { %v624_v37 = vsub.f32 %v600_v36, %v616_v34  ;;  %v640_v18 = vadd.f32 %v616_v34, %v600_v36  ;;  %6423 = vst [vmem:[#allocation12_spill] sm:$0xff] %v4730_v32  ;;  %v4732_v34 = vld [vmem:[#allocation2 + $0x88] sm:$0xff]  ;;  %v4738_v36 = vld [vmem:[#allocation2 + $0x98] sm:$0xff] }
 0x33d   :  { %6424 = vst [vmem:[#allocation13_spill] sm:$0xff] %v4732_v34 }
 0x33e   :  { %v632_v39 = vsub.f32 %v624_v37, %v4404_v47  ;;  %v648_v45 = vsub.f32 %v640_v18, %v4404_v47  ;;  %v4600_v47 = vld [vmem:[#allocation2 + $0x1e0] sm:$0xff]  ;;  %6425 = vst [vmem:[#allocation14_spill] sm:$0xff] %v4734_v35  ;;  %v4758_v18 = vld [vmem:[#allocation2 + $0x50] sm:$0xff] }
 0x33f   :  { %6426 = vst [vmem:[#allocation15_spill] sm:$0xff] %v4738_v36  ;;  %v4742_v37 = vld [vmem:[#allocation2 + $0x60] sm:$0xff] }
 0x340   :  { %1317 = vrot.lane.b32.xlu0 %v632_v39, %s4120_s30  ;;  %6427 = vst [vmem:[#allocation16_spill] sm:$0xff] %v4742_v37  ;;  %v4746_v39 = vld [vmem:[#allocation2 + $0x70] sm:$0xff] }
 0x341   :  { %v1136_v41 = vpop.permute.xlu2 %1135  ;;  %6429 = vst [vmem:[#allocation18_spill] sm:$0xff] %v4746_v39 }
 0x342   :  { %v1139_v44 = vsel %vm659_vm13, %v1138_v27, %v1136_v41  ;;  %v4752_v27 = vld [vmem:[#allocation2 + $0x40] sm:$0xff]  ;;  %v4754_v41 = vld [vmem:[#allocation2 + $0x48] sm:$0xff]  ;;  %6433 = vst [vmem:[#allocation22_spill] sm:$0xff] %v4758_v18 }
 0x343   :  { %3640 = vmatmul.msk.f32.vlgmr.msra.gmra.mxu0 %vm661_vm14, %v1139_v44  ;;  %3642 = vmatmul.msk.f32.vlgmr.msra.gmra.mxu1 %vm661_vm14, %v1139_v44  ;;  %6431 = vst [vmem:[#allocation20_spill] sm:$0xff] %v4752_v27 }
 0x344   :  { %3644 = vmatmul.msk.f32.vlgmr.msrb.gmra.mxu2 %vm661_vm14, %v1139_v44  ;;  %3646 = vmatmul.msk.f32.vlgmr.msrb.gmra.mxu3 %vm661_vm14, %v1139_v44  ;;  %6432 = vst [vmem:[#allocation21_spill] sm:$0xff] %v4754_v41  ;;  %v4760_v44 = vld [vmem:[#allocation2 + $0x58] sm:$0xff] }
 0x345   :  { %3655 = vmatpush.msk.msra.mxu0 %vm665_vm11, %v4449_v13  ;;  %3657 = vmatpush.msk.msra.mxu1 %vm665_vm11, %v4454_v1  ;;  %v1229_v42 = vpop.permute.xlu0 %1228  ;;  %v4626_v13 = vld [vmem:[#allocation2 + $0x1b0] sm:$0xff]  ;;  %v4628_v1 = vld [vmem:[#allocation2 + $0x1b8] sm:$0xff]  ;;  %6434 = vst [vmem:[#allocation23_spill] sm:$0xff] %v4760_v44 }
 0x346   :  { %3659 = vmatpush.msk.msrb.mxu2 %vm665_vm11, %v4470_v60  ;;  %3661 = vmatpush.msk.msrb.mxu3 %vm665_vm11, %v4463_v59  ;;  %v4638_v59 = vld [vmem:[#allocation2 + $0x188] sm:$0xff]  ;;  %v4640_v60 = vld [vmem:[#allocation2 + $0x190] sm:$0xff] }
 0x348   :  { %1321 = vrot.lane.b32.xlu0 %v648_v45, %s4119_s29  ;;  %v4766_v45 = vld [vmem:[#allocation2 + $0x20] sm:$0xff] }
 0x349   :  { %6435 = vst [vmem:[#allocation24_spill] sm:$0xff] %v4766_v45 }
 0x352   :  { %v1225_v46 = vpop.permute.xlu1 %1224 }
 0x353   :  { %v1231_v49 = vsel %vm657_vm12, %v3924_v48, %v1225_v46  ;;  %v4768_v46 = vld [vmem:[#allocation2 + $0x28] sm:$0xff]  ;;  %v4774_v48 = vld [vmem:[#allocation2 + $0x38] sm:$0xff] }
 0x354   :  { %v1232_v50 = vsel %vm659_vm13, %v1231_v49, %v1229_v42  ;;  %6436 = vst [vmem:[#allocation25_spill] sm:$0xff] %v4768_v46  ;;  %v4770_v42 = vld [vmem:[#allocation2 + $0x30] sm:$0xff]  ;;  %v4776_v49 = vld [vmem:[#allocation2] sm:$0xff] }
 0x355   :  { %3648 = vmatmul.msk.f32.vlgmr.msrb.gmra.mxu0 %vm661_vm14, %v1232_v50  ;;  %3650 = vmatmul.msk.f32.vlgmr.msrb.gmra.mxu1 %vm661_vm14, %v1232_v50  ;;  %6437 = vst [vmem:[#allocation26_spill] sm:$0xff] %v4770_v42 }
 0x356   :  { %3652 = vmatmul.msk.f32.vlgmr.msra.gmra.mxu2 %vm661_vm14, %v1232_v50  ;;  %3654 = vmatmul.msk.f32.vlgmr.msra.gmra.mxu3 %vm661_vm14, %v1232_v50  ;;  %6438 = vst [vmem:[#allocation27_spill] sm:$0xff] %v4774_v48  ;;  %v4778_v50 = vld [vmem:[#allocation2 + $0x8] sm:$0xff] }
 0x357   :  { %1409 = vmatpush.msrb.mxu0 %v4600_v47  ;;  %1429 = vmatpush.msrb.mxu1 %v4602_v51  ;;  %6439 = vst [vmem:[#allocation28_spill] sm:$0xff] %v4776_v49 }
 0x358   :  { %1449 = vmatpush.msra.mxu2 %v4604_v52  ;;  %1469 = vmatpush.msra.mxu3 %v4608_v53  ;;  %6440 = vst [vmem:[#allocation29_spill] sm:$0xff] %v4778_v50 }
 0x359   :  { %1410 = vmatpush.msrb.mxu0 %v4610_v54  ;;  %1430 = vmatpush.msrb.mxu1 %v4612_v33 }
 0x35a   :  { %1450 = vmatpush.msra.mxu2 %v4616_v55  ;;  %1470 = vmatpush.msra.mxu3 %v4618_v56 }
 0x35b   :  { %1411 = vmatpush.msrb.mxu0 %v4620_v57  ;;  %1431 = vmatpush.msrb.mxu1 %v4624_v11 }
 0x35c   :  { %1451 = vmatpush.msra.mxu2 %v4626_v13  ;;  %1471 = vmatpush.msra.mxu3 %v4628_v1 }
 0x35d   :  { %1412 = vmatpush.msrb.mxu0 %v4636_v58  ;;  %1432 = vmatpush.msrb.mxu1 %v4638_v59 }
 0x35e   :  { %1452 = vmatpush.msra.mxu2 %v4640_v60  ;;  %1472 = vmatpush.msra.mxu3 %v4644_v61 }
 0x35f   :  { %1413 = vmatpush.msrb.mxu0 %v4646_v62  ;;  %1433 = vmatpush.msrb.mxu1 %v4648_v63 }
 0x360   :  { %1453 = vmatpush.msra.mxu2 %v4652_v0  ;;  %1473 = vmatpush.msra.mxu3 %v4654_v5 }
 0x361   :  { %1414 = vmatpush.msrb.mxu0 %v4656_v7  ;;  %1434 = vmatpush.msrb.mxu1 %v4660_v24 }
 0x362   :  { %1454 = vmatpush.msra.mxu2 %v4662_v8  ;;  %1474 = vmatpush.msra.mxu3 %v4664_v9 }
 0x363   :  { %1415 = vmatpush.msrb.mxu0 %v4668_v10  ;;  %1435 = vmatpush.msrb.mxu1 %v4670_v14 }
 0x364   :  { %1455 = vmatpush.msra.mxu2 %v4674_v4  ;;  %1475 = vmatpush.msra.mxu3 %v4676_v15 }
 0x365   :  { %1416 = vmatpush.msrb.mxu0 %v4682_v16  ;;  %1436 = vmatpush.msrb.mxu1 %v4684_v19 }
 0x366   :  { %1456 = vmatpush.msra.mxu2 %v4686_v3  ;;  %1476 = vmatpush.msra.mxu3 %v4690_v21 }
 0x367   :  { %1417 = vmatpush.msrb.mxu0 %v4692_v22  ;;  %1437 = vmatpush.msrb.mxu1 %v4694_v23 }
 0x368   :  { %1457 = vmatpush.msra.mxu2 %v4698_v25  ;;  %1477 = vmatpush.msra.mxu3 %v4700_v2 }
 0x369   :  { %1418 = vmatpush.msrb.mxu0 %v4704_v12  ;;  %1438 = vmatpush.msrb.mxu1 %v4706_v17 }
 0x36a   :  { %1458 = vmatpush.msra.mxu2 %v4710_v6  ;;  %1478 = vmatpush.msra.mxu3 %v4712_v26 }
 0x36b   :  { %1419 = vmatpush.msrb.mxu0 %v4716_v28  ;;  %1439 = vmatpush.msrb.mxu1 %v4718_v29 }
 0x36c   :  { %1459 = vmatpush.msra.mxu2 %v4722_v30  ;;  %1479 = vmatpush.msra.mxu3 %v4724_v31 }
 0x36d   :  { %1420 = vmatpush.msrb.mxu0 %v4730_v32  ;;  %1440 = vmatpush.msrb.mxu1 %v4732_v34 }
 0x36e   :  { %1460 = vmatpush.msra.mxu2 %v4734_v35  ;;  %1480 = vmatpush.msra.mxu3 %v4738_v36 }
 0x36f   :  { %1421 = vmatpush.msrb.mxu0 %v4742_v37  ;;  %1441 = vmatpush.msrb.mxu1 %v4744_v38 }
 0x370   :  { %1461 = vmatpush.msra.mxu2 %v4746_v39  ;;  %1481 = vmatpush.msra.mxu3 %v4750_v40 }
 0x371   :  { %1422 = vmatpush.msrb.mxu0 %v4752_v27  ;;  %1442 = vmatpush.msrb.mxu1 %v4754_v41 }
 0x372   :  { %1462 = vmatpush.msra.mxu2 %v4758_v18  ;;  %1482 = vmatpush.msra.mxu3 %v4760_v44 }
 0x373   :  { %1423 = vmatpush.msrb.mxu0 %v4766_v45  ;;  %1443 = vmatpush.msrb.mxu1 %v4768_v46  ;;  %v3925_v46 = vld [vmem:[%s6218_s0 + $0x1c] sm:$0xf] }
 0x374   :  { %1463 = vmatpush.msra.mxu2 %v4770_v42  ;;  %1483 = vmatpush.msra.mxu3 %v4774_v48 }
 0x375   :  { %1424 = vmatpush.msrb.mxu0 %v4776_v49  ;;  %1444 = vmatpush.msrb.mxu1 %v4778_v50 }
 0x376   :  { %1464 = vmatpush.msra.mxu2 %v4782_v43  ;;  %1484 = vmatpush.msra.mxu3 %v4784_v20 }
 0x3b2   :  { %v1318_v44 = vpop.permute.xlu0 %1317 }
 0x3b3   :  { %v1324_v45 = vsel %vm657_vm12, %v3925_v46, %v1318_v44  ;;  %v6444_v44 = vld [vmem:[#allocation22_spill] sm:$0xff]  ;;  %v6446_v46 = vld [vmem:[#allocation24_spill] sm:$0xff] }
 0x3ba   :  { %v1322_v18 = vpop.permute.xlu0 %1321 }
 0x3bb   :  { %v1325_v42 = vsel %vm659_vm13, %v1324_v45, %v1322_v18  ;;  %v6443_v18 = vmov 0.0   ;;  %v6445_v45 = vld [vmem:[#allocation23_spill] sm:$0xff] }
 0x3bc   :  { %3656 = vmatmul.msk.f32.vlgmr.msra.gmra.mxu0 %vm661_vm14, %v1325_v42  ;;  %3658 = vmatmul.msk.f32.vlgmr.msra.gmra.mxu1 %vm661_vm14, %v1325_v42 }
 0x3bd   :  { %3660 = vmatmul.msk.f32.vlgmr.msrb.gmra.mxu2 %vm661_vm14, %v1325_v42  ;;  %3662 = vmatmul.msk.f32.vlgmr.msrb.gmra.mxu3 %vm661_vm14, %v1325_v42  ;;  %v6447_v42 = vld [vmem:[#allocation25_spill] sm:$0xff] }
 0x3be   :  { %1556 = vmatpush.msra.mxu0 %v4600_v47  ;;  %1576 = vmatpush.msra.mxu1 %v4602_v51 }
 0x3bf   :  { %1596 = vmatpush.msrb.mxu2 %v4604_v52  ;;  %1616 = vmatpush.msrb.mxu3 %v4608_v53 }
 0x3c0   :  { %1557 = vmatpush.msra.mxu0 %v4610_v54  ;;  %1577 = vmatpush.msra.mxu1 %v4612_v33 }
 0x3c1   :  { %1597 = vmatpush.msrb.mxu2 %v4616_v55  ;;  %1617 = vmatpush.msrb.mxu3 %v4618_v56 }
 0x3c2   :  { %1558 = vmatpush.msra.mxu0 %v4620_v57  ;;  %1578 = vmatpush.msra.mxu1 %v4624_v11 }
 0x3c3   :  { %1598 = vmatpush.msrb.mxu2 %v4626_v13  ;;  %1618 = vmatpush.msrb.mxu3 %v4628_v1 }
 0x3c4   :  { %1425 = vmatmul.f32.vlgmr.msrb.gmra.mxu0 %v6443_v18  ;;  %1445 = vmatmul.f32.vlgmr.msrb.gmra.mxu1 %v6443_v18 }
 0x3c5   :  { %1465 = vmatmul.f32.vlgmr.msra.gmra.mxu2 %v6443_v18  ;;  %1485 = vmatmul.f32.vlgmr.msra.gmra.mxu3 %v6443_v18  ;;  %v6448_v18 = vld [vmem:[#allocation26_spill] sm:$0xff] }
 0x3c6   :  { %1559 = vmatpush.msra.mxu0 %v4636_v58  ;;  %1579 = vmatpush.msra.mxu1 %v4638_v59 }
 0x3c7   :  { %1599 = vmatpush.msrb.mxu2 %v4640_v60  ;;  %1619 = vmatpush.msrb.mxu3 %v4644_v61 }
 0x3c8   :  { %1560 = vmatpush.msra.mxu0 %v4646_v62  ;;  %1580 = vmatpush.msra.mxu1 %v4648_v63 }
 0x3c9   :  { %1600 = vmatpush.msrb.mxu2 %v4652_v0  ;;  %1620 = vmatpush.msrb.mxu3 %v4654_v5 }
 0x3ca   :  { %1561 = vmatpush.msra.mxu0 %v4656_v7  ;;  %1581 = vmatpush.msra.mxu1 %v4660_v24 }
 0x3cb   :  { %1601 = vmatpush.msrb.mxu2 %v4662_v8  ;;  %1621 = vmatpush.msrb.mxu3 %v4664_v9 }
 0x3cc   :  { %1562 = vmatpush.msra.mxu0 %v4668_v10  ;;  %1582 = vmatpush.msra.mxu1 %v4670_v14 }
 0x3cd   :  { %1602 = vmatpush.msrb.mxu2 %v4674_v4  ;;  %1622 = vmatpush.msrb.mxu3 %v4676_v15 }
 0x3ce   :  { %1563 = vmatpush.msra.mxu0 %v4682_v16  ;;  %1583 = vmatpush.msra.mxu1 %v4684_v19 }
 0x3cf   :  { %1603 = vmatpush.msrb.mxu2 %v4686_v3  ;;  %1623 = vmatpush.msrb.mxu3 %v4690_v21 }
 0x3d0   :  { %1564 = vmatpush.msra.mxu0 %v4692_v22  ;;  %1584 = vmatpush.msra.mxu1 %v4694_v23 }
 0x3d1   :  { %1604 = vmatpush.msrb.mxu2 %v4698_v25  ;;  %1624 = vmatpush.msrb.mxu3 %v4700_v2 }
 0x3d2   :  { %1565 = vmatpush.msra.mxu0 %v4704_v12  ;;  %1585 = vmatpush.msra.mxu1 %v4706_v17 }
 0x3d3   :  { %1605 = vmatpush.msrb.mxu2 %v4710_v6  ;;  %1625 = vmatpush.msrb.mxu3 %v4712_v26 }
 0x3d4   :  { %1566 = vmatpush.msra.mxu0 %v4716_v28  ;;  %1586 = vmatpush.msra.mxu1 %v4718_v29 }
 0x3d5   :  { %1606 = vmatpush.msrb.mxu2 %v4722_v30  ;;  %1626 = vmatpush.msrb.mxu3 %v4724_v31 }
 0x3d6   :  { %1567 = vmatpush.msra.mxu0 %v4730_v32  ;;  %1587 = vmatpush.msra.mxu1 %v4732_v34 }
 0x3d7   :  { %1607 = vmatpush.msrb.mxu2 %v4734_v35  ;;  %1627 = vmatpush.msrb.mxu3 %v4738_v36 }
 0x3d8   :  { %1568 = vmatpush.msra.mxu0 %v4742_v37  ;;  %1588 = vmatpush.msra.mxu1 %v4744_v38 }
 0x3d9   :  { %1608 = vmatpush.msrb.mxu2 %v4746_v39  ;;  %1628 = vmatpush.msrb.mxu3 %v4750_v40 }
 0x3da   :  { %1569 = vmatpush.msra.mxu0 %v4752_v27  ;;  %1589 = vmatpush.msra.mxu1 %v4754_v41 }
 0x3db   :  { %1609 = vmatpush.msrb.mxu2 %v6444_v44  ;;  %1629 = vmatpush.msrb.mxu3 %v6445_v45 }
 0x3dc   :  { %1570 = vmatpush.msra.mxu0 %v6446_v46  ;;  %1590 = vmatpush.msra.mxu1 %v6447_v42 }
 0x3dd   :  { %1610 = vmatpush.msrb.mxu2 %v6448_v18  ;;  %1630 = vmatpush.msrb.mxu3 %v4774_v48 }
 0x3de   :  { %1571 = vmatpush.msra.mxu0 %v4776_v49  ;;  %1591 = vmatpush.msra.mxu1 %v4778_v50 }
 0x3df   :  { %1611 = vmatpush.msrb.mxu2 %v4782_v43  ;;  %1631 = vmatpush.msrb.mxu3 %v4784_v20 }
 0x3e0   :  { %1703 = vmatpush.msrb.mxu0 %v4600_v47  ;;  %1723 = vmatpush.msrb.mxu1 %v4602_v51 }
 0x3e1   :  { %1743 = vmatpush.msra.mxu2 %v4604_v52  ;;  %1763 = vmatpush.msra.mxu3 %v4608_v53 }
 0x3e2   :  { %1704 = vmatpush.msrb.mxu0 %v4610_v54  ;;  %1724 = vmatpush.msrb.mxu1 %v4612_v33 }
 0x3e3   :  { %1744 = vmatpush.msra.mxu2 %v4616_v55  ;;  %1764 = vmatpush.msra.mxu3 %v4618_v56 }
 0x3e4   :  { %1705 = vmatpush.msrb.mxu0 %v4620_v57  ;;  %1725 = vmatpush.msrb.mxu1 %v4624_v11 }
 0x3e5   :  { %1745 = vmatpush.msra.mxu2 %v4626_v13  ;;  %1765 = vmatpush.msra.mxu3 %v4628_v1 }
 0x3e6   :  { %1706 = vmatpush.msrb.mxu0 %v4636_v58  ;;  %1726 = vmatpush.msrb.mxu1 %v4638_v59 }
 0x3e7   :  { %1746 = vmatpush.msra.mxu2 %v4640_v60  ;;  %1766 = vmatpush.msra.mxu3 %v4644_v61 }
 0x3e8   :  { %1707 = vmatpush.msrb.mxu0 %v4646_v62  ;;  %1727 = vmatpush.msrb.mxu1 %v4648_v63 }
 0x3e9   :  { %1747 = vmatpush.msra.mxu2 %v4652_v0  ;;  %1767 = vmatpush.msra.mxu3 %v4654_v5 }
 0x3ea   :  { %1708 = vmatpush.msrb.mxu0 %v4656_v7  ;;  %1728 = vmatpush.msrb.mxu1 %v4660_v24 }
 0x3eb   :  { %1748 = vmatpush.msra.mxu2 %v4662_v8  ;;  %1768 = vmatpush.msra.mxu3 %v4664_v9 }
 0x3ec   :  { %1709 = vmatpush.msrb.mxu0 %v4668_v10  ;;  %1729 = vmatpush.msrb.mxu1 %v4670_v14 }
 0x3ed   :  { %1749 = vmatpush.msra.mxu2 %v4674_v4  ;;  %1769 = vmatpush.msra.mxu3 %v4676_v15  ;;  %v695_v15 = vpop.f32.mrf.mxu0 }
 0x3ee   :  { %1710 = vmatpush.msrb.mxu0 %v4682_v16  ;;  %1730 = vmatpush.msrb.mxu1 %v4684_v19 }
 0x3ef   :  { %1750 = vmatpush.msra.mxu2 %v4686_v3  ;;  %1770 = vmatpush.msra.mxu3 %v4690_v21 }
 0x3f0   :  { %1711 = vmatpush.msrb.mxu0 %v4692_v22  ;;  %1731 = vmatpush.msrb.mxu1 %v4694_v23  ;;  %v715_v22 = vpop.f32.mrf.mxu1 }
 0x3f1   :  { %1751 = vmatpush.msra.mxu2 %v4698_v25  ;;  %1771 = vmatpush.msra.mxu3 %v4700_v2 }
 0x3f2   :  { %1712 = vmatpush.msrb.mxu0 %v4704_v12  ;;  %1732 = vmatpush.msrb.mxu1 %v4706_v17 }
 0x3f3   :  { %1752 = vmatpush.msra.mxu2 %v4710_v6  ;;  %1772 = vmatpush.msra.mxu3 %v4712_v26 }
 0x3f4   :  { %1713 = vmatpush.msrb.mxu0 %v4716_v28  ;;  %1733 = vmatpush.msrb.mxu1 %v4718_v29 }
 0x3f5   :  { %1753 = vmatpush.msra.mxu2 %v4722_v30  ;;  %1773 = vmatpush.msra.mxu3 %v4724_v31 }
 0x3f6   :  { %1714 = vmatpush.msrb.mxu0 %v4730_v32  ;;  %1734 = vmatpush.msrb.mxu1 %v4732_v34 }
 0x3f7   :  { %1754 = vmatpush.msra.mxu2 %v4734_v35  ;;  %1774 = vmatpush.msra.mxu3 %v4738_v36  ;;  %v4927_v36 = vpop.f32.mrf.mxu0 }
 0x3f8   :  { %1715 = vmatpush.msrb.mxu0 %v4742_v37  ;;  %1735 = vmatpush.msrb.mxu1 %v4744_v38  ;;  %v4929_v37 = vpop.f32.mrf.mxu1 }
 0x3f9   :  { %1755 = vmatpush.msra.mxu2 %v4746_v39  ;;  %1775 = vmatpush.msra.mxu3 %v4750_v40  ;;  %6449 = vst [vmem:[#allocation32_spill] sm:$0xff] %v4929_v37 }
 0x3fa   :  { %1716 = vmatpush.msrb.mxu0 %v4752_v27  ;;  %1736 = vmatpush.msrb.mxu1 %v4754_v41 }
 0x3fb   :  { %1756 = vmatpush.msra.mxu2 %v6444_v44  ;;  %1776 = vmatpush.msra.mxu3 %v6445_v45  ;;  %v755_v45 = vpop.f32.mrf.mxu3 }
 0x3fc   :  { %1717 = vmatpush.msrb.mxu0 %v6446_v46  ;;  %1737 = vmatpush.msrb.mxu1 %v6447_v42 }
 0x3fd   :  { %1757 = vmatpush.msra.mxu2 %v6448_v18  ;;  %1777 = vmatpush.msra.mxu3 %v4774_v48 }
 0x3fe   :  { %1718 = vmatpush.msrb.mxu0 %v4776_v49  ;;  %1738 = vmatpush.msrb.mxu1 %v4778_v50 }
 0x3ff   :  { %1758 = vmatpush.msra.mxu2 %v4782_v43  ;;  %1778 = vmatpush.msra.mxu3 %v4784_v20  ;;  %v4937_v46 = vpop.f32.mrf.mxu0  ;;  %v4953_v43 = vpop.f32.mrf.mxu2 }
 0x400   :  { %6450 = vst [vmem:[#allocation33_spill] sm:$0xff] %v4937_v46  ;;  %v4939_v42 = vpop.f32.mrf.mxu1 }
 0x401   :  { %6451 = vst [vmem:[#allocation34_spill] sm:$0xff] %v4939_v42 }
 0x402   :  { %6458 = vst [vmem:[#allocation41_spill] sm:$0xff] %v4953_v43 }
 0x403   :  { %v4941_v44 = vpop.f32.mrf.mxu3 }
 0x404   :  { %6452 = vst [vmem:[#allocation35_spill] sm:$0xff] %v4941_v44 }
 0x407   :  { %v4943_v37 = vpop.f32.mrf.mxu0  ;;  %v4961_v42 = vpop.f32.mrf.mxu2 }
 0x408   :  { %6453 = vst [vmem:[#allocation36_spill] sm:$0xff] %v4943_v37  ;;  %v4945_v18 = vpop.f32.mrf.mxu1 }
 0x409   :  { %6454 = vst [vmem:[#allocation37_spill] sm:$0xff] %v4945_v18 }
 0x40a   :  { %6462 = vst [vmem:[#allocation45_spill] sm:$0xff] %v4961_v42 }
 0x40b   :  { %v4947_v48 = vpop.f32.mrf.mxu3 }
 0x40c   :  { %6455 = vst [vmem:[#allocation38_spill] sm:$0xff] %v4947_v48 }
 0x40f   :  { %v4949_v49 = vpop.f32.mrf.mxu0  ;;  %v4969_v48 = vpop.f32.mrf.mxu2 }
 0x410   :  { %6456 = vst [vmem:[#allocation39_spill] sm:$0xff] %v4949_v49  ;;  %v4951_v50 = vpop.f32.mrf.mxu1 }
 0x411   :  { %6457 = vst [vmem:[#allocation40_spill] sm:$0xff] %v4951_v50 }
 0x412   :  { %6466 = vst [vmem:[#allocation49_spill] sm:$0xff] %v4969_v48 }
 0x413   :  { %v4955_v20 = vpop.f32.mrf.mxu3 }
 0x414   :  { %6459 = vst [vmem:[#allocation42_spill] sm:$0xff] %v4955_v20 }
 0x417   :  { %v4957_v41 = vpop.f32.mrf.mxu0  ;;  %v4977_v20 = vpop.f32.mrf.mxu2 }
 0x418   :  { %6460 = vst [vmem:[#allocation43_spill] sm:$0xff] %v4957_v41  ;;  %v4959_v46 = vpop.f32.mrf.mxu1 }
 0x419   :  { %6461 = vst [vmem:[#allocation44_spill] sm:$0xff] %v4959_v46 }
 0x41a   :  { %6470 = vst [vmem:[#allocation53_spill] sm:$0xff] %v4977_v20 }
 0x41b   :  { %v4963_v44 = vpop.f32.mrf.mxu3 }
 0x41c   :  { %6463 = vst [vmem:[#allocation46_spill] sm:$0xff] %v4963_v44  ;;  %v143_v44 = vld [vmem:[%s6226_s8] sm:$0xf]  ;;  %s4121_s8 = smov 6  }
 0x41d   :  { %v4990_v48 = vperm.slane %v143_v44, 1  ;;  %v4998_v39 = vperm.slane %v143_v44, 3 }
 0x41f   :  { %v4965_v37 = vpop.f32.mrf.mxu0  ;;  %6475 = vst [vmem:[#allocation58_spill] sm:$0xff] %v4990_v48  ;;  %v756_v38 = vadd.f32 %v755_v45, %v4998_v39 }
 0x420   :  { %6464 = vst [vmem:[#allocation47_spill] sm:$0xff] %v4965_v37  ;;  %v4967_v18 = vpop.f32.mrf.mxu1 }
 0x421   :  { %6465 = vst [vmem:[#allocation48_spill] sm:$0xff] %v4967_v18  ;;  %v4988_v18 = vperm.slane %v143_v44, 0 }
 0x422   :  { %6478 = vst [vmem:[#allocation61_spill] sm:$0xff] %v4998_v39 }
 0x423   :  { %v4971_v49 = vpop.f32.mrf.mxu3  ;;  %6474 = vst [vmem:[#allocation57_spill] sm:$0xff] %v4988_v18 }
 0x424   :  { %6467 = vst [vmem:[#allocation50_spill] sm:$0xff] %v4971_v49  ;;  %v4994_v49 = vpop.f32.mrf.mxu2 }
 0x425   :  { %6476 = vst [vmem:[#allocation59_spill] sm:$0xff] %v4994_v49 }
 0x427   :  { %v4973_v50 = vpop.f32.mrf.mxu0 }
 0x428   :  { %6468 = vst [vmem:[#allocation51_spill] sm:$0xff] %v4973_v50  ;;  %v4975_v43 = vpop.f32.mrf.mxu1  ;;  %v696_v50 = vadd.f32 %v695_v15, %v4988_v18 }
 0x429   :  { %6469 = vst [vmem:[#allocation52_spill] sm:$0xff] %v4975_v43  ;;  %v716_v43 = vadd.f32 %v715_v22, %v4990_v48 }
 0x42b   :  { %v4979_v41 = vpop.f32.mrf.mxu3 }
 0x42c   :  { %6471 = vst [vmem:[#allocation54_spill] sm:$0xff] %v4979_v41 }
 0x439   :  { %v4984_v46 = vpop.f32.mrf.mxu0  ;;  %v4986_v37 = vpop.f32.mrf.mxu1 }
 0x43a   :  { %6472 = vst [vmem:[#allocation55_spill] sm:$0xff] %v4984_v46 }
 0x43b   :  { %6473 = vst [vmem:[#allocation56_spill] sm:$0xff] %v4986_v37 }
 0x440   :  { %v4996_v20 = vpop.f32.mrf.mxu3  ;;  %v5001_v35 = vpop.f32.mrf.mxu2 }
 0x441   :  { %6477 = vst [vmem:[#allocation60_spill] sm:$0xff] %v4996_v20  ;;  %v1426_v41 = vpop.f32.mrf.mxu0  ;;  %v1446_v42 = vpop.f32.mrf.mxu1 }
 0x442   :  { %v1489_v27 = vadd.f32 %v1426_v41, %v696_v50  ;;  %v1490_v40 = vadd.f32 %v1446_v42, %v716_v43  ;;  %6479 = vst [vmem:[#allocation62_spill] sm:$0xff] %v5001_v35  ;;  %v5003_v41 = vperm.slane %v143_v44, 2 }
 0x444   :  { %v3663_v46 = vmul.f32 -1.442695, %v1489_v27  ;;  %v3664_v37 = vmul.f32 -1.442695, %v1490_v40  ;;  %6480 = vst [vmem:[#allocation63_spill] sm:$0xff] %v5003_v41  ;;  %v736_v27 = vadd.f32 %v4927_v36, %v5003_v41 }
 0x446   :  { %3746 = vpow2.f32 %v3663_v46 }
 0x447   :  { %3748 = vpow2.f32 %v3664_v37 }
 0x448   :  { %v1486_v15 = vpop.f32.mrf.mxu3  ;;  %v1466_v43 = vpop.f32.mrf.mxu2 }
 0x449   :  { %v1492_v22 = vadd.f32 %v1486_v15, %v756_v38  ;;  %v1491_v45 = vadd.f32 %v1466_v43, %v736_v27 }
 0x44b   :  { %v3665_v18 = vmul.f32 -1.442695, %v1492_v22 }
 0x44c   :  { %v3747_v49 = vpop.eup %3746 }
 0x44d   :  { %v3749_v48 = vpop.eup %3748  ;;  %v1496_v20 = vadd.f32 1.0, %v3747_v49  ;;  %3750 = vpow2.f32 %v3665_v18 }
 0x44e   :  { %v1515_v34 = vadd.f32 1.0, %v3749_v48 }
 0x44f   :  { %3752 = vrcp.f32 %v1496_v20  ;;  %v1508_v18 = vand.u32 2147483648, %v1496_v20  ;;  %v1506_v22 = vand.u32 2147483647, %v1496_v20  ;;  %vm1502_vm2 = vweird.f32 %v1496_v20 }
 0x450   :  { %3754 = vrcp.f32 %v1515_v34  ;;  %v1527_v48 = vand.u32 2147483648, %v1515_v34  ;;  %v1525_v39 = vand.u32 2147483647, %v1515_v34  ;;  %vm1521_vm3 = vweird.f32 %v1515_v34 }
 0x451   :  { %v1509_v43 = vor.u32 1.1754944e-38, %v1508_v18  ;;  %vm1507_vm5 = vcmp.eq.f32.partialorder %v1506_v22, 8.507059e+37 }
 0x452   :  { %v1528_v41 = vor.u32 1.1754944e-38, %v1527_v48  ;;  %vm1526_vm7 = vcmp.eq.f32.partialorder %v1525_v39, 8.507059e+37 }
 0x453   :  { %v3751_v40 = vpop.eup %3750 }
 0x454   :  { %v1535_v37 = vadd.f32 1.0, %v3751_v40 }
 0x455   :  { %v3753_v50 = vpop.eup %3752 }
 0x456   :  { %v3755_v46 = vpop.eup %3754  ;;  %v1498_v38 = vmul.f32 %v3753_v50, %v1496_v20  ;;  %3756 = vrcp.f32 %v1535_v37  ;;  %vm1503_vm15 = vweird.f32 %v3753_v50  ;;  %vm1541_vm9 = vweird.f32 %v1535_v37 }
 0x457   :  { %v1517_v42 = vmul.f32 %v3755_v46, %v1515_v34  ;;  %3758 = vtanh.f32 %v1491_v45  ;;  %vm1522_vm1 = vweird.f32 %v3755_v46  ;;  %vm1504_vm4 = vmor %vm1502_vm2, %vm1503_vm15  ;;  %v1547_v34 = vand.u32 2147483648, %v1535_v37 }
 0x458   :  { %v1499_v15 = vsub.f32 1.0, %v1498_v38  ;;  %vm1523_vm6 = vmor %vm1521_vm3, %vm1522_vm1 }
 0x459   :  { %v1518_v49 = vsub.f32 1.0, %v1517_v42  ;;  %v1548_v18 = vor.u32 1.1754944e-38, %v1547_v34 }
 0x45a   :  { %v1500_v44 = vmul.f32 %v3753_v50, %v1499_v15 }
 0x45b   :  { %v1519_v35 = vmul.f32 %v3755_v46, %v1518_v49 }
 0x45c   :  { %v3757_v32 = vpop.eup %3756  ;;  %v1501_v36 = vadd.f32 %v3753_v50, %v1500_v44 }
 0x45d   :  { %v1520_v40 = vadd.f32 %v3755_v46, %v1519_v35  ;;  %v1537_v27 = vmul.f32 %v3757_v32, %v1535_v37  ;;  %v3759_v45 = vpop.eup %3758  ;;  %vm1542_vm8 = vweird.f32 %v3757_v32  ;;  %v1545_v35 = vand.u32 2147483647, %v1535_v37  ;;  %v6510_v37 = vld [vmem:[#allocation33_spill] sm:$0xff] }
 0x45e   :  { %v1505_v38 = vsel %vm1504_vm4, %v3753_v50, %v1501_v36  ;;  %vm1543_vm15 = vmor %vm1541_vm9, %vm1542_vm8 }
 0x45f   :  { %v1510_v42 = vsel %vm1507_vm5, %v1509_v43, %v1505_v38  ;;  %v1524_v15 = vsel %vm1523_vm6, %v3755_v46, %v1520_v40  ;;  %v1538_v31 = vsub.f32 1.0, %v1537_v27  ;;  %vm1546_vm1 = vcmp.eq.f32.partialorder %v1545_v35, 8.507059e+37 }
 0x460   :  { %v1529_v49 = vsel %vm1526_vm7, %v1528_v41, %v1524_v15  ;;  %v1552_v30 = vmul.f32 %v3759_v45, %v1510_v42  ;;  %v6509_v41 = vld [vmem:[#allocation57_spill] sm:$0xff]  ;;  %v6512_v15 = vld [vmem:[#allocation35_spill] sm:$0xff] }
 0x461   :  { %v1551_v29 = vmul.f32 0.0, %v1529_v49  ;;  %v1539_v28 = vmul.f32 %v3757_v32, %v1538_v31  ;;  %v6508_v31 = vld [vmem:[#allocation32_spill] sm:$0xff]  ;;  %v789_v22 = vadd.f32 %v6510_v37, %v6509_v41  ;;  %v6511_v42 = vld [vmem:[#allocation61_spill] sm:$0xff]  ;;  %v6514_v37 = vld [vmem:[#allocation34_spill] sm:$0xff] }
 0x462   :  { %v849_v49 = vadd.f32 %v6512_v15, %v6511_v42 }
 0x463   :  { %v5007_v44 = vadd.f32 %v1552_v30, %v1551_v29  ;;  %v1540_v20 = vadd.f32 %v3757_v32, %v1539_v28  ;;  %v6505_v28 = vld [vmem:[#allocation30_spill] sm:$0xff]  ;;  %v6506_v29 = vld [vmem:[#allocation31_spill] sm:$0xff] }
 0x464   :  { %v6507_v30 = vld [vmem:[#allocation58_spill] sm:$0xff] }
 0x465   :  { %3760 = vtanh.f32 %v5007_v44  ;;  %v1544_v50 = vsel %vm1543_vm15, %v3757_v32, %v1540_v20  ;;  %v809_v32 = vadd.f32 %v6508_v31, %v6507_v30 }
 0x466   :  { %v1549_v39 = vsel %vm1546_vm1, %v1548_v18, %v1544_v50 }
 0x46b   :  { %v3761_v46 = vpop.eup %3760 }
 0x46c   :  { %v1555_v48 = vmul.f32 %v3761_v46, %v1549_v39 }
 0x46e   :  { %1572 = vmatmul.f32.vlgmr.msra.gmra.mxu0 %v1555_v48  ;;  %1592 = vmatmul.f32.vlgmr.msra.gmra.mxu1 %v1555_v48 }
 0x46f   :  { %1612 = vmatmul.f32.vlgmr.msrb.gmra.mxu2 %v1555_v48  ;;  %1632 = vmatmul.f32.vlgmr.msrb.gmra.mxu3 %v1555_v48 }
 0x470   :  { %1850 = vmatpush.msra.mxu0 %v4600_v47  ;;  %1870 = vmatpush.msra.mxu1 %v4602_v51  ;;  %v6481_v47 = vld [vmem:[#allocation6_spill] sm:$0xff]  ;;  %v6482_v51 = vld [vmem:[#allocation7_spill] sm:$0xff] }
 0x471   :  { %1890 = vmatpush.msrb.mxu2 %v4604_v52  ;;  %1910 = vmatpush.msrb.mxu3 %v4608_v53  ;;  %v6483_v52 = vld [vmem:[#allocation8_spill] sm:$0xff]  ;;  %v6484_v53 = vld [vmem:[#allocation9_spill] sm:$0xff] }
 0x472   :  { %1851 = vmatpush.msra.mxu0 %v4610_v54  ;;  %1871 = vmatpush.msra.mxu1 %v4612_v33  ;;  %v6485_v54 = vld [vmem:[#allocation10_spill] sm:$0xff]  ;;  %v6486_v33 = vld [vmem:[#allocation11_spill] sm:$0xff] }
 0x473   :  { %1891 = vmatpush.msrb.mxu2 %v4616_v55  ;;  %1911 = vmatpush.msrb.mxu3 %v4618_v56  ;;  %v6487_v55 = vld [vmem:[#allocation12_spill] sm:$0xff]  ;;  %v6488_v56 = vld [vmem:[#allocation13_spill] sm:$0xff] }
 0x474   :  { %1852 = vmatpush.msra.mxu0 %v4620_v57  ;;  %1872 = vmatpush.msra.mxu1 %v4624_v11  ;;  %v6489_v57 = vld [vmem:[#allocation14_spill] sm:$0xff]  ;;  %v6490_v11 = vld [vmem:[#allocation15_spill] sm:$0xff] }
 0x475   :  { %1892 = vmatpush.msrb.mxu2 %v4626_v13  ;;  %1912 = vmatpush.msrb.mxu3 %v4628_v1  ;;  %v6491_v13 = vld [vmem:[#allocation16_spill] sm:$0xff]  ;;  %v6492_v1 = vld [vmem:[#allocation17_spill] sm:$0xff] }
 0x476   :  { %1853 = vmatpush.msra.mxu0 %v4636_v58  ;;  %1873 = vmatpush.msra.mxu1 %v4638_v59  ;;  %v6493_v58 = vld [vmem:[#allocation18_spill] sm:$0xff]  ;;  %v6494_v59 = vld [vmem:[#allocation19_spill] sm:$0xff] }
 0x477   :  { %1893 = vmatpush.msrb.mxu2 %v4640_v60  ;;  %1913 = vmatpush.msrb.mxu3 %v4644_v61  ;;  %v6495_v60 = vld [vmem:[#allocation20_spill] sm:$0xff]  ;;  %v6496_v61 = vld [vmem:[#allocation21_spill] sm:$0xff] }
 0x478   :  { %1854 = vmatpush.msra.mxu0 %v4646_v62  ;;  %1874 = vmatpush.msra.mxu1 %v4648_v63  ;;  %v6497_v62 = vld [vmem:[#allocation22_spill] sm:$0xff]  ;;  %v6498_v63 = vld [vmem:[#allocation23_spill] sm:$0xff] }
 0x479   :  { %1894 = vmatpush.msrb.mxu2 %v4652_v0  ;;  %1914 = vmatpush.msrb.mxu3 %v4654_v5  ;;  %v6499_v0 = vld [vmem:[#allocation24_spill] sm:$0xff]  ;;  %v6500_v5 = vld [vmem:[#allocation25_spill] sm:$0xff] }
 0x47a   :  { %1855 = vmatpush.msra.mxu0 %v4656_v7  ;;  %1875 = vmatpush.msra.mxu1 %v4660_v24  ;;  %v6501_v7 = vld [vmem:[#allocation26_spill] sm:$0xff]  ;;  %v6502_v24 = vld [vmem:[#allocation27_spill] sm:$0xff] }
 0x47b   :  { %1895 = vmatpush.msrb.mxu2 %v4662_v8  ;;  %1915 = vmatpush.msrb.mxu3 %v4664_v9  ;;  %v6503_v8 = vld [vmem:[#allocation28_spill] sm:$0xff]  ;;  %v6504_v9 = vld [vmem:[#allocation29_spill] sm:$0xff] }
 0x47c   :  { %1856 = vmatpush.msra.mxu0 %v4668_v10  ;;  %1876 = vmatpush.msra.mxu1 %v4670_v14 }
 0x47d   :  { %1896 = vmatpush.msrb.mxu2 %v4674_v4  ;;  %1916 = vmatpush.msrb.mxu3 %v6481_v47 }
 0x47e   :  { %1857 = vmatpush.msra.mxu0 %v4682_v16  ;;  %1877 = vmatpush.msra.mxu1 %v4684_v19 }
 0x47f   :  { %1897 = vmatpush.msrb.mxu2 %v4686_v3  ;;  %1917 = vmatpush.msrb.mxu3 %v4690_v21 }
 0x480   :  { %1858 = vmatpush.msra.mxu0 %v6482_v51  ;;  %1878 = vmatpush.msra.mxu1 %v4694_v23 }
 0x481   :  { %1898 = vmatpush.msrb.mxu2 %v4698_v25  ;;  %1918 = vmatpush.msrb.mxu3 %v4700_v2 }
 0x482   :  { %1859 = vmatpush.msra.mxu0 %v4704_v12  ;;  %1879 = vmatpush.msra.mxu1 %v4706_v17 }
 0x483   :  { %1899 = vmatpush.msrb.mxu2 %v4710_v6  ;;  %1919 = vmatpush.msrb.mxu3 %v4712_v26 }
 0x484   :  { %1860 = vmatpush.msra.mxu0 %v6483_v52  ;;  %1880 = vmatpush.msra.mxu1 %v6484_v53 }
 0x485   :  { %1900 = vmatpush.msrb.mxu2 %v6485_v54  ;;  %1920 = vmatpush.msrb.mxu3 %v6486_v33 }
 0x486   :  { %1861 = vmatpush.msra.mxu0 %v6487_v55  ;;  %1881 = vmatpush.msra.mxu1 %v6488_v56 }
 0x487   :  { %1901 = vmatpush.msrb.mxu2 %v6489_v57  ;;  %1921 = vmatpush.msrb.mxu3 %v6490_v11 }
 0x488   :  { %1862 = vmatpush.msra.mxu0 %v6491_v13  ;;  %1882 = vmatpush.msra.mxu1 %v6492_v1 }
 0x489   :  { %1902 = vmatpush.msrb.mxu2 %v6493_v58  ;;  %1922 = vmatpush.msrb.mxu3 %v6494_v59 }
 0x48a   :  { %1863 = vmatpush.msra.mxu0 %v6495_v60  ;;  %1883 = vmatpush.msra.mxu1 %v6496_v61 }
 0x48b   :  { %1903 = vmatpush.msrb.mxu2 %v6497_v62  ;;  %1923 = vmatpush.msrb.mxu3 %v6498_v63 }
 0x48c   :  { %1864 = vmatpush.msra.mxu0 %v6499_v0  ;;  %1884 = vmatpush.msra.mxu1 %v6500_v5 }
 0x48d   :  { %1904 = vmatpush.msrb.mxu2 %v6501_v7  ;;  %1924 = vmatpush.msrb.mxu3 %v6502_v24 }
 0x48e   :  { %1865 = vmatpush.msra.mxu0 %v6503_v8  ;;  %1885 = vmatpush.msra.mxu1 %v6504_v9 }
 0x48f   :  { %1905 = vmatpush.msrb.mxu2 %v6505_v28  ;;  %1925 = vmatpush.msrb.mxu3 %v6506_v29 }
 0x4eb   :  { %v1573_v36 = vpop.f32.mrf.mxu0  ;;  %v1593_v43 = vpop.f32.mrf.mxu1 }
 0x4ec   :  { %v1636_v40 = vadd.f32 %v1573_v36, %v789_v22  ;;  %v1637_v27 = vadd.f32 %v1593_v43, %v809_v32  ;;  %v6513_v32 = vld [vmem:[#allocation63_spill] sm:$0xff] }
 0x4ed   :  { %v829_v22 = vadd.f32 %v6514_v37, %v6513_v32 }
 0x4ee   :  { %v3666_v38 = vmul.f32 -1.442695, %v1636_v40  ;;  %v3667_v45 = vmul.f32 -1.442695, %v1637_v27 }
 0x4f0   :  { %3762 = vpow2.f32 %v3666_v38 }
 0x4f1   :  { %3764 = vpow2.f32 %v3667_v45 }
 0x4f2   :  { %v1633_v20 = vpop.f32.mrf.mxu3  ;;  %v1613_v48 = vpop.f32.mrf.mxu2 }
 0x4f3   :  { %v1639_v34 = vadd.f32 %v1633_v20, %v849_v49  ;;  %v1638_v40 = vadd.f32 %v1613_v48, %v829_v22 }
 0x4f5   :  { %v3668_v35 = vmul.f32 -1.442695, %v1639_v34 }
 0x4f6   :  { %v3763_v50 = vpop.eup %3762 }
 0x4f7   :  { %v3765_v18 = vpop.eup %3764  ;;  %v1643_v46 = vadd.f32 1.0, %v3763_v50  ;;  %3766 = vpow2.f32 %v3668_v35 }
 0x4f8   :  { %v1662_v39 = vadd.f32 1.0, %v3765_v18 }
 0x4f9   :  { %3768 = vrcp.f32 %v1643_v46  ;;  %v1655_v20 = vand.u32 2147483648, %v1643_v46  ;;  %v1653_v50 = vand.u32 2147483647, %v1643_v46  ;;  %vm1649_vm4 = vweird.f32 %v1643_v46 }
 0x4fa   :  { %3770 = vrcp.f32 %v1662_v39  ;;  %v1674_v34 = vand.u32 2147483648, %v1662_v39  ;;  %v1672_v42 = vand.u32 2147483647, %v1662_v39  ;;  %vm1668_vm5 = vweird.f32 %v1662_v39 }
 0x4fb   :  { %v1656_v48 = vor.u32 1.1754944e-38, %v1655_v20  ;;  %vm1654_vm8 = vcmp.eq.f32.partialorder %v1653_v50, 8.507059e+37 }
 0x4fc   :  { %vm1673_vm9 = vcmp.eq.f32.partialorder %v1672_v42, 8.507059e+37 }
 0x4fd   :  { %v3767_v31 = vpop.eup %3766 }
 0x4fe   :  { %v1682_v36 = vadd.f32 1.0, %v3767_v31 }
 0x4ff   :  { %v3769_v43 = vpop.eup %3768 }
 0x500   :  { %v3771_v27 = vpop.eup %3770  ;;  %v1645_v38 = vmul.f32 %v3769_v43, %v1643_v46  ;;  %3772 = vrcp.f32 %v1682_v36  ;;  %vm1650_vm2 = vweird.f32 %v3769_v43  ;;  %v1694_v20 = vand.u32 2147483648, %v1682_v36 }
 0x501   :  { %v1664_v45 = vmul.f32 %v3771_v27, %v1662_v39  ;;  %3774 = vtanh.f32 %v1638_v40  ;;  %vm1669_vm3 = vweird.f32 %v3771_v27  ;;  %vm1651_vm6 = vmor %vm1649_vm4, %vm1650_vm2  ;;  %vm1688_vm1 = vweird.f32 %v1682_v36 }
 0x502   :  { %v1646_v15 = vsub.f32 1.0, %v1645_v38  ;;  %vm1670_vm7 = vmor %vm1668_vm5, %vm1669_vm3  ;;  %v1675_v38 = vor.u32 1.1754944e-38, %v1674_v34  ;;  %v1695_v50 = vor.u32 1.1754944e-38, %v1694_v20  ;;  %v5140_v20 = vld [vmem:[#allocation2 + $0x170] sm:$0xff] }
 0x503   :  { %v1665_v49 = vsub.f32 1.0, %v1664_v45 }
 0x504   :  { %v1647_v35 = vmul.f32 %v3769_v43, %v1646_v15 }
 0x505   :  { %v1666_v18 = vmul.f32 %v3771_v27, %v1665_v49 }
 0x506   :  { %v3773_v30 = vpop.eup %3772  ;;  %v1648_v37 = vadd.f32 %v3769_v43, %v1647_v35 }
 0x507   :  { %v1667_v31 = vadd.f32 %v3771_v27, %v1666_v18  ;;  %v1684_v22 = vmul.f32 %v3773_v30, %v1682_v36  ;;  %v3775_v40 = vpop.eup %3774  ;;  %vm1689_vm15 = vweird.f32 %v3773_v30 }
 0x508   :  { %v1652_v45 = vsel %vm1651_vm6, %v3769_v43, %v1648_v37  ;;  %v1692_v43 = vand.u32 2147483647, %v1682_v36  ;;  %vm1690_vm2 = vmor %vm1688_vm1, %vm1689_vm15  ;;  %v5104_v36 = vld [vmem:[#allocation2 + $0x1d0] sm:$0xff]  ;;  %v5107_v37 = vld [vmem:[#allocation2 + $0x1d8] sm:$0xff] }
 0x509   :  { %v1657_v32 = vsel %vm1654_vm8, %v1656_v48, %v1652_v45  ;;  %v1671_v15 = vsel %vm1670_vm7, %v3771_v27, %v1667_v31  ;;  %v1685_v41 = vsub.f32 1.0, %v1684_v22  ;;  %v5110_v48 = vld [vmem:[#allocation2 + $0x1a0] sm:$0xff]  ;;  %v5113_v31 = vld [vmem:[#allocation2 + $0x1a8] sm:$0xff]  ;;  %v5116_v22 = vld [vmem:[#allocation2 + $0x1b0] sm:$0xff] }
 0x50a   :  { %v1676_v49 = vsel %vm1673_vm9, %v1675_v38, %v1671_v15  ;;  %v1699_v29 = vmul.f32 %v3775_v40, %v1657_v32  ;;  %vm1693_vm3 = vcmp.eq.f32.partialorder %v1692_v43, 8.507059e+37  ;;  %v5101_v32 = vld [vmem:[#allocation2 + $0x1c8] sm:$0xff]  ;;  %v5119_v38 = vld [vmem:[#allocation2 + $0x1b8] sm:$0xff]  ;;  %v5122_v45 = vld [vmem:[#allocation2 + $0x180] sm:$0xff] }
 0x50b   :  { %v1698_v28 = vmul.f32 %v1676_v49, %v5007_v44  ;;  %v1686_v35 = vmul.f32 %v3773_v30, %v1685_v41  ;;  %v5086_v44 = vld [vmem:[#allocation2 + $0x1e0] sm:$0xff]  ;;  %v5125_v40 = vld [vmem:[#allocation2 + $0x188] sm:$0xff]  ;;  %v5128_v15 = vld [vmem:[#allocation2 + $0x190] sm:$0xff] }
 0x50c   :  { %v5098_v41 = vld [vmem:[#allocation2 + $0x1c0] sm:$0xff]  ;;  %v5131_v49 = vld [vmem:[#allocation2 + $0x198] sm:$0xff] }
 0x50d   :  { %v5083_v46 = vadd.f32 %v1699_v29, %v1698_v28  ;;  %v1687_v39 = vadd.f32 %v3773_v30, %v1686_v35  ;;  %v5089_v28 = vld [vmem:[#allocation2 + $0x1e8] sm:$0xff]  ;;  %v5092_v29 = vld [vmem:[#allocation2 + $0x1f0] sm:$0xff]  ;;  %v5134_v35 = vld [vmem:[#allocation2 + $0x160] sm:$0xff] }
 0x50e   :  { %v5143_v43 = vld [vmem:[#allocation2 + $0x178] sm:$0xff] }
 0x50f   :  { %3776 = vtanh.f32 %v5083_v46  ;;  %v1691_v34 = vsel %vm1690_vm2, %v3773_v30, %v1687_v39  ;;  %v5095_v30 = vld [vmem:[#allocation2 + $0x1f8] sm:$0xff]  ;;  %v5137_v39 = vld [vmem:[#allocation2 + $0x168] sm:$0xff] }
 0x510   :  { %v1696_v27 = vsel %vm1693_vm3, %v1695_v50, %v1691_v34  ;;  %v5146_v34 = vld [vmem:[#allocation2 + $0x140] sm:$0xff]  ;;  %v5149_v50 = vld [vmem:[#allocation2 + $0x148] sm:$0xff] }
 0x515   :  { %v3777_v42 = vpop.eup %3776 }
 0x516   :  { %v1702_v18 = vmul.f32 %v3777_v42, %v1696_v27  ;;  %v5152_v42 = vld [vmem:[#allocation2 + $0x150] sm:$0xff]  ;;  %v5155_v27 = vld [vmem:[#allocation2 + $0x158] sm:$0xff] }
 0x518   :  { %1719 = vmatmul.f32.vlgmr.msrb.gmra.mxu0 %v1702_v18  ;;  %1739 = vmatmul.f32.vlgmr.msrb.gmra.mxu1 %v1702_v18 }
 0x519   :  { %1759 = vmatmul.f32.vlgmr.msra.gmra.mxu2 %v1702_v18  ;;  %1779 = vmatmul.f32.vlgmr.msra.gmra.mxu3 %v1702_v18 }
 0x51a   :  { %1997 = vmatpush.msrb.mxu0 %v5086_v44  ;;  %2017 = vmatpush.msrb.mxu1 %v5089_v28 }
 0x51b   :  { %2037 = vmatpush.msra.mxu2 %v5092_v29  ;;  %2057 = vmatpush.msra.mxu3 %v5095_v30 }
 0x51c   :  { %1998 = vmatpush.msrb.mxu0 %v5098_v41  ;;  %2018 = vmatpush.msrb.mxu1 %v5101_v32 }
 0x51d   :  { %2038 = vmatpush.msra.mxu2 %v5104_v36  ;;  %2058 = vmatpush.msra.mxu3 %v5107_v37 }
 0x51e   :  { %1999 = vmatpush.msrb.mxu0 %v5110_v48  ;;  %2019 = vmatpush.msrb.mxu1 %v5113_v31 }
 0x51f   :  { %2039 = vmatpush.msra.mxu2 %v5116_v22  ;;  %2059 = vmatpush.msra.mxu3 %v5119_v38 }
 0x520   :  { %2000 = vmatpush.msrb.mxu0 %v5122_v45  ;;  %2020 = vmatpush.msrb.mxu1 %v5125_v40 }
 0x521   :  { %2040 = vmatpush.msra.mxu2 %v5128_v15  ;;  %2060 = vmatpush.msra.mxu3 %v5131_v49 }
 0x522   :  { %2001 = vmatpush.msrb.mxu0 %v5134_v35  ;;  %2021 = vmatpush.msrb.mxu1 %v5137_v39 }
 0x523   :  { %2041 = vmatpush.msra.mxu2 %v5140_v20  ;;  %2061 = vmatpush.msra.mxu3 %v5143_v43 }
 0x524   :  { %2002 = vmatpush.msrb.mxu0 %v5146_v34  ;;  %2022 = vmatpush.msrb.mxu1 %v5149_v50 }
 0x525   :  { %2042 = vmatpush.msra.mxu2 %v5152_v42  ;;  %2062 = vmatpush.msra.mxu3 %v5155_v27 }
 0x526   :  { %2003 = vmatpush.msrb.mxu0 %v4668_v10  ;;  %2023 = vmatpush.msrb.mxu1 %v4670_v14  ;;  %v6515_v10 = vld [vmem:[#allocation30_spill] sm:$0xff]  ;;  %v6516_v14 = vld [vmem:[#allocation31_spill] sm:$0xff] }
 0x527   :  { %2043 = vmatpush.msra.mxu2 %v4674_v4  ;;  %2063 = vmatpush.msra.mxu3 %v6481_v47  ;;  %v6517_v4 = vld [vmem:[#allocation57_spill] sm:$0xff] }
 0x528   :  { %2004 = vmatpush.msrb.mxu0 %v4682_v16  ;;  %2024 = vmatpush.msrb.mxu1 %v4684_v19  ;;  %v6518_v16 = vld [vmem:[#allocation36_spill] sm:$0xff]  ;;  %v6521_v47 = vld [vmem:[#allocation61_spill] sm:$0xff] }
 0x529   :  { %2044 = vmatpush.msra.mxu2 %v4686_v3  ;;  %2064 = vmatpush.msra.mxu3 %v4690_v21  ;;  %v882_v19 = vadd.f32 %v6518_v16, %v6517_v4  ;;  %v6519_v3 = vld [vmem:[#allocation58_spill] sm:$0xff]  ;;  %v6520_v21 = vld [vmem:[#allocation37_spill] sm:$0xff] }
 0x52a   :  { %2005 = vmatpush.msrb.mxu0 %v6482_v51  ;;  %2025 = vmatpush.msrb.mxu1 %v4694_v23  ;;  %v902_v23 = vadd.f32 %v6520_v21, %v6519_v3  ;;  %v6522_v51 = vld [vmem:[#allocation38_spill] sm:$0xff] }
 0x52b   :  { %2045 = vmatpush.msra.mxu2 %v4698_v25  ;;  %2065 = vmatpush.msra.mxu3 %v4700_v2 }
 0x52c   :  { %2006 = vmatpush.msrb.mxu0 %v4704_v12  ;;  %2026 = vmatpush.msrb.mxu1 %v4706_v17 }
 0x52d   :  { %2046 = vmatpush.msra.mxu2 %v4710_v6  ;;  %2066 = vmatpush.msra.mxu3 %v4712_v26 }
 0x52e   :  { %2007 = vmatpush.msrb.mxu0 %v6483_v52  ;;  %2027 = vmatpush.msrb.mxu1 %v6484_v53  ;;  %v942_v52 = vadd.f32 %v6522_v51, %v6521_v47 }
 0x52f   :  { %2047 = vmatpush.msra.mxu2 %v6485_v54  ;;  %2067 = vmatpush.msra.mxu3 %v6486_v33 }
 0x530   :  { %2008 = vmatpush.msrb.mxu0 %v6487_v55  ;;  %2028 = vmatpush.msrb.mxu1 %v6488_v56 }
 0x531   :  { %2048 = vmatpush.msra.mxu2 %v6489_v57  ;;  %2068 = vmatpush.msra.mxu3 %v6490_v11 }
 0x532   :  { %2009 = vmatpush.msrb.mxu0 %v6491_v13  ;;  %2029 = vmatpush.msrb.mxu1 %v6492_v1 }
 0x533   :  { %2049 = vmatpush.msra.mxu2 %v6493_v58  ;;  %2069 = vmatpush.msra.mxu3 %v6494_v59  ;;  %v6523_v58 = vld [vmem:[#allocation63_spill] sm:$0xff]  ;;  %v6524_v59 = vld [vmem:[#allocation41_spill] sm:$0xff] }
 0x534   :  { %2010 = vmatpush.msrb.mxu0 %v6495_v60  ;;  %2030 = vmatpush.msrb.mxu1 %v6496_v61  ;;  %v922_v60 = vadd.f32 %v6524_v59, %v6523_v58 }
 0x535   :  { %2050 = vmatpush.msra.mxu2 %v6497_v62  ;;  %2070 = vmatpush.msra.mxu3 %v6498_v63 }
 0x536   :  { %2011 = vmatpush.msrb.mxu0 %v6499_v0  ;;  %2031 = vmatpush.msrb.mxu1 %v6500_v5 }
 0x537   :  { %2051 = vmatpush.msra.mxu2 %v6501_v7  ;;  %2071 = vmatpush.msra.mxu3 %v6502_v24 }
 0x538   :  { %2012 = vmatpush.msrb.mxu0 %v6503_v8  ;;  %2032 = vmatpush.msrb.mxu1 %v6504_v9 }
 0x539   :  { %2052 = vmatpush.msra.mxu2 %v6515_v10  ;;  %2072 = vmatpush.msra.mxu3 %v6516_v14 }
 0x595   :  { %v1720_v25 = vpop.f32.mrf.mxu0  ;;  %v1740_v2 = vpop.f32.mrf.mxu1 }
 0x596   :  { %v1783_v12 = vadd.f32 %v1720_v25, %v882_v19  ;;  %v1784_v17 = vadd.f32 %v1740_v2, %v902_v23 }
 0x598   :  { %v3669_v6 = vmul.f32 -1.442695, %v1783_v12  ;;  %v3670_v26 = vmul.f32 -1.442695, %v1784_v17 }
 0x59a   :  { %3778 = vpow2.f32 %v3669_v6 }
 0x59b   :  { %3780 = vpow2.f32 %v3670_v26 }
 0x59c   :  { %v1780_v53 = vpop.f32.mrf.mxu3  ;;  %v1760_v13 = vpop.f32.mrf.mxu2 }
 0x59d   :  { %v1786_v54 = vadd.f32 %v1780_v53, %v942_v52  ;;  %v1785_v63 = vadd.f32 %v1760_v13, %v922_v60 }
 0x59f   :  { %v3671_v33 = vmul.f32 -1.442695, %v1786_v54 }
 0x5a0   :  { %v3779_v55 = vpop.eup %3778 }
 0x5a1   :  { %v3781_v56 = vpop.eup %3780  ;;  %v1790_v57 = vadd.f32 1.0, %v3779_v55  ;;  %3782 = vpow2.f32 %v3671_v33 }
 0x5a2   :  { %v1809_v11 = vadd.f32 1.0, %v3781_v56 }
 0x5a3   :  { %3784 = vrcp.f32 %v1790_v57  ;;  %v1802_v9 = vand.u32 2147483648, %v1790_v57  ;;  %v1800_v14 = vand.u32 2147483647, %v1790_v57  ;;  %vm1796_vm6 = vweird.f32 %v1790_v57 }
 0x5a4   :  { %3786 = vrcp.f32 %v1809_v11  ;;  %v1821_v18 = vand.u32 2147483648, %v1809_v11  ;;  %v1819_v19 = vand.u32 2147483647, %v1809_v11  ;;  %vm1815_vm7 = vweird.f32 %v1809_v11 }
 0x5a5   :  { %v1803_v25 = vor.u32 1.1754944e-38, %v1802_v9  ;;  %vm1801_vm15 = vcmp.eq.f32.partialorder %v1800_v14, 8.507059e+37  ;;  %v5252_v9 = vld [vmem:[#allocation2 + $0x110] sm:$0xff]  ;;  %v5261_v14 = vld [vmem:[#allocation2 + $0xe8] sm:$0xff] }
 0x5a6   :  { %v1822_v17 = vor.u32 1.1754944e-38, %v1821_v18  ;;  %vm1820_vm1 = vcmp.eq.f32.partialorder %v1819_v19, 8.507059e+37  ;;  %v5255_v18 = vld [vmem:[#allocation2 + $0x118] sm:$0xff] }
 0x5a7   :  { %v3783_v1 = vpop.eup %3782  ;;  %v5267_v19 = vld [vmem:[#allocation2 + $0xf8] sm:$0xff] }
 0x5a8   :  { %v1829_v61 = vadd.f32 1.0, %v3783_v1 }
 0x5a9   :  { %v3785_v62 = vpop.eup %3784 }
 0x5aa   :  { %v3787_v0 = vpop.eup %3786  ;;  %v1792_v5 = vmul.f32 %v3785_v62, %v1790_v57  ;;  %3788 = vrcp.f32 %v1829_v61  ;;  %vm1797_vm4 = vweird.f32 %v3785_v62  ;;  %v1841_v13 = vand.u32 2147483648, %v1829_v61 }
 0x5ab   :  { %v1811_v7 = vmul.f32 %v3787_v0, %v1809_v11  ;;  %3790 = vtanh.f32 %v1785_v63  ;;  %vm1816_vm5 = vweird.f32 %v3787_v0  ;;  %vm1798_vm8 = vmor %vm1796_vm6, %vm1797_vm4  ;;  %vm1835_vm3 = vweird.f32 %v1829_v61 }
 0x5ac   :  { %v1793_v24 = vsub.f32 1.0, %v1792_v5  ;;  %vm1817_vm9 = vmor %vm1815_vm7, %vm1816_vm5  ;;  %v1839_v1 = vand.u32 2147483647, %v1829_v61  ;;  %v1842_v60 = vor.u32 1.1754944e-38, %v1841_v13  ;;  %v5240_v5 = vld [vmem:[#allocation2 + $0x130] sm:$0xff]  ;;  %v5318_v13 = vld [vmem:[#allocation2 + $0x40] sm:$0xff] }
 0x5ad   :  { %v1812_v8 = vsub.f32 1.0, %v1811_v7  ;;  %v5243_v7 = vld [vmem:[#allocation2 + $0x138] sm:$0xff]  ;;  %6539 = vst [vmem:[#allocation20_spill] sm:$0xff] %v5318_v13 }
 0x5ae   :  { %v1794_v10 = vmul.f32 %v3785_v62, %v1793_v24  ;;  %vm1840_vm5 = vcmp.eq.f32.partialorder %v1839_v1, 8.507059e+37  ;;  %v5246_v24 = vld [vmem:[#allocation2 + $0x100] sm:$0xff]  ;;  %v5321_v1 = vld [vmem:[#allocation2 + $0x48] sm:$0xff] }
 0x5af   :  { %v1813_v16 = vmul.f32 %v3787_v0, %v1812_v8  ;;  %v5249_v8 = vld [vmem:[#allocation2 + $0x108] sm:$0xff]  ;;  %6540 = vst [vmem:[#allocation21_spill] sm:$0xff] %v5321_v1 }
 0x5b0   :  { %v3789_v21 = vpop.eup %3788  ;;  %v1795_v23 = vadd.f32 %v3785_v62, %v1794_v10  ;;  %v5258_v10 = vld [vmem:[#allocation2 + $0xe0] sm:$0xff] }
 0x5b1   :  { %v1814_v2 = vadd.f32 %v3787_v0, %v1813_v16  ;;  %v1831_v12 = vmul.f32 %v3789_v21, %v1829_v61  ;;  %v3791_v26 = vpop.eup %3790  ;;  %vm1836_vm2 = vweird.f32 %v3789_v21  ;;  %v5237_v61 = vld [vmem:[#allocation2 + $0x128] sm:$0xff]  ;;  %v5264_v16 = vld [vmem:[#allocation2 + $0xf0] sm:$0xff] }
 0x5b2   :  { %v1799_v6 = vsel %vm1798_vm8, %v3785_v62, %v1795_v23  ;;  %vm1837_vm4 = vmor %vm1835_vm3, %vm1836_vm2  ;;  %v5273_v23 = vld [vmem:[#allocation2 + $0xc8] sm:$0xff] }
 0x5b3   :  { %v1804_v51 = vsel %vm1801_vm15, %v1803_v25, %v1799_v6  ;;  %v1818_v52 = vsel %vm1817_vm9, %v3787_v0, %v1814_v2  ;;  %v1832_v53 = vsub.f32 1.0, %v1831_v12  ;;  %v5276_v25 = vld [vmem:[#allocation2 + $0xd0] sm:$0xff]  ;;  %v5279_v2 = vld [vmem:[#allocation2 + $0xd8] sm:$0xff]  ;;  %v5282_v12 = vld [vmem:[#allocation2 + $0xa0] sm:$0xff] }
 0x5b4   :  { %v1823_v54 = vsel %vm1820_vm1, %v1822_v17, %v1818_v52  ;;  %v1846_v33 = vmul.f32 %v3791_v26, %v1804_v51  ;;  %6525 = vst [vmem:[#allocation6_spill] sm:$0xff] %v5276_v25  ;;  %v5285_v17 = vld [vmem:[#allocation2 + $0xa8] sm:$0xff]  ;;  %v5288_v6 = vld [vmem:[#allocation2 + $0xb0] sm:$0xff]  ;;  %v5291_v26 = vld [vmem:[#allocation2 + $0xb8] sm:$0xff] }
 0x5b5   :  { %v1845_v55 = vmul.f32 %v1823_v54, %v5083_v46  ;;  %v1833_v56 = vmul.f32 %v3789_v21, %v1832_v53  ;;  %v5234_v46 = vld [vmem:[#allocation2 + $0x120] sm:$0xff]  ;;  %6526 = vst [vmem:[#allocation7_spill] sm:$0xff] %v5279_v2  ;;  %v5297_v52 = vld [vmem:[#allocation2 + $0x88] sm:$0xff]  ;;  %v5300_v53 = vld [vmem:[#allocation2 + $0x90] sm:$0xff] }
 0x5b6   :  { %6527 = vst [vmem:[#allocation8_spill] sm:$0xff] %v5282_v12  ;;  %v5294_v51 = vld [vmem:[#allocation2 + $0x80] sm:$0xff]  ;;  %v5303_v54 = vld [vmem:[#allocation2 + $0x98] sm:$0xff] }
 0x5b7   :  { %v5207_v57 = vadd.f32 %v1846_v33, %v1845_v55  ;;  %v1834_v11 = vadd.f32 %v3789_v21, %v1833_v56  ;;  %6528 = vst [vmem:[#allocation9_spill] sm:$0xff] %v5285_v17  ;;  %v5306_v33 = vld [vmem:[#allocation2 + $0x60] sm:$0xff]  ;;  %v5309_v55 = vld [vmem:[#allocation2 + $0x68] sm:$0xff]  ;;  %v5312_v56 = vld [vmem:[#allocation2 + $0x70] sm:$0xff] }
 0x5b8   :  { %6529 = vst [vmem:[#allocation10_spill] sm:$0xff] %v5288_v6 }
 0x5b9   :  { %3792 = vtanh.f32 %v5207_v57  ;;  %v1838_v59 = vsel %vm1837_vm4, %v3789_v21, %v1834_v11  ;;  %v5270_v21 = vld [vmem:[#allocation2 + $0xc0] sm:$0xff]  ;;  %6530 = vst [vmem:[#allocation11_spill] sm:$0xff] %v5291_v26  ;;  %v5315_v11 = vld [vmem:[#allocation2 + $0x78] sm:$0xff] }
 0x5ba   :  { %v1843_v63 = vsel %vm1840_vm5, %v1842_v60, %v1838_v59  ;;  %6531 = vst [vmem:[#allocation12_spill] sm:$0xff] %v5294_v51  ;;  %v5324_v59 = vld [vmem:[#allocation2 + $0x50] sm:$0xff]  ;;  %v5327_v60 = vld [vmem:[#allocation2 + $0x58] sm:$0xff] }
 0x5bb   :  { %6532 = vst [vmem:[#allocation13_spill] sm:$0xff] %v5297_v52 }
 0x5bc   :  { %6533 = vst [vmem:[#allocation14_spill] sm:$0xff] %v5300_v53 }
 0x5bd   :  { %6534 = vst [vmem:[#allocation15_spill] sm:$0xff] %v5303_v54 }
 0x5be   :  { %6535 = vst [vmem:[#allocation16_spill] sm:$0xff] %v5306_v33 }
 0x5bf   :  { %v3793_v62 = vpop.eup %3792  ;;  %6536 = vst [vmem:[#allocation17_spill] sm:$0xff] %v5309_v55 }
 0x5c0   :  { %v1849_v0 = vmul.f32 %v3793_v62, %v1843_v63  ;;  %6537 = vst [vmem:[#allocation18_spill] sm:$0xff] %v5312_v56  ;;  %v5330_v62 = vld [vmem:[#allocation2 + $0x20] sm:$0xff]  ;;  %v5333_v63 = vld [vmem:[#allocation2 + $0x28] sm:$0xff] }
 0x5c1   :  { %6538 = vst [vmem:[#allocation19_spill] sm:$0xff] %v5315_v11 }
 0x5c2   :  { %1866 = vmatmul.f32.vlgmr.msra.gmra.mxu0 %v1849_v0  ;;  %1886 = vmatmul.f32.vlgmr.msra.gmra.mxu1 %v1849_v0  ;;  %6541 = vst [vmem:[#allocation22_spill] sm:$0xff] %v5324_v59 }
 0x5c3   :  { %1906 = vmatmul.f32.vlgmr.msrb.gmra.mxu2 %v1849_v0  ;;  %1926 = vmatmul.f32.vlgmr.msrb.gmra.mxu3 %v1849_v0  ;;  %6542 = vst [vmem:[#allocation23_spill] sm:$0xff] %v5327_v60  ;;  %v5336_v0 = vld [vmem:[#allocation2 + $0x30] sm:$0xff] }
 0x5c4   :  { %2144 = vmatpush.msra.mxu0 %v5086_v44  ;;  %2164 = vmatpush.msra.mxu1 %v5089_v28  ;;  %6543 = vst [vmem:[#allocation24_spill] sm:$0xff] %v5330_v62 }
 0x5c5   :  { %2184 = vmatpush.msrb.mxu2 %v5092_v29  ;;  %2204 = vmatpush.msrb.mxu3 %v5095_v30  ;;  %6544 = vst [vmem:[#allocation25_spill] sm:$0xff] %v5333_v63 }
 0x5c6   :  { %2145 = vmatpush.msra.mxu0 %v5098_v41  ;;  %2165 = vmatpush.msra.mxu1 %v5101_v32  ;;  %6545 = vst [vmem:[#allocation26_spill] sm:$0xff] %v5336_v0 }
 0x5c7   :  { %2185 = vmatpush.msrb.mxu2 %v5104_v36  ;;  %2205 = vmatpush.msrb.mxu3 %v5107_v37 }
 0x5c8   :  { %2146 = vmatpush.msra.mxu0 %v5110_v48  ;;  %2166 = vmatpush.msra.mxu1 %v5113_v31 }
 0x5c9   :  { %2186 = vmatpush.msrb.mxu2 %v5116_v22  ;;  %2206 = vmatpush.msrb.mxu3 %v5119_v38 }
 0x5ca   :  { %2147 = vmatpush.msra.mxu0 %v5122_v45  ;;  %2167 = vmatpush.msra.mxu1 %v5125_v40 }
 0x5cb   :  { %2187 = vmatpush.msrb.mxu2 %v5128_v15  ;;  %2207 = vmatpush.msrb.mxu3 %v5131_v49 }
 0x5cc   :  { %2148 = vmatpush.msra.mxu0 %v5134_v35  ;;  %2168 = vmatpush.msra.mxu1 %v5137_v39 }
 0x5cd   :  { %2188 = vmatpush.msrb.mxu2 %v5140_v20  ;;  %2208 = vmatpush.msrb.mxu3 %v5143_v43 }
 0x5ce   :  { %2149 = vmatpush.msra.mxu0 %v5146_v34  ;;  %2169 = vmatpush.msra.mxu1 %v5149_v50 }
 0x5cf   :  { %2189 = vmatpush.msrb.mxu2 %v5152_v42  ;;  %2209 = vmatpush.msrb.mxu3 %v5155_v27 }
 0x5d0   :  { %2150 = vmatpush.msra.mxu0 %v5234_v46  ;;  %2170 = vmatpush.msra.mxu1 %v5237_v61 }
 0x5d1   :  { %2190 = vmatpush.msrb.mxu2 %v5240_v5  ;;  %2210 = vmatpush.msrb.mxu3 %v5243_v7 }
 0x5d2   :  { %2151 = vmatpush.msra.mxu0 %v5246_v24  ;;  %2171 = vmatpush.msra.mxu1 %v5249_v8 }
 0x5d3   :  { %2191 = vmatpush.msrb.mxu2 %v5252_v9  ;;  %2211 = vmatpush.msrb.mxu3 %v5255_v18 }
 0x5d4   :  { %2152 = vmatpush.msra.mxu0 %v5258_v10  ;;  %2172 = vmatpush.msra.mxu1 %v5261_v14 }
 0x5d5   :  { %2192 = vmatpush.msrb.mxu2 %v5264_v16  ;;  %2212 = vmatpush.msrb.mxu3 %v5267_v19 }
 0x5d6   :  { %2153 = vmatpush.msra.mxu0 %v5270_v21  ;;  %2173 = vmatpush.msra.mxu1 %v5273_v23 }
 0x5d7   :  { %2193 = vmatpush.msrb.mxu2 %v5276_v25  ;;  %2213 = vmatpush.msrb.mxu3 %v5279_v2 }
 0x5d8   :  { %2154 = vmatpush.msra.mxu0 %v5282_v12  ;;  %2174 = vmatpush.msra.mxu1 %v5285_v17 }
 0x5d9   :  { %2194 = vmatpush.msrb.mxu2 %v5288_v6  ;;  %2214 = vmatpush.msrb.mxu3 %v5291_v26 }
 0x5da   :  { %2155 = vmatpush.msra.mxu0 %v5294_v51  ;;  %2175 = vmatpush.msra.mxu1 %v5297_v52 }
 0x5db   :  { %2195 = vmatpush.msrb.mxu2 %v5300_v53  ;;  %2215 = vmatpush.msrb.mxu3 %v5303_v54  ;;  %v6553_v53 = vld [vmem:[#allocation42_spill] sm:$0xff] }
 0x5dc   :  { %2156 = vmatpush.msra.mxu0 %v5306_v33  ;;  %2176 = vmatpush.msra.mxu1 %v5309_v55 }
 0x5dd   :  { %2196 = vmatpush.msrb.mxu2 %v5312_v56  ;;  %2216 = vmatpush.msrb.mxu3 %v5315_v11 }
 0x5de   :  { %2157 = vmatpush.msra.mxu0 %v5318_v13  ;;  %2177 = vmatpush.msra.mxu1 %v5321_v1  ;;  %v5339_v1 = vld [vmem:[#allocation2 + $0x38] sm:$0xff] }
 0x5df   :  { %2197 = vmatpush.msrb.mxu2 %v5324_v59  ;;  %2217 = vmatpush.msrb.mxu3 %v5327_v60  ;;  %6546 = vst [vmem:[#allocation27_spill] sm:$0xff] %v5339_v1  ;;  %v5342_v59 = vld [vmem:[#allocation2] sm:$0xff]  ;;  %v5345_v60 = vld [vmem:[#allocation2 + $0x8] sm:$0xff] }
 0x5e0   :  { %2158 = vmatpush.msra.mxu0 %v5330_v62  ;;  %2178 = vmatpush.msra.mxu1 %v5333_v63  ;;  %6547 = vst [vmem:[#allocation28_spill] sm:$0xff] %v5342_v59  ;;  %v5348_v62 = vld [vmem:[#allocation2 + $0x10] sm:$0xff]  ;;  %v5351_v63 = vld [vmem:[#allocation2 + $0x18] sm:$0xff] }
 0x5e1   :  { %2198 = vmatpush.msrb.mxu2 %v5336_v0  ;;  %2218 = vmatpush.msrb.mxu3 %v5339_v1  ;;  %6548 = vst [vmem:[#allocation29_spill] sm:$0xff] %v5345_v60  ;;  %v6551_v0 = vld [vmem:[#allocation39_spill] sm:$0xff]  ;;  %v6552_v1 = vld [vmem:[#allocation40_spill] sm:$0xff] }
 0x5e2   :  { %2159 = vmatpush.msra.mxu0 %v5342_v59  ;;  %2179 = vmatpush.msra.mxu1 %v5345_v60  ;;  %6549 = vst [vmem:[#allocation32_spill] sm:$0xff] %v5348_v62  ;;  %v975_v13 = vadd.f32 %v6551_v0, %v6517_v4  ;;  %v995_v11 = vadd.f32 %v6552_v1, %v6519_v3 }
 0x5e3   :  { %2199 = vmatpush.msrb.mxu2 %v5348_v62  ;;  %6550 = vst [vmem:[#allocation33_spill] sm:$0xff] %v5351_v63  ;;  %2219 = vmatpush.msrb.mxu3 %v5351_v63  ;;  %v1035_v62 = vadd.f32 %v6553_v53, %v6521_v47 }
 0x63f   :  { %v1867_v56 = vpop.f32.mrf.mxu0  ;;  %v1887_v59 = vpop.f32.mrf.mxu1 }
 0x640   :  { %v1930_v55 = vadd.f32 %v1867_v56, %v975_v13  ;;  %v1931_v33 = vadd.f32 %v1887_v59, %v995_v11 }
 0x642   :  { %v3672_v54 = vmul.f32 -1.442695, %v1930_v55  ;;  %v3673_v60 = vmul.f32 -1.442695, %v1931_v33  ;;  %v6554_v55 = vld [vmem:[#allocation45_spill] sm:$0xff] }
 0x643   :  { %v1015_v33 = vadd.f32 %v6554_v55, %v6523_v58 }
 0x644   :  { %3794 = vpow2.f32 %v3672_v54 }
 0x645   :  { %3796 = vpow2.f32 %v3673_v60 }
 0x646   :  { %v1927_v52 = vpop.f32.mrf.mxu3  ;;  %v1907_v1 = vpop.f32.mrf.mxu2 }
 0x647   :  { %v1933_v51 = vadd.f32 %v1927_v52, %v1035_v62  ;;  %v1932_v13 = vadd.f32 %v1907_v1, %v1015_v33 }
 0x649   :  { %v3674_v63 = vmul.f32 -1.442695, %v1933_v51 }
 0x64a   :  { %v3795_v26 = vpop.eup %3794 }
 0x64b   :  { %v3797_v6 = vpop.eup %3796  ;;  %v1937_v0 = vadd.f32 1.0, %v3795_v26  ;;  %3798 = vpow2.f32 %v3674_v63 }
 0x64c   :  { %v1956_v4 = vadd.f32 1.0, %v3797_v6 }
 0x64d   :  { %3800 = vrcp.f32 %v1937_v0  ;;  %v1949_v62 = vand.u32 2147483648, %v1937_v0  ;;  %v1947_v63 = vand.u32 2147483647, %v1937_v0  ;;  %vm1943_vm8 = vweird.f32 %v1937_v0 }
 0x64e   :  { %3802 = vrcp.f32 %v1956_v4  ;;  %v1968_v26 = vand.u32 2147483648, %v1956_v4  ;;  %v1966_v3 = vand.u32 2147483647, %v1956_v4  ;;  %vm1962_vm9 = vweird.f32 %v1956_v4 }
 0x64f   :  { %v1950_v1 = vor.u32 1.1754944e-38, %v1949_v62  ;;  %vm1948_vm2 = vcmp.eq.f32.partialorder %v1947_v63, 8.507059e+37 }
 0x650   :  { %vm1967_vm3 = vcmp.eq.f32.partialorder %v1966_v3, 8.507059e+37 }
 0x651   :  { %v3799_v56 = vpop.eup %3798 }
 0x652   :  { %v1976_v54 = vadd.f32 1.0, %v3799_v56 }
 0x653   :  { %v3801_v11 = vpop.eup %3800 }
 0x654   :  { %v3803_v53 = vpop.eup %3802  ;;  %v1939_v59 = vmul.f32 %v3801_v11, %v1937_v0  ;;  %3804 = vrcp.f32 %v1976_v54  ;;  %vm1944_vm6 = vweird.f32 %v3801_v11  ;;  %vm1982_vm5 = vweird.f32 %v1976_v54 }
 0x655   :  { %v1958_v52 = vmul.f32 %v3803_v53, %v1956_v4  ;;  %3806 = vtanh.f32 %v1932_v13  ;;  %vm1963_vm7 = vweird.f32 %v3803_v53  ;;  %vm1945_vm15 = vmor %vm1943_vm8, %vm1944_vm6 }
 0x656   :  { %v1940_v51 = vsub.f32 1.0, %v1939_v59  ;;  %vm1964_vm1 = vmor %vm1962_vm9, %vm1963_vm7  ;;  %v1969_v59 = vor.u32 1.1754944e-38, %v1968_v26 }
 0x657   :  { %v1959_v60 = vsub.f32 1.0, %v1958_v52 }
 0x658   :  { %v1941_v6 = vmul.f32 %v3801_v11, %v1940_v51 }
 0x659   :  { %v1960_v47 = vmul.f32 %v3803_v53, %v1959_v60 }
 0x65a   :  { %v3805_v17 = vpop.eup %3804  ;;  %v1942_v55 = vadd.f32 %v3801_v11, %v1941_v6 }
 0x65b   :  { %v1961_v56 = vadd.f32 %v3803_v53, %v1960_v47  ;;  %v1978_v33 = vmul.f32 %v3805_v17, %v1976_v54  ;;  %v3807_v13 = vpop.eup %3806  ;;  %vm1983_vm4 = vweird.f32 %v3805_v17  ;;  %v1988_v47 = vand.u32 2147483648, %v1976_v54 }
 0x65c   :  { %v1946_v52 = vsel %vm1945_vm15, %v3801_v11, %v1942_v55  ;;  %v1986_v11 = vand.u32 2147483647, %v1976_v54  ;;  %vm1984_vm6 = vmor %vm1982_vm5, %vm1983_vm4  ;;  %v6561_v54 = vld [vmem:[#allocation12_spill] sm:$0xff]  ;;  %v6562_v55 = vld [vmem:[#allocation13_spill] sm:$0xff] }
 0x65d   :  { %v1951_v58 = vsel %vm1948_vm2, %v1950_v1, %v1946_v52  ;;  %v1965_v51 = vsel %vm1964_vm1, %v3803_v53, %v1961_v56  ;;  %v1979_v12 = vsub.f32 1.0, %v1978_v33  ;;  %v1989_v26 = vor.u32 1.1754944e-38, %v1988_v47  ;;  %v6563_v1 = vld [vmem:[#allocation14_spill] sm:$0xff]  ;;  %v6564_v56 = vld [vmem:[#allocation15_spill] sm:$0xff]  ;;  %v6565_v33 = vld [vmem:[#allocation16_spill] sm:$0xff] }
 0x65e   :  { %v1970_v60 = vsel %vm1967_vm3, %v1969_v59, %v1965_v51  ;;  %v1993_v2 = vmul.f32 %v3807_v13, %v1951_v58  ;;  %vm1987_vm7 = vcmp.eq.f32.partialorder %v1986_v11, 8.507059e+37  ;;  %v6555_v58 = vld [vmem:[#allocation6_spill] sm:$0xff]  ;;  %v6566_v59 = vld [vmem:[#allocation17_spill] sm:$0xff]  ;;  %v6568_v13 = vld [vmem:[#allocation19_spill] sm:$0xff] }
 0x65f   :  { %v1992_v25 = vmul.f32 %v1970_v60, %v5207_v57  ;;  %v1980_v6 = vmul.f32 %v3805_v17, %v1979_v12  ;;  %v6556_v57 = vld [vmem:[#allocation7_spill] sm:$0xff]  ;;  %v6559_v12 = vld [vmem:[#allocation10_spill] sm:$0xff]  ;;  %v6569_v51 = vld [vmem:[#allocation20_spill] sm:$0xff] }
 0x660   :  { %v6567_v52 = vld [vmem:[#allocation18_spill] sm:$0xff]  ;;  %v6570_v60 = vld [vmem:[#allocation21_spill] sm:$0xff]  ;;  %v6573_v47 = vld [vmem:[#allocation24_spill] sm:$0xff] }
 0x661   :  { %v5363_v0 = vadd.f32 %v1993_v2, %v1992_v25  ;;  %v1981_v4 = vadd.f32 %v3805_v17, %v1980_v6  ;;  %v6557_v25 = vld [vmem:[#allocation8_spill] sm:$0xff]  ;;  %v6558_v2 = vld [vmem:[#allocation9_spill] sm:$0xff]  ;;  %v6571_v6 = vld [vmem:[#allocation22_spill] sm:$0xff] }
 0x662   :  { %v6574_v11 = vld [vmem:[#allocation25_spill] sm:$0xff] }
 0x663   :  { %3808 = vtanh.f32 %v5363_v0  ;;  %v1985_v62 = vsel %vm1984_vm6, %v3805_v17, %v1981_v4  ;;  %v6560_v17 = vld [vmem:[#allocation11_spill] sm:$0xff] }
 0x664   :  { %v1990_v53 = vsel %vm1987_vm7, %v1989_v26, %v1985_v62  ;;  %v6572_v4 = vld [vmem:[#allocation23_spill] sm:$0xff]  ;;  %v6575_v62 = vld [vmem:[#allocation26_spill] sm:$0xff] }
 0x665   :  { %v6576_v26 = vld [vmem:[#allocation27_spill] sm:$0xff] }
 0x669   :  { %v3809_v3 = vpop.eup %3808 }
 0x66a   :  { %v1996_v63 = vmul.f32 %v3809_v3, %v1990_v53  ;;  %v6577_v3 = vld [vmem:[#allocation28_spill] sm:$0xff]  ;;  %v6578_v53 = vld [vmem:[#allocation29_spill] sm:$0xff] }
 0x66c   :  { %2013 = vmatmul.f32.vlgmr.msrb.gmra.mxu0 %v1996_v63  ;;  %2033 = vmatmul.f32.vlgmr.msrb.gmra.mxu1 %v1996_v63 }
 0x66d   :  { %2053 = vmatmul.f32.vlgmr.msra.gmra.mxu2 %v1996_v63  ;;  %2073 = vmatmul.f32.vlgmr.msra.gmra.mxu3 %v1996_v63  ;;  %v6579_v63 = vld [vmem:[#allocation32_spill] sm:$0xff] }
 0x66e   :  { %2291 = vmatpush.msrb.mxu0 %v5086_v44  ;;  %2311 = vmatpush.msrb.mxu1 %v5089_v28 }
 0x66f   :  { %2331 = vmatpush.msra.mxu2 %v5092_v29  ;;  %2351 = vmatpush.msra.mxu3 %v5095_v30 }
 0x670   :  { %2292 = vmatpush.msrb.mxu0 %v5098_v41  ;;  %2312 = vmatpush.msrb.mxu1 %v5101_v32 }
 0x671   :  { %2332 = vmatpush.msra.mxu2 %v5104_v36  ;;  %2352 = vmatpush.msra.mxu3 %v5107_v37 }
 0x672   :  { %2293 = vmatpush.msrb.mxu0 %v5110_v48  ;;  %2313 = vmatpush.msrb.mxu1 %v5113_v31 }
 0x673   :  { %2333 = vmatpush.msra.mxu2 %v5116_v22  ;;  %2353 = vmatpush.msra.mxu3 %v5119_v38 }
 0x674   :  { %2294 = vmatpush.msrb.mxu0 %v5122_v45  ;;  %2314 = vmatpush.msrb.mxu1 %v5125_v40 }
 0x675   :  { %2334 = vmatpush.msra.mxu2 %v5128_v15  ;;  %2354 = vmatpush.msra.mxu3 %v5131_v49 }
 0x676   :  { %2295 = vmatpush.msrb.mxu0 %v5134_v35  ;;  %2315 = vmatpush.msrb.mxu1 %v5137_v39 }
 0x677   :  { %2335 = vmatpush.msra.mxu2 %v5140_v20  ;;  %2355 = vmatpush.msra.mxu3 %v5143_v43 }
 0x678   :  { %2296 = vmatpush.msrb.mxu0 %v5146_v34  ;;  %2316 = vmatpush.msrb.mxu1 %v5149_v50 }
 0x679   :  { %2336 = vmatpush.msra.mxu2 %v5152_v42  ;;  %2356 = vmatpush.msra.mxu3 %v5155_v27 }
 0x67a   :  { %2297 = vmatpush.msrb.mxu0 %v5234_v46  ;;  %2317 = vmatpush.msrb.mxu1 %v5237_v61 }
 0x67b   :  { %2337 = vmatpush.msra.mxu2 %v5240_v5  ;;  %2357 = vmatpush.msra.mxu3 %v5243_v7 }
 0x67c   :  { %2298 = vmatpush.msrb.mxu0 %v5246_v24  ;;  %2318 = vmatpush.msrb.mxu1 %v5249_v8 }
 0x67d   :  { %2338 = vmatpush.msra.mxu2 %v5252_v9  ;;  %2358 = vmatpush.msra.mxu3 %v5255_v18 }
 0x67e   :  { %2299 = vmatpush.msrb.mxu0 %v5258_v10  ;;  %2319 = vmatpush.msrb.mxu1 %v5261_v14 }
 0x67f   :  { %2339 = vmatpush.msra.mxu2 %v5264_v16  ;;  %2359 = vmatpush.msra.mxu3 %v5267_v19 }
 0x680   :  { %2300 = vmatpush.msrb.mxu0 %v5270_v21  ;;  %2320 = vmatpush.msrb.mxu1 %v5273_v23 }
 0x681   :  { %2340 = vmatpush.msra.mxu2 %v6555_v58  ;;  %2360 = vmatpush.msra.mxu3 %v6556_v57 }
 0x682   :  { %2301 = vmatpush.msrb.mxu0 %v6557_v25  ;;  %2321 = vmatpush.msrb.mxu1 %v6558_v2 }
 0x683   :  { %2341 = vmatpush.msra.mxu2 %v6559_v12  ;;  %2361 = vmatpush.msra.mxu3 %v6560_v17 }
 0x684   :  { %2302 = vmatpush.msrb.mxu0 %v6561_v54  ;;  %2322 = vmatpush.msrb.mxu1 %v6562_v55 }
 0x685   :  { %2342 = vmatpush.msra.mxu2 %v6563_v1  ;;  %2362 = vmatpush.msra.mxu3 %v6564_v56  ;;  %v6586_v1 = vld [vmem:[#allocation46_spill] sm:$0xff] }
 0x686   :  { %2303 = vmatpush.msrb.mxu0 %v6565_v33  ;;  %2323 = vmatpush.msrb.mxu1 %v6566_v59 }
 0x687   :  { %2343 = vmatpush.msra.mxu2 %v6567_v52  ;;  %2363 = vmatpush.msra.mxu3 %v6568_v13  ;;  %v6584_v52 = vld [vmem:[#allocation44_spill] sm:$0xff] }
 0x688   :  { %2304 = vmatpush.msrb.mxu0 %v6569_v51  ;;  %2324 = vmatpush.msrb.mxu1 %v6570_v60  ;;  %v6580_v51 = vld [vmem:[#allocation33_spill] sm:$0xff] }
 0x689   :  { %2344 = vmatpush.msra.mxu2 %v6571_v6  ;;  %2364 = vmatpush.msra.mxu3 %v6572_v4  ;;  %v6581_v60 = vld [vmem:[#allocation57_spill] sm:$0xff]  ;;  %v6582_v6 = vld [vmem:[#allocation43_spill] sm:$0xff]  ;;  %v6583_v4 = vld [vmem:[#allocation58_spill] sm:$0xff] }
 0x68a   :  { %2305 = vmatpush.msrb.mxu0 %v6573_v47  ;;  %2325 = vmatpush.msrb.mxu1 %v6574_v11  ;;  %v1068_v13 = vadd.f32 %v6582_v6, %v6581_v60  ;;  %v1088_v47 = vadd.f32 %v6584_v52, %v6583_v4 }
 0x68b   :  { %2345 = vmatpush.msra.mxu2 %v6575_v62  ;;  %2365 = vmatpush.msra.mxu3 %v6576_v26 }
 0x68c   :  { %2306 = vmatpush.msrb.mxu0 %v6577_v3  ;;  %2326 = vmatpush.msrb.mxu1 %v6578_v53  ;;  %v6585_v3 = vld [vmem:[#allocation61_spill] sm:$0xff] }
 0x68d   :  { %2346 = vmatpush.msra.mxu2 %v6579_v63  ;;  %2366 = vmatpush.msra.mxu3 %v6580_v51  ;;  %v1128_v53 = vadd.f32 %v6586_v1, %v6585_v3 }
 0x6e9   :  { %v2014_v59 = vpop.f32.mrf.mxu0  ;;  %v2034_v11 = vpop.f32.mrf.mxu1 }
 0x6ea   :  { %v2077_v33 = vadd.f32 %v2014_v59, %v1068_v13  ;;  %v2078_v62 = vadd.f32 %v2034_v11, %v1088_v47  ;;  %v6587_v13 = vld [vmem:[#allocation63_spill] sm:$0xff] }
 0x6ec   :  { %v3675_v56 = vmul.f32 -1.442695, %v2077_v33  ;;  %v3676_v26 = vmul.f32 -1.442695, %v2078_v62  ;;  %v6588_v33 = vld [vmem:[#allocation49_spill] sm:$0xff] }
 0x6ed   :  { %v1108_v47 = vadd.f32 %v6588_v33, %v6587_v13 }
 0x6ee   :  { %3810 = vpow2.f32 %v3675_v56 }
 0x6ef   :  { %3812 = vpow2.f32 %v3676_v26 }
 0x6f0   :  { %v2074_v63 = vpop.f32.mrf.mxu3  ;;  %v2054_v52 = vpop.f32.mrf.mxu2 }
 0x6f1   :  { %v2080_v55 = vadd.f32 %v2074_v63, %v1128_v53  ;;  %v2079_v62 = vadd.f32 %v2054_v52, %v1108_v47 }
 0x6f3   :  { %v3677_v51 = vmul.f32 -1.442695, %v2080_v55 }
 0x6f4   :  { %v3811_v54 = vpop.eup %3810 }
 0x6f5   :  { %v3813_v17 = vpop.eup %3812  ;;  %v2084_v6 = vadd.f32 1.0, %v3811_v54  ;;  %3814 = vpow2.f32 %v3677_v51 }
 0x6f6   :  { %v2103_v60 = vadd.f32 1.0, %v3813_v17 }
 0x6f7   :  { %3816 = vrcp.f32 %v2084_v6  ;;  %v2096_v3 = vand.u32 2147483648, %v2084_v6  ;;  %v2094_v51 = vand.u32 2147483647, %v2084_v6  ;;  %vm2090_vm15 = vweird.f32 %v2084_v6 }
 0x6f8   :  { %3818 = vrcp.f32 %v2103_v60  ;;  %v2115_v54 = vand.u32 2147483648, %v2103_v60  ;;  %v2113_v12 = vand.u32 2147483647, %v2103_v60  ;;  %vm2109_vm1 = vweird.f32 %v2103_v60 }
 0x6f9   :  { %v2097_v52 = vor.u32 1.1754944e-38, %v2096_v3  ;;  %vm2095_vm4 = vcmp.eq.f32.partialorder %v2094_v51, 8.507059e+37 }
 0x6fa   :  { %vm2114_vm5 = vcmp.eq.f32.partialorder %v2113_v12, 8.507059e+37 }
 0x6fb   :  { %v3815_v59 = vpop.eup %3814 }
 0x6fc   :  { %v2123_v56 = vadd.f32 1.0, %v3815_v59 }
 0x6fd   :  { %v3817_v11 = vpop.eup %3816 }
 0x6fe   :  { %v3819_v1 = vpop.eup %3818  ;;  %v2086_v26 = vmul.f32 %v3817_v11, %v2084_v6  ;;  %3820 = vrcp.f32 %v2123_v56  ;;  %vm2091_vm8 = vweird.f32 %v3817_v11  ;;  %vm2129_vm7 = vweird.f32 %v2123_v56 }
 0x6ff   :  { %v2105_v53 = vmul.f32 %v3819_v1, %v2103_v60  ;;  %3822 = vtanh.f32 %v2079_v62  ;;  %vm2110_vm9 = vweird.f32 %v3819_v1  ;;  %vm2092_vm2 = vmor %vm2090_vm15, %vm2091_vm8  ;;  %v2133_v3 = vand.u32 2147483647, %v2123_v56 }
 0x700   :  { %v2087_v55 = vsub.f32 1.0, %v2086_v26  ;;  %vm2111_vm3 = vmor %vm2109_vm1, %vm2110_vm9  ;;  %v2116_v26 = vor.u32 1.1754944e-38, %v2115_v54 }
 0x701   :  { %v2106_v63 = vsub.f32 1.0, %v2105_v53  ;;  %vm2134_vm9 = vcmp.eq.f32.partialorder %v2133_v3, 8.507059e+37 }
 0x702   :  { %v2088_v17 = vmul.f32 %v3817_v11, %v2087_v55 }
 0x703   :  { %v2107_v4 = vmul.f32 %v3819_v1, %v2106_v63 }
 0x704   :  { %v3821_v2 = vpop.eup %3820  ;;  %v2089_v33 = vadd.f32 %v3817_v11, %v2088_v17 }
 0x705   :  { %v2108_v59 = vadd.f32 %v3819_v1, %v2107_v4  ;;  %v2125_v47 = vmul.f32 %v3821_v2, %v2123_v56  ;;  %v3823_v62 = vpop.eup %3822  ;;  %vm2130_vm6 = vweird.f32 %v3821_v2  ;;  %v2135_v4 = vand.u32 2147483648, %v2123_v56 }
 0x706   :  { %v2093_v53 = vsel %vm2092_vm2, %v3817_v11, %v2089_v33  ;;  %vm2131_vm8 = vmor %vm2129_vm7, %vm2130_vm6 }
 0x707   :  { %v2098_v13 = vsel %vm2095_vm4, %v2097_v52, %v2093_v53  ;;  %v2112_v55 = vsel %vm2111_vm3, %v3819_v1, %v2108_v59  ;;  %v2126_v25 = vsub.f32 1.0, %v2125_v47  ;;  %v2136_v54 = vor.u32 1.1754944e-38, %v2135_v4  ;;  %v6621_v53 = vld [vmem:[#allocation63_spill] sm:$0xff] }
 0x708   :  { %v2117_v63 = vsel %vm2114_vm5, %v2116_v26, %v2112_v55  ;;  %v2140_v57 = vmul.f32 %v3823_v62, %v2098_v13  ;;  %v6622_v62 = vld [vmem:[#allocation53_spill] sm:$0xff] }
 0x709   :  { %v2139_v58 = vmul.f32 %v2117_v63, %v5363_v0  ;;  %v2127_v17 = vmul.f32 %v3821_v2, %v2126_v25  ;;  %v6619_v0 = vld [vmem:[#allocation61_spill] sm:$0xff]  ;;  %v1201_v55 = vadd.f32 %v6622_v62, %v6621_v53 }
 0x70b   :  { %v5439_v6 = vadd.f32 %v2140_v57, %v2139_v58  ;;  %v2128_v60 = vadd.f32 %v3821_v2, %v2127_v17  ;;  %v6620_v58 = vld [vmem:[#allocation50_spill] sm:$0xff] }
 0x70c   :  { %v1221_v57 = vadd.f32 %v6620_v58, %v6619_v0 }
 0x70d   :  { %3824 = vtanh.f32 %v5439_v6  ;;  %v2132_v11 = vsel %vm2131_vm8, %v3821_v2, %v2128_v60 }
 0x70e   :  { %v2137_v1 = vsel %vm2134_vm9, %v2136_v54, %v2132_v11 }
 0x713   :  { %v3825_v12 = vpop.eup %3824 }
 0x714   :  { %v2143_v51 = vmul.f32 %v3825_v12, %v2137_v1 }
 0x716   :  { %2160 = vmatmul.f32.vlgmr.msra.gmra.mxu0 %v2143_v51  ;;  %2180 = vmatmul.f32.vlgmr.msra.gmra.mxu1 %v2143_v51 }
 0x717   :  { %2200 = vmatmul.f32.vlgmr.msrb.gmra.mxu2 %v2143_v51  ;;  %2220 = vmatmul.f32.vlgmr.msrb.gmra.mxu3 %v2143_v51 }
 0x718   :  { %2438 = vmatpush.msra.mxu0 %v5086_v44  ;;  %2458 = vmatpush.msra.mxu1 %v5089_v28  ;;  %v6589_v44 = vld [vmem:[#allocation6_spill] sm:$0xff]  ;;  %v6590_v28 = vld [vmem:[#allocation7_spill] sm:$0xff] }
 0x719   :  { %2478 = vmatpush.msrb.mxu2 %v5092_v29  ;;  %2498 = vmatpush.msrb.mxu3 %v5095_v30  ;;  %v6591_v29 = vld [vmem:[#allocation8_spill] sm:$0xff]  ;;  %v6592_v30 = vld [vmem:[#allocation9_spill] sm:$0xff] }
 0x71a   :  { %2439 = vmatpush.msra.mxu0 %v5098_v41  ;;  %2459 = vmatpush.msra.mxu1 %v5101_v32  ;;  %v6593_v41 = vld [vmem:[#allocation10_spill] sm:$0xff]  ;;  %v6594_v32 = vld [vmem:[#allocation11_spill] sm:$0xff] }
 0x71b   :  { %2479 = vmatpush.msrb.mxu2 %v5104_v36  ;;  %2499 = vmatpush.msrb.mxu3 %v5107_v37  ;;  %v6595_v36 = vld [vmem:[#allocation12_spill] sm:$0xff]  ;;  %v6596_v37 = vld [vmem:[#allocation13_spill] sm:$0xff] }
 0x71c   :  { %2440 = vmatpush.msra.mxu0 %v5110_v48  ;;  %2460 = vmatpush.msra.mxu1 %v5113_v31  ;;  %v6597_v48 = vld [vmem:[#allocation14_spill] sm:$0xff]  ;;  %v6598_v31 = vld [vmem:[#allocation15_spill] sm:$0xff] }
 0x71d   :  { %2480 = vmatpush.msrb.mxu2 %v5116_v22  ;;  %2500 = vmatpush.msrb.mxu3 %v5119_v38  ;;  %v6599_v22 = vld [vmem:[#allocation16_spill] sm:$0xff]  ;;  %v6600_v38 = vld [vmem:[#allocation17_spill] sm:$0xff] }
 0x71e   :  { %2441 = vmatpush.msra.mxu0 %v5122_v45  ;;  %2461 = vmatpush.msra.mxu1 %v5125_v40  ;;  %v6601_v45 = vld [vmem:[#allocation18_spill] sm:$0xff]  ;;  %v6602_v40 = vld [vmem:[#allocation19_spill] sm:$0xff] }
 0x71f   :  { %2481 = vmatpush.msrb.mxu2 %v5128_v15  ;;  %2501 = vmatpush.msrb.mxu3 %v5131_v49  ;;  %v6603_v15 = vld [vmem:[#allocation20_spill] sm:$0xff]  ;;  %v6604_v49 = vld [vmem:[#allocation21_spill] sm:$0xff] }
 0x720   :  { %2442 = vmatpush.msra.mxu0 %v5134_v35  ;;  %2462 = vmatpush.msra.mxu1 %v5137_v39  ;;  %v6605_v35 = vld [vmem:[#allocation22_spill] sm:$0xff]  ;;  %v6606_v39 = vld [vmem:[#allocation23_spill] sm:$0xff] }
 0x721   :  { %2482 = vmatpush.msrb.mxu2 %v5140_v20  ;;  %2502 = vmatpush.msrb.mxu3 %v5143_v43  ;;  %v6607_v20 = vld [vmem:[#allocation24_spill] sm:$0xff]  ;;  %v6608_v43 = vld [vmem:[#allocation25_spill] sm:$0xff] }
 0x722   :  { %2443 = vmatpush.msra.mxu0 %v5146_v34  ;;  %2463 = vmatpush.msra.mxu1 %v5149_v50  ;;  %v6609_v34 = vld [vmem:[#allocation26_spill] sm:$0xff]  ;;  %v6610_v50 = vld [vmem:[#allocation27_spill] sm:$0xff] }
 0x723   :  { %2483 = vmatpush.msrb.mxu2 %v5152_v42  ;;  %2503 = vmatpush.msrb.mxu3 %v5155_v27  ;;  %v6611_v42 = vld [vmem:[#allocation28_spill] sm:$0xff]  ;;  %v6612_v27 = vld [vmem:[#allocation29_spill] sm:$0xff] }
 0x724   :  { %2444 = vmatpush.msra.mxu0 %v5234_v46  ;;  %2464 = vmatpush.msra.mxu1 %v5237_v61  ;;  %v6613_v46 = vld [vmem:[#allocation32_spill] sm:$0xff]  ;;  %v6614_v61 = vld [vmem:[#allocation33_spill] sm:$0xff] }
 0x725   :  { %2484 = vmatpush.msrb.mxu2 %v5240_v5  ;;  %2504 = vmatpush.msrb.mxu3 %v5243_v7  ;;  %v6615_v5 = vld [vmem:[#allocation57_spill] sm:$0xff]  ;;  %v6616_v7 = vld [vmem:[#allocation47_spill] sm:$0xff] }
 0x726   :  { %2445 = vmatpush.msra.mxu0 %v5246_v24  ;;  %2465 = vmatpush.msra.mxu1 %v5249_v8  ;;  %v1161_v24 = vadd.f32 %v6616_v7, %v6615_v5  ;;  %v6617_v8 = vld [vmem:[#allocation58_spill] sm:$0xff] }
 0x727   :  { %2485 = vmatpush.msrb.mxu2 %v5252_v9  ;;  %2505 = vmatpush.msrb.mxu3 %v5255_v18  ;;  %v6618_v9 = vld [vmem:[#allocation48_spill] sm:$0xff] }
 0x728   :  { %2446 = vmatpush.msra.mxu0 %v5258_v10  ;;  %2466 = vmatpush.msra.mxu1 %v5261_v14  ;;  %v1181_v18 = vadd.f32 %v6618_v9, %v6617_v8 }
 0x729   :  { %2486 = vmatpush.msrb.mxu2 %v5264_v16  ;;  %2506 = vmatpush.msrb.mxu3 %v5267_v19 }
 0x72a   :  { %2447 = vmatpush.msra.mxu0 %v5270_v21  ;;  %2467 = vmatpush.msra.mxu1 %v5273_v23 }
 0x72b   :  { %2487 = vmatpush.msrb.mxu2 %v6589_v44  ;;  %2507 = vmatpush.msrb.mxu3 %v6590_v28 }
 0x72c   :  { %2448 = vmatpush.msra.mxu0 %v6591_v29  ;;  %2468 = vmatpush.msra.mxu1 %v6592_v30 }
 0x72d   :  { %2488 = vmatpush.msrb.mxu2 %v6593_v41  ;;  %2508 = vmatpush.msrb.mxu3 %v6594_v32 }
 0x72e   :  { %2449 = vmatpush.msra.mxu0 %v6595_v36  ;;  %2469 = vmatpush.msra.mxu1 %v6596_v37 }
 0x72f   :  { %2489 = vmatpush.msrb.mxu2 %v6597_v48  ;;  %2509 = vmatpush.msrb.mxu3 %v6598_v31 }
 0x730   :  { %2450 = vmatpush.msra.mxu0 %v6599_v22  ;;  %2470 = vmatpush.msra.mxu1 %v6600_v38 }
 0x731   :  { %2490 = vmatpush.msrb.mxu2 %v6601_v45  ;;  %2510 = vmatpush.msrb.mxu3 %v6602_v40 }
 0x732   :  { %2451 = vmatpush.msra.mxu0 %v6603_v15  ;;  %2471 = vmatpush.msra.mxu1 %v6604_v49 }
 0x733   :  { %2491 = vmatpush.msrb.mxu2 %v6605_v35  ;;  %2511 = vmatpush.msrb.mxu3 %v6606_v39 }
 0x734   :  { %2452 = vmatpush.msra.mxu0 %v6607_v20  ;;  %2472 = vmatpush.msra.mxu1 %v6608_v43 }
 0x735   :  { %2492 = vmatpush.msrb.mxu2 %v6609_v34  ;;  %2512 = vmatpush.msrb.mxu3 %v6610_v50 }
 0x736   :  { %2453 = vmatpush.msra.mxu0 %v6611_v42  ;;  %2473 = vmatpush.msra.mxu1 %v6612_v27 }
 0x737   :  { %2493 = vmatpush.msrb.mxu2 %v6613_v46  ;;  %2513 = vmatpush.msrb.mxu3 %v6614_v61 }
 0x793   :  { %v2161_v10 = vpop.f32.mrf.mxu0  ;;  %v2181_v14 = vpop.f32.mrf.mxu1 }
 0x794   :  { %v2224_v16 = vadd.f32 %v2161_v10, %v1161_v24  ;;  %v2225_v19 = vadd.f32 %v2181_v14, %v1181_v18 }
 0x796   :  { %v3678_v21 = vmul.f32 -1.442695, %v2224_v16  ;;  %v3679_v23 = vmul.f32 -1.442695, %v2225_v19 }
 0x798   :  { %3826 = vpow2.f32 %v3678_v21 }
 0x799   :  { %3828 = vpow2.f32 %v3679_v23 }
 0x79a   :  { %v2221_v25 = vpop.f32.mrf.mxu3  ;;  %v2201_v47 = vpop.f32.mrf.mxu2 }
 0x79b   :  { %v2227_v2 = vadd.f32 %v2221_v25, %v1221_v57  ;;  %v2226_v60 = vadd.f32 %v2201_v47, %v1201_v55 }
 0x79d   :  { %v3680_v13 = vmul.f32 -1.442695, %v2227_v2 }
 0x79e   :  { %v3827_v56 = vpop.eup %3826 }
 0x79f   :  { %v3829_v33 = vpop.eup %3828  ;;  %v2231_v52 = vadd.f32 1.0, %v3827_v56  ;;  %3830 = vpow2.f32 %v3680_v13  ;;  %v5528_v13 = vld [vmem:[%s6225_s7 + $0x10] sm:$0x3f]  ;;  %v5535_v56 = vld [vmem:[%s6225_s7] sm:$0x3f] }
 0x7a0   :  { %v2250_v59 = vadd.f32 1.0, %v3829_v33  ;;  %v6623_v33 = vld [vmem:[#allocation51_spill] sm:$0xff] }
 0x7a1   :  { %3832 = vrcp.f32 %v2231_v52  ;;  %v2243_v1 = vand.u32 2147483648, %v2231_v52  ;;  %v2241_v28 = vand.u32 2147483647, %v2231_v52  ;;  %vm2237_vm2 = vweird.f32 %v2231_v52 }
 0x7a2   :  { %3834 = vrcp.f32 %v2250_v59  ;;  %v2262_v51 = vand.u32 2147483648, %v2250_v59  ;;  %v2260_v32 = vand.u32 2147483647, %v2250_v59  ;;  %vm2256_vm3 = vweird.f32 %v2250_v59 }
 0x7a3   :  { %v2244_v45 = vor.u32 1.1754944e-38, %v2243_v1  ;;  %vm2242_vm6 = vcmp.eq.f32.partialorder %v2241_v28, 8.507059e+37 }
 0x7a4   :  { %v2263_v39 = vor.u32 1.1754944e-38, %v2262_v51  ;;  %vm2261_vm7 = vcmp.eq.f32.partialorder %v2260_v32, 8.507059e+37  ;;  %v5553_v32 = vld [vmem:[%s6227_s9 + $0x70] sm:$0xff] }
 0x7a5   :  { %v3831_v26 = vpop.eup %3830 }
 0x7a6   :  { %v2270_v63 = vadd.f32 1.0, %v3831_v26 }
 0x7a7   :  { %v3833_v17 = vpop.eup %3832 }
 0x7a8   :  { %v3835_v4 = vpop.eup %3834  ;;  %v2233_v3 = vmul.f32 %v3833_v17, %v2231_v52  ;;  %3836 = vrcp.f32 %v2270_v63  ;;  %vm2238_vm15 = vweird.f32 %v3833_v17  ;;  %v2282_v19 = vand.u32 2147483648, %v2270_v63 }
 0x7a9   :  { %v2252_v11 = vmul.f32 %v3835_v4, %v2250_v59  ;;  %3838 = vtanh.f32 %v2226_v60  ;;  %vm2257_vm1 = vweird.f32 %v3835_v4  ;;  %vm2239_vm4 = vmor %vm2237_vm2, %vm2238_vm15  ;;  %vm2276_vm9 = vweird.f32 %v2270_v63  ;;  %v6624_v59 = vld [vmem:[#allocation52_spill] sm:$0xff] }
 0x7aa   :  { %v2234_v54 = vsub.f32 1.0, %v2233_v3  ;;  %vm2258_vm5 = vmor %vm2256_vm3, %vm2257_vm1  ;;  %v2280_v21 = vand.u32 2147483647, %v2270_v63  ;;  %v2283_v58 = vor.u32 1.1754944e-38, %v2282_v19  ;;  %v1254_v52 = vadd.f32 %v6623_v33, %v6615_v5 }
 0x7ab   :  { %v2253_v12 = vsub.f32 1.0, %v2252_v11  ;;  %v1274_v47 = vadd.f32 %v6624_v59, %v6617_v8 }
 0x7ac   :  { %v2235_v44 = vmul.f32 %v3833_v17, %v2234_v54  ;;  %vm2281_vm1 = vcmp.eq.f32.partialorder %v2280_v21, 8.507059e+37 }
 0x7ad   :  { %v2254_v41 = vmul.f32 %v3835_v4, %v2253_v12 }
 0x7ae   :  { %v3837_v48 = vpop.eup %3836  ;;  %v2236_v31 = vadd.f32 %v3833_v17, %v2235_v44 }
 0x7af   :  { %v2255_v40 = vadd.f32 %v3835_v4, %v2254_v41  ;;  %v2272_v35 = vmul.f32 %v3837_v48, %v2270_v63  ;;  %v3839_v50 = vpop.eup %3838  ;;  %vm2277_vm8 = vweird.f32 %v3837_v48  ;;  %v5548_v41 = vld [vmem:[%s6227_s9 + $0x78] sm:$0xff] }
 0x7b0   :  { %v2240_v34 = vsel %vm2239_vm4, %v3833_v17, %v2236_v31  ;;  %vm2278_vm15 = vmor %vm2276_vm9, %vm2277_vm8 }
 0x7b1   :  { %v2245_v46 = vsel %vm2242_vm6, %v2244_v45, %v2240_v34  ;;  %v2259_v61 = vsel %vm2258_vm5, %v3835_v4, %v2255_v40  ;;  %v2273_v7 = vsub.f32 1.0, %v2272_v35  ;;  %v6625_v4 = vld [vmem:[#allocation54_spill] sm:$0xff]  ;;  %v6626_v40 = vld [vmem:[#allocation59_spill] sm:$0xff] }
 0x7b2   :  { %v2264_v24 = vsel %vm2261_vm7, %v2263_v39, %v2259_v61  ;;  %v2287_v9 = vmul.f32 %v3839_v50, %v2245_v46  ;;  %v1314_v3 = vadd.f32 %v6625_v4, %v6619_v0  ;;  %v1294_v35 = vadd.f32 %v6626_v40, %v6621_v53  ;;  %v5567_v39 = vld [vmem:[%s6227_s9 + $0x60] sm:$0xff]  ;;  %v5573_v61 = vld [vmem:[%s6227_s9 + $0x58] sm:$0xff] }
 0x7b3   :  { %v2286_v18 = vmul.f32 %v2264_v24, %v5439_v6  ;;  %v2274_v10 = vmul.f32 %v3837_v48, %v2273_v7  ;;  %v5521_v6 = vld [vmem:[%s6225_s7 + $0x8] sm:$0x3f] }
 0x7b5   :  { %v5515_v14 = vadd.f32 %v2287_v9, %v2286_v18  ;;  %v2275_v16 = vadd.f32 %v3837_v48, %v2274_v10 }
 0x7b7   :  { %3840 = vtanh.f32 %v5515_v14  ;;  %v2279_v23 = vsel %vm2278_vm15, %v3837_v48, %v2275_v16  ;;  %v5559_v48 = vld [vmem:[%s6227_s9 + $0x68] sm:$0xff] }
 0x7b8   :  { %v2284_v25 = vsel %vm2281_vm1, %v2283_v58, %v2279_v23 }
 0x7bd   :  { %v3841_v57 = vpop.eup %3840 }
 0x7be   :  { %v2290_v2 = vmul.f32 %v3841_v57, %v2284_v25 }
 0x7c0   :  { %2307 = vmatmul.f32.vlgmr.msrb.gmra.mxu0 %v2290_v2  ;;  %2327 = vmatmul.f32.vlgmr.msrb.gmra.mxu1 %v2290_v2 }
 0x7c1   :  { %2347 = vmatmul.f32.vlgmr.msra.gmra.mxu2 %v2290_v2  ;;  %2367 = vmatmul.f32.vlgmr.msra.gmra.mxu3 %v2290_v2 }
 0x7c2   :  { %3690 = vmatpush.msk.msra.mxu2 %vm665_vm11, %v5521_v6  ;;  %3692 = vmatpush.msk.msra.mxu3 %vm665_vm11, %v5528_v13 }
 0x7c3   :  { %3688 = vmatpush.msk.msrb.mxu1 %vm665_vm11, %v5535_v56  ;;  %2585 = vmatpush.msrb.mxu0 %v5548_v41 }
 0x7c5   :  { %2586 = vmatpush.msrb.mxu0 %v5553_v32 }
 0x7c7   :  { %2587 = vmatpush.msrb.mxu0 %v5559_v48 }
 0x7c9   :  { %2588 = vmatpush.msrb.mxu0 %v5567_v39 }
 0x7cb   :  { %2589 = vmatpush.msrb.mxu0 %v5573_v61 }
 0x83d   :  { %v2308_v26 = vpop.f32.mrf.mxu0  ;;  %v2328_v62 = vpop.f32.mrf.mxu1 }
 0x83e   :  { %v2371_v55 = vadd.f32 %v2308_v26, %v1254_v52  ;;  %v2372_v63 = vadd.f32 %v2328_v62, %v1274_v47 }
 0x840   :  { %v3681_v17 = vmul.f32 -1.442695, %v2371_v55  ;;  %v3682_v60 = vmul.f32 -1.442695, %v2372_v63 }
 0x842   :  { %3842 = vpow2.f32 %v3681_v17 }
 0x843   :  { %3844 = vpow2.f32 %v3682_v60 }
 0x844   :  { %v2368_v11 = vpop.f32.mrf.mxu3  ;;  %v2348_v31 = vpop.f32.mrf.mxu2 }
 0x845   :  { %v2374_v54 = vadd.f32 %v2368_v11, %v1314_v3  ;;  %v2373_v46 = vadd.f32 %v2348_v31, %v1294_v35  ;;  %v5584_v35 = vld [vmem:[#allocation2 + $0x1e8] sm:$0xff] }
 0x847   :  { %v3683_v12 = vmul.f32 -1.442695, %v2374_v54 }
 0x848   :  { %v3843_v1 = vpop.eup %3842 }
 0x849   :  { %v3845_v51 = vpop.eup %3844  ;;  %v2378_v44 = vadd.f32 1.0, %v3843_v1  ;;  %3846 = vpow2.f32 %v3683_v12 }
 0x84a   :  { %v2397_v28 = vadd.f32 1.0, %v3845_v51 }
 0x84b   :  { %3848 = vrcp.f32 %v2378_v44  ;;  %v2390_v16 = vand.u32 2147483648, %v2378_v44  ;;  %v2388_v23 = vand.u32 2147483647, %v2378_v44  ;;  %vm2384_vm4 = vweird.f32 %v2378_v44 }
 0x84c   :  { %3850 = vrcp.f32 %v2397_v28  ;;  %v2409_v19 = vand.u32 2147483648, %v2397_v28  ;;  %v2407_v57 = vand.u32 2147483647, %v2397_v28  ;;  %vm2403_vm5 = vweird.f32 %v2397_v28 }
 0x84d   :  { %v2391_v33 = vor.u32 1.1754944e-38, %v2390_v16  ;;  %vm2389_vm8 = vcmp.eq.f32.partialorder %v2388_v23, 8.507059e+37  ;;  %v5615_v16 = vld [vmem:[#allocation2 + $0x168] sm:$0xff]  ;;  %v5624_v23 = vld [vmem:[#allocation2 + $0x120] sm:$0xff] }
 0x84e   :  { %v2410_v47 = vor.u32 1.1754944e-38, %v2409_v19  ;;  %vm2408_vm9 = vcmp.eq.f32.partialorder %v2407_v57, 8.507059e+37  ;;  %v5618_v19 = vld [vmem:[#allocation2 + $0x140] sm:$0xff]  ;;  %6634 = vst [vmem:[#allocation41_spill] sm:$0xff] %v5624_v23 }
 0x84f   :  { %v3847_v45 = vpop.eup %3846  ;;  %6633 = vst [vmem:[#allocation38_spill] sm:$0xff] %v5618_v19  ;;  %v5630_v57 = vld [vmem:[#allocation2 + $0x100] sm:$0xff] }
 0x850   :  { %v2417_v34 = vadd.f32 1.0, %v3847_v45  ;;  %6635 = vst [vmem:[#allocation39_spill] sm:$0xff] %v5630_v57 }
 0x851   :  { %v3849_v50 = vpop.eup %3848 }
 0x852   :  { %v3851_v7 = vpop.eup %3850  ;;  %v2380_v24 = vmul.f32 %v3849_v50, %v2378_v44  ;;  %3852 = vrcp.f32 %v2417_v34  ;;  %vm2385_vm2 = vweird.f32 %v3849_v50  ;;  %v2429_v1 = vand.u32 2147483648, %v2417_v34 }
 0x853   :  { %v2399_v9 = vmul.f32 %v3851_v7, %v2397_v28  ;;  %3854 = vtanh.f32 %v2373_v46  ;;  %vm2404_vm3 = vweird.f32 %v3851_v7  ;;  %vm2386_vm6 = vmor %vm2384_vm4, %vm2385_vm2  ;;  %vm2423_vm1 = vweird.f32 %v2417_v34  ;;  %v5597_v46 = vld [vmem:[#allocation2 + $0x1c8] sm:$0xff] }
 0x854   :  { %v2381_v18 = vsub.f32 1.0, %v2380_v24  ;;  %vm2405_vm7 = vmor %vm2403_vm5, %vm2404_vm3  ;;  %v2427_v51 = vand.u32 2147483647, %v2417_v34  ;;  %v2430_v28 = vor.u32 1.1754944e-38, %v2429_v1  ;;  %v5603_v24 = vld [vmem:[#allocation2 + $0x1a8] sm:$0xff] }
 0x855   :  { %v2400_v10 = vsub.f32 1.0, %v2399_v9  ;;  %v5606_v9 = vld [vmem:[#allocation2 + $0x180] sm:$0xff] }
 0x856   :  { %v2382_v21 = vmul.f32 %v3849_v50, %v2381_v18  ;;  %vm2428_vm3 = vcmp.eq.f32.partialorder %v2427_v51, 8.507059e+37  ;;  %6631 = vst [vmem:[#allocation36_spill] sm:$0xff] %v5606_v9  ;;  %v5609_v18 = vld [vmem:[#allocation2 + $0x188] sm:$0xff]  ;;  %v5745_v51 = vld [vmem:[#allocation2 + $0x158] sm:$0xff] }
 0x857   :  { %v2401_v58 = vmul.f32 %v3851_v7, %v2400_v10  ;;  %v5612_v10 = vld [vmem:[#allocation2 + $0x160] sm:$0xff]  ;;  %6645 = vst [vmem:[#allocation6_spill] sm:$0xff] %v5745_v51 }
 0x858   :  { %v3853_v25 = vpop.eup %3852  ;;  %v2383_v2 = vadd.f32 %v3849_v50, %v2382_v21  ;;  %6632 = vst [vmem:[#allocation37_spill] sm:$0xff] %v5612_v10  ;;  %v5621_v21 = vld [vmem:[#allocation2 + $0x148] sm:$0xff] }
 0x859   :  { %v2402_v52 = vadd.f32 %v3851_v7, %v2401_v58  ;;  %v2419_v59 = vmul.f32 %v3853_v25, %v2417_v34  ;;  %v3855_v62 = vpop.eup %3854  ;;  %vm2424_vm15 = vweird.f32 %v3853_v25  ;;  %v5590_v34 = vld [vmem:[%s6225_s7 + $0x18] sm:$0x3f]  ;;  %v5627_v58 = vld [vmem:[#allocation2 + $0x128] sm:$0xff] }
 0x85a   :  { %v2387_v26 = vsel %vm2386_vm6, %v3849_v50, %v2383_v2  ;;  %vm2425_vm2 = vmor %vm2423_vm1, %vm2424_vm15  ;;  %6628 = vst [vmem:[#allocation34_spill] sm:$0xff] %v5590_v34  ;;  %v5594_v50 = vld [vmem:[#allocation2 + $0x1c0] sm:$0xff] }
 0x85b   :  { %v2392_v55 = vsel %vm2389_vm8, %v2391_v33, %v2387_v26  ;;  %v2406_v63 = vsel %vm2405_vm7, %v3851_v7, %v2402_v52  ;;  %v2420_v17 = vsub.f32 1.0, %v2419_v59  ;;  %6629 = vst [vmem:[#allocation30_spill] sm:$0xff] %v5594_v50  ;;  %v5600_v7 = vld [vmem:[#allocation2 + $0x1a0] sm:$0xff]  ;;  %v5639_v33 = vld [vmem:[#allocation2 + $0xe8] sm:$0xff]  ;;  %v5732_v26 = vld [vmem:[#allocation2 + $0x1b8] sm:$0xff] }
 0x85c   :  { %v2411_v60 = vsel %vm2408_vm9, %v2410_v47, %v2406_v63  ;;  %v2434_v4 = vmul.f32 %v3855_v62, %v2392_v55  ;;  %6630 = vst [vmem:[#allocation31_spill] sm:$0xff] %v5600_v7  ;;  %v5636_v2 = vld [vmem:[#allocation2 + $0xe0] sm:$0xff]  ;;  %v5645_v59 = vld [vmem:[#allocation2 + $0xc8] sm:$0xff]  ;;  %v5729_v47 = vld [vmem:[#allocation2 + $0x1d8] sm:$0xff] }
 0x85d   :  { %v2433_v3 = vmul.f32 %v2411_v60, %v5515_v14  ;;  %v2421_v11 = vmul.f32 %v3853_v25, %v2420_v17  ;;  %v5581_v14 = vld [vmem:[#allocation2 + $0x1e0] sm:$0xff]  ;;  %6636 = vst [vmem:[#allocation40_spill] sm:$0xff] %v5636_v2  ;;  %v5735_v62 = vld [vmem:[#allocation2 + $0x198] sm:$0xff]  ;;  %v6642_v55 = vld [vmem:[#allocation55_spill] sm:$0xff] }
 0x85e   :  { %6627 = vst [vmem:[#allocation35_spill] sm:$0xff] %v5581_v14  ;;  %v5642_v52 = vld [vmem:[#allocation2 + $0xc0] sm:$0xff]  ;;  %v1347_v63 = vadd.f32 %v6642_v55, %v6615_v5  ;;  %v6643_v17 = vld [vmem:[#allocation56_spill] sm:$0xff] }
 0x85f   :  { %v5578_v54 = vadd.f32 %v2434_v4, %v2433_v3  ;;  %v2422_v12 = vadd.f32 %v3853_v25, %v2421_v11  ;;  %6637 = vst [vmem:[#allocation42_spill] sm:$0xff] %v5642_v52  ;;  %v1367_v60 = vadd.f32 %v6643_v17, %v6617_v8  ;;  %v5742_v4 = vld [vmem:[#allocation2 + $0x178] sm:$0xff] }
 0x860   :  { %6639 = vst [vmem:[#allocation43_spill] sm:$0xff] %v5729_v47  ;;  %v5756_v17 = vld [vmem:[#allocation2 + $0xf8] sm:$0xff] }
 0x861   :  { %3856 = vtanh.f32 %v5578_v54  ;;  %v2426_v44 = vsel %vm2425_vm2, %v3853_v25, %v2422_v12  ;;  %v5633_v25 = vld [vmem:[#allocation2 + $0x108] sm:$0xff]  ;;  %6640 = vst [vmem:[#allocation44_spill] sm:$0xff] %v5732_v26 }
 0x862   :  { %v2431_v45 = vsel %vm2428_vm3, %v2430_v28, %v2426_v44  ;;  %6641 = vst [vmem:[#allocation46_spill] sm:$0xff] %v5735_v62 }
 0x863   :  { %6644 = vst [vmem:[#allocation49_spill] sm:$0xff] %v5742_v4 }
 0x864   :  { %6649 = vst [vmem:[#allocation9_spill] sm:$0xff] %v5756_v17 }
 0x867   :  { %v3857_v31 = vpop.eup %3856 }
 0x868   :  { %v2437_v40 = vmul.f32 %v3857_v31, %v2431_v45  ;;  %v5748_v31 = vld [vmem:[#allocation2 + $0x138] sm:$0xff] }
 0x869   :  { %6646 = vst [vmem:[#allocation7_spill] sm:$0xff] %v5748_v31  ;;  %v5751_v45 = vld [vmem:[#allocation2 + $0x118] sm:$0xff] }
 0x86a   :  { %2454 = vmatmul.f32.vlgmr.msra.gmra.mxu0 %v2437_v40  ;;  %2474 = vmatmul.f32.vlgmr.msra.gmra.mxu1 %v2437_v40  ;;  %6647 = vst [vmem:[#allocation8_spill] sm:$0xff] %v5751_v45 }
 0x86b   :  { %2494 = vmatmul.f32.vlgmr.msrb.gmra.mxu2 %v2437_v40  ;;  %2514 = vmatmul.f32.vlgmr.msrb.gmra.mxu3 %v2437_v40  ;;  %v6648_v40 = vld [vmem:[#allocation60_spill] sm:$0xff] }
 0x86c   :  { %2759 = vmatpush.msrb.mxu2 %v5581_v14  ;;  %2779 = vmatpush.msrb.mxu3 %v5584_v35  ;;  %v1407_v55 = vadd.f32 %v6648_v40, %v6619_v0  ;;  %v5765_v40 = vld [vmem:[#allocation2 + $0x98] sm:$0xff] }
 0x86d   :  { %3694 = vmatpush.msk.msra.mxu1 %vm665_vm11, %v5590_v34  ;;  %6652 = vst [vmem:[#allocation12_spill] sm:$0xff] %v5765_v40 }
 0x86e   :  { %2760 = vmatpush.msrb.mxu2 %v5594_v50  ;;  %2780 = vmatpush.msrb.mxu3 %v5597_v46 }
 0x870   :  { %2761 = vmatpush.msrb.mxu2 %v5600_v7  ;;  %2781 = vmatpush.msrb.mxu3 %v5603_v24  ;;  %v5779_v7 = vld [vmem:[#allocation2 + $0x18] sm:$0xff] }
 0x871   :  { %6657 = vst [vmem:[#allocation16_spill] sm:$0xff] %v5779_v7 }
 0x872   :  { %2762 = vmatpush.msrb.mxu2 %v5606_v9  ;;  %2782 = vmatpush.msrb.mxu3 %v5609_v18 }
 0x874   :  { %2763 = vmatpush.msrb.mxu2 %v5612_v10  ;;  %2783 = vmatpush.msrb.mxu3 %v5615_v16 }
 0x876   :  { %2764 = vmatpush.msrb.mxu2 %v5618_v19  ;;  %2784 = vmatpush.msrb.mxu3 %v5621_v21 }
 0x878   :  { %2765 = vmatpush.msrb.mxu2 %v5624_v23  ;;  %2785 = vmatpush.msrb.mxu3 %v5627_v58 }
 0x87a   :  { %2766 = vmatpush.msrb.mxu2 %v5630_v57  ;;  %2786 = vmatpush.msrb.mxu3 %v5633_v25  ;;  %v5776_v57 = vld [vmem:[#allocation2 + $0x38] sm:$0xff] }
 0x87b   :  { %6656 = vst [vmem:[#allocation15_spill] sm:$0xff] %v5776_v57 }
 0x87c   :  { %2767 = vmatpush.msrb.mxu2 %v5636_v2  ;;  %2787 = vmatpush.msrb.mxu3 %v5639_v33 }
 0x87e   :  { %2768 = vmatpush.msrb.mxu2 %v5642_v52  ;;  %2788 = vmatpush.msrb.mxu3 %v5645_v59 }
 0x880   :  { %2769 = vmatpush.msrb.mxu2 %v6591_v29  ;;  %2789 = vmatpush.msrb.mxu3 %v6592_v30  ;;  %v5663_v29 = vld [vmem:[%s6227_s9 + $0x50] sm:$0xff]  ;;  %v5669_v30 = vld [vmem:[%s6227_s9 + $0x48] sm:$0xff] }
 0x881   :  { %2590 = vmatpush.msrb.mxu0 %v5663_v29 }
 0x882   :  { %2770 = vmatpush.msrb.mxu2 %v6595_v36  ;;  %2790 = vmatpush.msrb.mxu3 %v6596_v37  ;;  %v5675_v36 = vld [vmem:[%s6227_s9 + $0x40] sm:$0xff]  ;;  %v5681_v37 = vld [vmem:[%s6227_s9 + $0x38] sm:$0xff] }
 0x883   :  { %2591 = vmatpush.msrb.mxu0 %v5669_v30 }
 0x884   :  { %2771 = vmatpush.msrb.mxu2 %v6599_v22  ;;  %2791 = vmatpush.msrb.mxu3 %v6600_v38  ;;  %v5687_v22 = vld [vmem:[%s6227_s9 + $0x30] sm:$0xff]  ;;  %v5693_v38 = vld [vmem:[%s6227_s9 + $0x28] sm:$0xff] }
 0x885   :  { %2592 = vmatpush.msrb.mxu0 %v5675_v36 }
 0x886   :  { %2772 = vmatpush.msrb.mxu2 %v6603_v15  ;;  %2792 = vmatpush.msrb.mxu3 %v6604_v49  ;;  %v5699_v15 = vld [vmem:[%s6227_s9 + $0x20] sm:$0xff]  ;;  %v5705_v49 = vld [vmem:[%s6227_s9 + $0x18] sm:$0xff] }
 0x887   :  { %2593 = vmatpush.msrb.mxu0 %v5681_v37 }
 0x888   :  { %2773 = vmatpush.msrb.mxu2 %v6607_v20  ;;  %2793 = vmatpush.msrb.mxu3 %v6608_v43  ;;  %v5711_v20 = vld [vmem:[%s6227_s9 + $0x10] sm:$0xff]  ;;  %v5717_v43 = vld [vmem:[%s6227_s9 + $0x8] sm:$0xff] }
 0x889   :  { %2594 = vmatpush.msrb.mxu0 %v5687_v22 }
 0x88a   :  { %2774 = vmatpush.msrb.mxu2 %v6611_v42  ;;  %2794 = vmatpush.msrb.mxu3 %v6612_v27  ;;  %v5723_v42 = vld [vmem:[%s6227_s9] sm:$0xff]  ;;  %v5726_v27 = vld [vmem:[#allocation2 + $0x1f8] sm:$0xff] }
 0x88b   :  { %2595 = vmatpush.msrb.mxu0 %v5693_v38  ;;  %6638 = vst [vmem:[#allocation45_spill] sm:$0xff] %v5726_v27 }
 0x88d   :  { %2596 = vmatpush.msrb.mxu0 %v5699_v15 }
 0x88f   :  { %2597 = vmatpush.msrb.mxu0 %v5705_v49 }
 0x891   :  { %2598 = vmatpush.msrb.mxu0 %v5711_v20 }
 0x893   :  { %2599 = vmatpush.msrb.mxu0 %v5717_v43 }
 0x895   :  { %2600 = vmatpush.msrb.mxu0 %v5723_v42 }
 0x897   :  { %2819 = vmatpush.msra.mxu0 %v5726_v27 }
 0x899   :  { %2820 = vmatpush.msra.mxu0 %v5729_v47 }
 0x89b   :  { %2821 = vmatpush.msra.mxu0 %v5732_v26 }
 0x89d   :  { %2822 = vmatpush.msra.mxu0 %v5735_v62 }
 0x89f   :  { %2823 = vmatpush.msra.mxu0 %v5742_v4 }
 0x8a1   :  { %2824 = vmatpush.msra.mxu0 %v5745_v51 }
 0x8a3   :  { %2825 = vmatpush.msra.mxu0 %v5748_v31 }
 0x8a5   :  { %2826 = vmatpush.msra.mxu0 %v5751_v45 }
 0x8a7   :  { %2827 = vmatpush.msra.mxu0 %v5756_v17 }
 0x8e7   :  { %v2455_v3 = vpop.f32.mrf.mxu0  ;;  %v2475_v11 = vpop.f32.mrf.mxu1 }
 0x8e8   :  { %v2518_v12 = vadd.f32 %v2455_v3, %v1347_v63  ;;  %v2519_v1 = vadd.f32 %v2475_v11, %v1367_v60  ;;  %v5759_v3 = vld [vmem:[#allocation2 + $0xd8] sm:$0xff] }
 0x8e9   :  { %6650 = vst [vmem:[#allocation10_spill] sm:$0xff] %v5759_v3  ;;  %2828 = vmatpush.msra.mxu0 %v5759_v3 }
 0x8ea   :  { %v3684_v44 = vmul.f32 -1.442695, %v2518_v12  ;;  %v3685_v28 = vmul.f32 -1.442695, %v2519_v1  ;;  %v5762_v1 = vld [vmem:[#allocation2 + $0xb8] sm:$0xff] }
 0x8eb   :  { %6651 = vst [vmem:[#allocation11_spill] sm:$0xff] %v5762_v1  ;;  %2829 = vmatpush.msra.mxu0 %v5762_v1 }
 0x8ec   :  { %3858 = vpow2.f32 %v3684_v44 }
 0x8ed   :  { %3860 = vpow2.f32 %v3685_v28  ;;  %2830 = vmatpush.msra.mxu0 %v5765_v40 }
 0x8ee   :  { %v2515_v63 = vpop.f32.mrf.mxu3 }
 0x8ef   :  { %v2521_v60 = vadd.f32 %v2515_v63, %v1407_v55  ;;  %v5768_v55 = vld [vmem:[#allocation2 + $0x78] sm:$0xff]  ;;  %v2495_v63 = vpop.f32.mrf.mxu2 }
 0x8f0   :  { %6653 = vst [vmem:[#allocation13_spill] sm:$0xff] %v5768_v55  ;;  %2831 = vmatpush.msra.mxu0 %v5768_v55 }
 0x8f1   :  { %v3686_v11 = vmul.f32 -1.442695, %v2521_v60  ;;  %v5771_v60 = vld [vmem:[#allocation2 + $0x58] sm:$0xff] }
 0x8f2   :  { %v3859_v12 = vpop.eup %3858  ;;  %6654 = vst [vmem:[#allocation14_spill] sm:$0xff] %v5771_v60  ;;  %2832 = vmatpush.msra.mxu0 %v5771_v60 }
 0x8f3   :  { %v3861_v44 = vpop.eup %3860  ;;  %v2525_v52 = vadd.f32 1.0, %v3859_v12  ;;  %3862 = vpow2.f32 %v3686_v11  ;;  %v6655_v12 = vld [vmem:[#allocation62_spill] sm:$0xff] }
 0x8f4   :  { %v2544_v28 = vadd.f32 1.0, %v3861_v44  ;;  %v1387_v11 = vadd.f32 %v6655_v12, %v6621_v53  ;;  %2833 = vmatpush.msra.mxu0 %v5776_v57 }
 0x8f5   :  { %3864 = vrcp.f32 %v2525_v52  ;;  %v2537_v5 = vand.u32 2147483648, %v2525_v52  ;;  %v2535_v53 = vand.u32 2147483647, %v2525_v52  ;;  %vm2531_vm6 = vweird.f32 %v2525_v52 }
 0x8f6   :  { %3866 = vrcp.f32 %v2544_v28  ;;  %v2520_v19 = vadd.f32 %v2495_v63, %v1387_v11  ;;  %2834 = vmatpush.msra.mxu0 %v5779_v7  ;;  %v2556_v12 = vand.u32 2147483648, %v2544_v28  ;;  %v2554_v57 = vand.u32 2147483647, %v2544_v28 }
 0x8f7   :  { %vm2550_vm7 = vweird.f32 %v2544_v28  ;;  %v2538_v60 = vor.u32 1.1754944e-38, %v2537_v5  ;;  %vm2536_vm15 = vcmp.eq.f32.partialorder %v2535_v53, 8.507059e+37 }
 0x8f8   :  { %vm2555_vm1 = vcmp.eq.f32.partialorder %v2554_v57, 8.507059e+37 }
 0x8f9   :  { %v3863_v2 = vpop.eup %3862 }
 0x8fa   :  { %v2564_v44 = vadd.f32 1.0, %v3863_v2 }
 0x8fb   :  { %v3865_v23 = vpop.eup %3864 }
 0x8fc   :  { %v3867_v10 = vpop.eup %3866  ;;  %v2527_v9 = vmul.f32 %v3865_v23, %v2525_v52  ;;  %3868 = vrcp.f32 %v2564_v44  ;;  %vm2532_vm4 = vweird.f32 %v3865_v23  ;;  %vm2570_vm3 = vweird.f32 %v2564_v44 }
 0x8fd   :  { %v2546_v50 = vmul.f32 %v3867_v10, %v2544_v28  ;;  %3870 = vtanh.f32 %v2520_v19  ;;  %vm2551_vm5 = vweird.f32 %v3867_v10  ;;  %vm2533_vm8 = vmor %vm2531_vm6, %vm2532_vm4 }
 0x8fe   :  { %v2528_v14 = vsub.f32 1.0, %v2527_v9  ;;  %vm2552_vm9 = vmor %vm2550_vm7, %vm2551_vm5  ;;  %v2557_v9 = vor.u32 1.1754944e-38, %v2556_v12 }
 0x8ff   :  { %v2547_v8 = vsub.f32 1.0, %v2546_v50 }
 0x900   :  { %v2529_v2 = vmul.f32 %v3865_v23, %v2528_v14 }
 0x901   :  { %v2548_v0 = vmul.f32 %v3867_v10, %v2547_v8 }
 0x902   :  { %v3869_v63 = vpop.eup %3868  ;;  %v2530_v11 = vadd.f32 %v3865_v23, %v2529_v2 }
 0x903   :  { %v2549_v55 = vadd.f32 %v3867_v10, %v2548_v0  ;;  %v2566_v7 = vmul.f32 %v3869_v63, %v2564_v44  ;;  %v3871_v19 = vpop.eup %3870  ;;  %vm2571_vm2 = vweird.f32 %v3869_v63  ;;  %v2576_v0 = vand.u32 2147483648, %v2564_v44 }
 0x904   :  { %v2534_v50 = vsel %vm2533_vm8, %v3865_v23, %v2530_v11  ;;  %v2574_v23 = vand.u32 2147483647, %v2564_v44  ;;  %vm2572_vm4 = vmor %vm2570_vm3, %vm2571_vm2  ;;  %v6660_v11 = vld [vmem:[#allocation5_spill] sm:$0xff] }
 0x905   :  { %v2539_v40 = vsel %vm2536_vm15, %v2538_v60, %v2534_v50  ;;  %v2553_v14 = vsel %vm2552_vm9, %v3867_v10, %v2549_v55  ;;  %v2567_v1 = vsub.f32 1.0, %v2566_v7  ;;  %v2577_v28 = vor.u32 1.1754944e-38, %v2576_v0 }
 0x906   :  { %v2558_v8 = vsel %vm2555_vm1, %v2557_v9, %v2553_v14  ;;  %v2581_v3 = vmul.f32 %v3871_v19, %v2539_v40  ;;  %vm2575_vm5 = vcmp.eq.f32.partialorder %v2574_v23, 8.507059e+37 }
 0x907   :  { %v2580_v17 = vmul.f32 %v2558_v8, %v5578_v54  ;;  %v2568_v2 = vmul.f32 %v3869_v63, %v2567_v1  ;;  %v4030_v54 = vld [vmem:[#allocation2 + $0xa8] sm:$0xff]  ;;  %v5821_v1 = vld [vmem:[%s6221_s3] sm:$0xf] }
 0x909   :  { %v5783_v52 = vadd.f32 %v2581_v3, %v2580_v17  ;;  %v2569_v5 = vadd.f32 %v3869_v63, %v2568_v2 }
 0x90b   :  { %3872 = vtanh.f32 %v5783_v52  ;;  %v2573_v53 = vsel %vm2572_vm4, %v3869_v63, %v2569_v5 }
 0x90c   :  { %v2578_v7 = vsel %vm2575_vm5, %v2577_v28, %v2573_v53 }
 0x911   :  { %v3873_v10 = vpop.eup %3872 }
 0x912   :  { %v5786_v57 = vmul.f32 %v3873_v10, %v2578_v7 }
 0x914   :  { %2601 = vmatmul.f32.vlgmr.msrb.gmra.mxu0 %v5786_v57 }
 0x915   :  { %3100 = vmatpush.msrb.mxu0 %v5584_v35  ;;  %v4031_v35 = vld [vmem:[#allocation2 + $0x88] sm:$0xff] }
 0x917   :  { %3101 = vmatpush.msrb.mxu0 %v5597_v46  ;;  %v4032_v46 = vld [vmem:[#allocation2 + $0x68] sm:$0xff] }
 0x919   :  { %3102 = vmatpush.msrb.mxu0 %v5603_v24  ;;  %v4033_v24 = vld [vmem:[#allocation2 + $0x48] sm:$0xff] }
 0x91b   :  { %3103 = vmatpush.msrb.mxu0 %v5609_v18  ;;  %v4034_v18 = vld [vmem:[#allocation2 + $0x28] sm:$0xff] }
 0x91c   :  { %2835 = vmatmul.f32.vlgmr.msra.gmra.mxu0 %v5786_v57 }
 0x91d   :  { %3104 = vmatpush.msrb.mxu0 %v5615_v16  ;;  %v4035_v16 = vld [vmem:[#allocation2 + $0x8] sm:$0xff] }
 0x91f   :  { %3105 = vmatpush.msrb.mxu0 %v5621_v21  ;;  %v5805_v21 = vld [vmem:[%s6228_s10] ss:$0 sm:$0xff] }
 0x920   :  { %6658 = vst [vmem:[#allocation17_spill] sm:$0xff] %v5805_v21 }
 0x921   :  { %3106 = vmatpush.msrb.mxu0 %v5627_v58 }
 0x923   :  { %3107 = vmatpush.msrb.mxu0 %v5633_v25 }
 0x925   :  { %3108 = vmatpush.msrb.mxu0 %v5639_v33 }
 0x927   :  { %3109 = vmatpush.msrb.mxu0 %v5645_v59  ;;  %v5815_v59 = vld [vmem:[%s6220_s2] sm:$0xf] }
 0x929   :  { %3110 = vmatpush.msrb.mxu0 %v4030_v54  ;;  %v6661_v54 = vmov 0.0  }
 0x92b   :  { %3111 = vmatpush.msrb.mxu0 %v4031_v35 }
 0x92d   :  { %3112 = vmatpush.msrb.mxu0 %v4032_v46  ;;  %v5832_v46 = vld [vmem:[%s6223_s5] sm:$0xf] }
 0x92f   :  { %3113 = vmatpush.msrb.mxu0 %v4033_v24 }
 0x931   :  { %3114 = vmatpush.msrb.mxu0 %v4034_v18  ;;  %v5838_v18 = vld [vmem:[%s6222_s4] sm:$0xf] }
 0x932   :  { %6662 = vst [vmem:[#allocation19_spill] sm:$0xff] %v5838_v18 }
 0x933   :  { %3115 = vmatpush.msrb.mxu0 %v4035_v16 }
 0x935   :  { %3712 = vmatpush.msk.msra.mxu0 %vm665_vm11, %v5535_v56 }
 0x991   :  { %v2602_v58 = vpop.f32.mrf.mxu0 }
 0x992   :  { %v5808_v25 = vadd.f32 %v5805_v21, %v2602_v58 }
 0x994   :  { %6659 = vst [vmem:[#allocation18_spill] sm:$0xff] %v5808_v25  ;;  %2613 = vperm.xlu0 %3741, %v5808_v25   ;;  %2608 = vperm.xlu2 %3742, %v5808_v25  }
 0x9ee   :  { %v2609_v33 = vpop.permute.xlu2 %2608 }
 0x9ef   :  { %v2611_v17 = vsub.f32 %v5815_v59, %v2609_v33 }
 0x9f1   :  { %v2617_v55 = vmul.f32 %v2611_v17, %v2611_v17 }
 0xa06   :  { %v2614_v3 = vpop.permute.xlu0 %2613 }
 0xa07   :  { %v2616_v40 = vsub.f32 %v5821_v1, %v2614_v3 }
 0xa09   :  { %v2618_v60 = vmul.f32 %v2616_v40, %v2616_v40 }
 0xa0b   :  { %v2619_v44 = vadd.f32 %v2618_v60, %v2617_v55 }
 0xa0d   :  { %v2620_v12 = vsel %vm279_vm0, %v2619_v44, inf }
 0xa0e   :  { %2621 = vmin.xlane.f32.xlu1 %v2620_v12 }
 0xa81   :  { %v2622_v63 = vpop.xlane.xlu1 %2621 }
 0xa82   :  { %vm2623_vm6 = vcmp.le.f32.partialorder %v2619_v44, %v2622_v63 }
 0xa83   :  { %v2624_v9 = vsel %vm2623_vm6, %v6660_v11, 16 }
 0xa84   :  { %v2625_v50 = vsel %vm279_vm0, %v2624_v9, 2147483647 }
 0xa85   :  { %v2627_v19 = vshra.s32 %v2625_v50, 16  ;;  %v2626_v8 = vand.u32 65535, %v2625_v50 }
 0xa87   :  { %v2629_v14 = vcvt.s32.f32 %v2627_v19  ;;  %v2628_v5 = vcvt.s32.f32 %v2626_v8 }
 0xa89   :  { %2630 = vmin.xlane.f32.xlu2 %v2629_v14 }
 0xafc   :  { %v2631_v2 = vpop.xlane.xlu2 %2630 }
 0xafd   :  { %vm2632_vm7 = vcmp.eq.f32.partialorder %v2629_v14, %v2631_v2  ;;  %v2637_v23 = vcvt.f32.s32 %v2631_v2  ;;  %v5852_v2 = vld [vmem:[%s6219_s1] sm:$0xf] }
 0xafe   :  { %v2633_v0 = vsel %vm2632_vm7, %v2628_v5, inf }
 0xaff   :  { %2634 = vmin.xlane.f32.xlu0 %v2633_v0  ;;  %v2638_v28 = vshll.u32 %v2637_v23, 16 }
 0xb72   :  { %v2635_v53 = vpop.xlane.xlu0 %2634 }
 0xb73   :  { %v2636_v10 = vcvt.f32.s32 %v2635_v53 }
 0xb75   :  { %v2639_v7 = vadd.s32 %v2638_v28, %v2636_v10 }
 0xb77   :  { %vm2640_vm8 = vcmp.eq.s32.totalorder %v6660_v11, %v2639_v7  ;;  %v5864_v7 = vld [vmem:[#allocation2 + $0x1f0] sm:$0xff] }
 0xb78   :  { %v3687_v35 = vsel %vm2640_vm8, 1.0, %v6661_v54 }
 0xb79   :  { %v2655_v24 = vmul.f32 %v5832_v46, %v3687_v35  ;;  %v2651_v16 = vmul.f32 %v5838_v18, %v3687_v35  ;;  %v2647_v17 = vmul.f32 %v5821_v1, %v3687_v35  ;;  %v2643_v3 = vmul.f32 %v5815_v59, %v3687_v35  ;;  %v5870_v35 = vld [vmem:[#allocation2 + $0x1d0] sm:$0xff] }
 0xb7b   :  { %v2656_v58 = vsel %vm279_vm0, %v2655_v24, 0.0  ;;  %v2652_v33 = vsel %vm279_vm0, %v2651_v16, 0.0  ;;  %v2648_v40 = vsel %vm279_vm0, %v2647_v17, 0.0  ;;  %v2644_v55 = vsel %vm279_vm0, %v2643_v3, 0.0  ;;  %v5874_v24 = vld [vmem:[#allocation2 + $0x1b0] sm:$0xff] }
 0xb7c   :  { %2657 = vadd.xlane.f32.xlu1 %v2656_v58  ;;  %2653 = vadd.xlane.f32.xlu2 %v2652_v33  ;;  %v5878_v16 = vld [vmem:[#allocation2 + $0x190] sm:$0xff] }
 0xb7d   :  { %v5890_v58 = vld [vmem:[#allocation2 + $0x150] sm:$0xff] }
 0xb7e   :  { %v5894_v33 = vld [vmem:[#allocation2 + $0x130] sm:$0xff] }
 0xb7f   :  { %v5898_v17 = vld [vmem:[#allocation2 + $0x110] sm:$0xff] }
 0xb80   :  { %v5902_v3 = vld [vmem:[#allocation2 + $0xf0] sm:$0xff] }
 0xb84   :  { %2649 = vadd.xlane.f32.xlu1 %v2648_v40  ;;  %2645 = vadd.xlane.f32.xlu2 %v2644_v55  ;;  %v5906_v40 = vld [vmem:[#allocation2 + $0xd0] sm:$0xff] }
 0xb85   :  { %v5910_v55 = vld [vmem:[#allocation2 + $0xb0] sm:$0xff] }
 0xbef   :  { %v2658_v60 = vpop.xlane.xlu1 %2657  ;;  %v2654_v44 = vpop.xlane.xlu2 %2653 }
 0xbf0   :  { %v2660_v12 = vsel %vm592_vm10, %v2654_v44, %v2658_v60  ;;  %v5914_v60 = vld [vmem:[#allocation2 + $0x90] sm:$0xff] }
 0xbf1   :  { %v2661_v63 = vmul.f32 0.5, %v2660_v12  ;;  %v5918_v44 = vld [vmem:[#allocation2 + $0x70] sm:$0xff] }
 0xbf2   :  { %6663 = vst [vmem:[#allocation20_spill] sm:$0xff] %v5918_v44  ;;  %v5922_v12 = vld [vmem:[#allocation2 + $0x50] sm:$0xff] }
 0xbf3   :  { %6664 = vst [vmem:[#allocation21_spill] sm:$0xff] %v5922_v12 }
 0xbf7   :  { %v2650_v9 = vpop.xlane.xlu1 %2649  ;;  %v2646_v50 = vpop.xlane.xlu2 %2645 }
 0xbf8   :  { %v2659_v19 = vsel %vm592_vm10, %v2646_v50, %v2650_v9  ;;  %v5930_v9 = vld [vmem:[#allocation2 + $0x10] sm:$0xff] }
 0xbf9   :  { %v2662_v14 = vsub.f32 %v2659_v19, %v2661_v63  ;;  %v2664_v8 = vadd.f32 %v2661_v63, %v2659_v19  ;;  %v5926_v63 = vld [vmem:[#allocation2 + $0x30] sm:$0xff]  ;;  %6666 = vst [vmem:[#allocation23_spill] sm:$0xff] %v5930_v9  ;;  %v6670_v19 = vld [vmem:[#allocation12_spill] sm:$0xff] }
 0xbfa   :  { %6665 = vst [vmem:[#allocation22_spill] sm:$0xff] %v5926_v63  ;;  %v6669_v50 = vld [vmem:[#allocation11_spill] sm:$0xff] }
 0xbfb   :  { %v2665_v5 = vsub.f32 %v2664_v8, %v5852_v2  ;;  %v2663_v0 = vsub.f32 %v2662_v14, %v5852_v2  ;;  %v6671_v14 = vld [vmem:[#allocation13_spill] sm:$0xff]  ;;  %v6672_v8 = vld [vmem:[#allocation14_spill] sm:$0xff] }
 0xbfd   :  { %2671 = vrot.lane.b32.xlu0 %v2665_v5, %s4119_s29  ;;  %2667 = vrot.lane.b32.xlu2 %v2663_v0, %s4120_s30  ;;  %v6673_v5 = vld [vmem:[#allocation15_spill] sm:$0xff]  ;;  %v6674_v0 = vld [vmem:[#allocation16_spill] sm:$0xff] }
 0xc57   :  { %v2668_v23 = vpop.permute.xlu2 %2667 }
 0xc58   :  { %v2674_v53 = vsel %vm657_vm12, %v5808_v25, %v2668_v23 }
 0xc6f   :  { %v2672_v28 = vpop.permute.xlu0 %2671 }
 0xc70   :  { %v2675_v10 = vsel %vm659_vm13, %v2674_v53, %v2672_v28 }
 0xc71   :  { %3689 = vmatmul.msk.f32.vlgmr.msrb.gmra.mxu1 %vm661_vm14, %v2675_v10  ;;  %3691 = vmatmul.msk.f32.vlgmr.msra.gmra.mxu2 %vm661_vm14, %v2675_v10 }
 0xc72   :  { %3693 = vmatmul.msk.f32.vlgmr.msra.gmra.mxu3 %vm661_vm14, %v2675_v10  ;;  %2799 = vmatpush.msrb.mxu1 %v5864_v7 }
 0xc73   :  { %2906 = vmatpush.msra.mxu2 %v5548_v41  ;;  %3700 = vmatpush.msk.msra.mxu3 %vm665_vm11, %v5535_v56  ;;  %v5884_v56 = vld [vmem:[#allocation2 + $0x170] sm:$0xff] }
 0xc74   :  { %2800 = vmatpush.msrb.mxu1 %v5870_v35 }
 0xc75   :  { %2907 = vmatpush.msra.mxu2 %v5553_v32 }
 0xc76   :  { %2801 = vmatpush.msrb.mxu1 %v5874_v24 }
 0xc77   :  { %2908 = vmatpush.msra.mxu2 %v5559_v48 }
 0xc78   :  { %2802 = vmatpush.msrb.mxu1 %v5878_v16 }
 0xc79   :  { %3695 = vmatmul.msk.f32.vlgmr.msra.gmra.mxu1 %vm661_vm14, %v2675_v10  ;;  %2775 = vmatmul.f32.vlgmr.msrb.gmra.mxu2 %v5786_v57  ;;  %v2836_v10 = vpop.f32.mrf.mxu0 }
 0xc7a   :  { %2795 = vmatmul.f32.vlgmr.msrb.gmra.mxu3 %v5786_v57  ;;  %2803 = vmatpush.msrb.mxu1 %v5884_v56 }
 0xc7b   :  { %2909 = vmatpush.msra.mxu2 %v5567_v39  ;;  %3704 = vmatpush.msk.msrb.mxu3 %vm665_vm11, %v5528_v13 }
 0xc7c   :  { %2804 = vmatpush.msrb.mxu1 %v5890_v58 }
 0xc7d   :  { %2910 = vmatpush.msra.mxu2 %v5573_v61 }
 0xc7e   :  { %2805 = vmatpush.msrb.mxu1 %v5894_v33 }
 0xc7f   :  { %2911 = vmatpush.msra.mxu2 %v5663_v29 }
 0xc80   :  { %2806 = vmatpush.msrb.mxu1 %v5898_v17 }
 0xc81   :  { %2912 = vmatpush.msra.mxu2 %v5669_v30 }
 0xc82   :  { %2807 = vmatpush.msrb.mxu1 %v5902_v3 }
 0xc83   :  { %2913 = vmatpush.msra.mxu2 %v5675_v36 }
 0xc84   :  { %2808 = vmatpush.msrb.mxu1 %v5906_v40 }
 0xc85   :  { %2914 = vmatpush.msra.mxu2 %v5681_v37 }
 0xc86   :  { %2809 = vmatpush.msrb.mxu1 %v5910_v55 }
 0xc87   :  { %2915 = vmatpush.msra.mxu2 %v5687_v22 }
 0xc88   :  { %2810 = vmatpush.msrb.mxu1 %v5914_v60 }
 0xc89   :  { %2916 = vmatpush.msra.mxu2 %v5693_v38 }
 0xc8a   :  { %2811 = vmatpush.msrb.mxu1 %v5918_v44 }
 0xc8b   :  { %2917 = vmatpush.msra.mxu2 %v5699_v15 }
 0xc8c   :  { %2812 = vmatpush.msrb.mxu1 %v5922_v12 }
 0xc8d   :  { %2918 = vmatpush.msra.mxu2 %v5705_v49 }
 0xc8e   :  { %2813 = vmatpush.msrb.mxu1 %v5926_v63 }
 0xc8f   :  { %2919 = vmatpush.msra.mxu2 %v5711_v20 }
 0xc90   :  { %2814 = vmatpush.msrb.mxu1 %v5930_v9 }
 0xc91   :  { %2815 = vmatmul.f32.vlgmr.msrb.gmra.mxu1 %v5786_v57  ;;  %2920 = vmatpush.msra.mxu2 %v5717_v43  ;;  %v6668_v57 = vld [vmem:[#allocation10_spill] sm:$0xff] }
 0xc92   :  { %3702 = vmatpush.msk.msra.mxu1 %vm665_vm11, %v5521_v6  ;;  %v6667_v6 = vld [vmem:[#allocation9_spill] sm:$0xff] }
 0xc93   :  { %2921 = vmatpush.msra.mxu2 %v5723_v42 }
 0xc94   :  { %3706 = vmatpush.msk.msrb.mxu1 %vm665_vm11, %v5590_v34 }
 0xc95   :  { %3140 = vmatpush.msrb.mxu2 %v5726_v27 }
 0xc97   :  { %3141 = vmatpush.msrb.mxu2 %v5729_v47 }
 0xc99   :  { %3142 = vmatpush.msrb.mxu2 %v5732_v26 }
 0xc9b   :  { %3143 = vmatpush.msrb.mxu2 %v5735_v62  ;;  %v6677_v62 = vld [vmem:[#allocation58_spill] sm:$0xff] }
 0xc9d   :  { %3144 = vmatpush.msrb.mxu2 %v5742_v4  ;;  %v6676_v4 = vld [vmem:[#allocation57_spill] sm:$0xff] }
 0xc9f   :  { %3145 = vmatpush.msrb.mxu2 %v5745_v51 }
 0xca1   :  { %3146 = vmatpush.msrb.mxu2 %v5748_v31 }
 0xca3   :  { %3147 = vmatpush.msrb.mxu2 %v5751_v45  ;;  %v6675_v45 = vld [vmem:[#allocation61_spill] sm:$0xff] }
 0xca5   :  { %3148 = vmatpush.msrb.mxu2 %v6667_v6 }
 0xca7   :  { %3149 = vmatpush.msrb.mxu2 %v6668_v57 }
 0xca9   :  { %3150 = vmatpush.msrb.mxu2 %v6669_v50 }
 0xcab   :  { %3151 = vmatpush.msrb.mxu2 %v6670_v19 }
 0xcad   :  { %3152 = vmatpush.msrb.mxu2 %v6671_v14 }
 0xcaf   :  { %3153 = vmatpush.msrb.mxu2 %v6672_v8 }
 0xcb1   :  { %3154 = vmatpush.msrb.mxu2 %v6673_v5 }
 0xcb3   :  { %3155 = vmatpush.msrb.mxu2 %v6674_v0 }
 0xcee   :  { %v2696_v23 = vpop.f32.mrf.mxu1 }
 0xcf4   :  { %v2716_v53 = vpop.f32.mrf.mxu2 }
 0xcf5   :  { %v2736_v28 = vpop.f32.mrf.mxu3 }
 0xcf6   :  { %v2756_v25 = vpop.f32.mrf.mxu1 }
 0xcf7   :  { %v2837_v6 = vadd.f32 %v2836_v10, %v2756_v25 }
 0xcf9   :  { %v2842_v57 = vadd.f32 %v2837_v6, %v6675_v45 }
 0xcfb   :  { %v3698_v31 = vmul.f32 -1.442695, %v2842_v57 }
 0xcfc   :  { %v2776_v50 = vpop.f32.mrf.mxu2 }
 0xcfd   :  { %v2777_v51 = vadd.f32 %v2776_v50, %v2696_v23  ;;  %v2796_v19 = vpop.f32.mrf.mxu3  ;;  %3874 = vpow2.f32 %v3698_v31 }
 0xcfe   :  { %v2797_v14 = vadd.f32 %v2796_v19, %v2716_v53 }
 0xcff   :  { %v2839_v8 = vadd.f32 %v2777_v51, %v6676_v4  ;;  %v6678_v51 = vld [vmem:[#allocation63_spill] sm:$0xff] }
 0xd00   :  { %v2840_v5 = vadd.f32 %v2797_v14, %v6677_v62 }
 0xd01   :  { %v3696_v26 = vmul.f32 -1.442695, %v2839_v8 }
 0xd02   :  { %v3697_v0 = vmul.f32 -1.442695, %v2840_v5 }
 0xd03   :  { %3876 = vpow2.f32 %v3696_v26  ;;  %v3875_v47 = vpop.eup %3874 }
 0xd04   :  { %3878 = vpow2.f32 %v3697_v0  ;;  %v2885_v27 = vadd.f32 1.0, %v3875_v47 }
 0xd06   :  { %3880 = vrcp.f32 %v2885_v27  ;;  %vm2891_vm8 = vweird.f32 %v2885_v27 }
 0xd09   :  { %v3877_v34 = vpop.eup %3876 }
 0xd0a   :  { %v3879_v25 = vpop.eup %3878  ;;  %v2846_v10 = vadd.f32 1.0, %v3877_v34 }
 0xd0b   :  { %v2865_v6 = vadd.f32 1.0, %v3879_v25 }
 0xd0c   :  { %3882 = vrcp.f32 %v2846_v10  ;;  %v3881_v50 = vpop.eup %3880  ;;  %v2858_v47 = vand.u32 2147483648, %v2846_v10  ;;  %v2856_v25 = vand.u32 2147483647, %v2846_v10  ;;  %vm2852_vm1 = vweird.f32 %v2846_v10 }
 0xd0d   :  { %3884 = vrcp.f32 %v2865_v6  ;;  %v2887_v26 = vmul.f32 %v3881_v50, %v2885_v27  ;;  %v2877_v4 = vand.u32 2147483648, %v2865_v6  ;;  %v2875_v62 = vand.u32 2147483647, %v2865_v6 }
 0xd0e   :  { %v2816_v57 = vpop.f32.mrf.mxu1  ;;  %vm2871_vm2 = vweird.f32 %v2865_v6  ;;  %vm2857_vm5 = vcmp.eq.f32.partialorder %v2856_v25, 8.507059e+37  ;;  %vm2892_vm7 = vweird.f32 %v3881_v50  ;;  %v6688_v25 = vld [vmem:[#allocation42_spill] sm:$0xff] }
 0xd0f   :  { %v2817_v31 = vadd.f32 %v2816_v57, %v2736_v28  ;;  %v2888_v28 = vsub.f32 1.0, %v2887_v26  ;;  %v2878_v9 = vor.u32 1.1754944e-38, %v2877_v4  ;;  %vm2876_vm6 = vcmp.eq.f32.partialorder %v2875_v62, 8.507059e+37 }
 0xd10   :  { %v2895_v4 = vand.u32 2147483647, %v2885_v27 }
 0xd11   :  { %v2841_v23 = vadd.f32 %v2817_v31, %v6678_v51  ;;  %v2859_v31 = vor.u32 1.1754944e-38, %v2858_v47  ;;  %v6686_v47 = vld [vmem:[#allocation39_spill] sm:$0xff] }
 0xd12   :  { %v3883_v19 = vpop.eup %3882 }
 0xd13   :  { %v3885_v14 = vpop.eup %3884  ;;  %v2848_v8 = vmul.f32 %v3883_v19, %v2846_v10  ;;  %3886 = vtanh.f32 %v2841_v23  ;;  %vm2853_vm9 = vweird.f32 %v3883_v19 }
 0xd14   :  { %v2867_v5 = vmul.f32 %v3885_v14, %v2865_v6  ;;  %vm2872_vm15 = vweird.f32 %v3885_v14  ;;  %vm2854_vm3 = vmor %vm2852_vm1, %vm2853_vm9  ;;  %v2897_v6 = vand.u32 2147483648, %v2885_v27  ;;  %v6681_v27 = vld [vmem:[#allocation31_spill] sm:$0xff] }
 0xd15   :  { %v2849_v53 = vsub.f32 1.0, %v2848_v8  ;;  %vm2873_vm4 = vmor %vm2871_vm2, %vm2872_vm15  ;;  %vm2896_vm15 = vcmp.eq.f32.partialorder %v2895_v4, 8.507059e+37 }
 0xd16   :  { %v2868_v0 = vsub.f32 1.0, %v2867_v5  ;;  %vm2893_vm9 = vmor %vm2891_vm8, %vm2892_vm7 }
 0xd17   :  { %v2850_v34 = vmul.f32 %v3883_v19, %v2849_v53  ;;  %v2889_v53 = vmul.f32 %v3881_v50, %v2888_v28  ;;  %v5984_v28 = vld [vmem:[#allocation2 + $0x80] sm:$0xff] }
 0xd18   :  { %v2869_v45 = vmul.f32 %v3885_v14, %v2868_v0 }
 0xd19   :  { %v2851_v57 = vadd.f32 %v3883_v19, %v2850_v34  ;;  %v3887_v5 = vpop.eup %3886  ;;  %v2890_v10 = vadd.f32 %v3881_v50, %v2889_v53  ;;  %v6687_v34 = vld [vmem:[#allocation40_spill] sm:$0xff] }
 0xd1a   :  { %v2870_v51 = vadd.f32 %v3885_v14, %v2869_v45 }
 0xd1b   :  { %v2855_v8 = vsel %vm2854_vm3, %v3883_v19, %v2851_v57  ;;  %v2894_v45 = vsel %vm2893_vm9, %v3881_v50, %v2890_v10  ;;  %v2898_v19 = vor.u32 1.1754944e-38, %v2897_v6  ;;  %v6685_v50 = vld [vmem:[#allocation41_spill] sm:$0xff] }
 0xd1c   :  { %v2860_v23 = vsel %vm2857_vm5, %v2859_v31, %v2855_v8  ;;  %v2874_v63 = vsel %vm2873_vm4, %v3885_v14, %v2870_v51  ;;  %v5987_v57 = vld [vmem:[#allocation2 + $0x60] sm:$0xff] }
 0xd1d   :  { %v2879_v12 = vsel %vm2876_vm6, %v2878_v9, %v2874_v63  ;;  %v2902_v0 = vmul.f32 %v3887_v5, %v2860_v23  ;;  %v2899_v62 = vsel %vm2896_vm15, %v2898_v19, %v2894_v45  ;;  %v6683_v63 = vld [vmem:[#allocation37_spill] sm:$0xff]  ;;  %v6684_v9 = vld [vmem:[#allocation38_spill] sm:$0xff] }
 0xd1e   :  { %v2901_v44 = vmul.f32 %v2879_v12, %v5783_v52  ;;  %v6679_v52 = vld [vmem:[#allocation35_spill] sm:$0xff]  ;;  %v6682_v12 = vld [vmem:[#allocation36_spill] sm:$0xff]  ;;  %v5990_v31 = vld [vmem:[#allocation2 + $0x40] sm:$0xff] }
 0xd1f   :  { %v5993_v8 = vld [vmem:[#allocation2 + $0x20] sm:$0xff] }
 0xd20   :  { %v5961_v26 = vadd.f32 %v2902_v0, %v2901_v44  ;;  %v6680_v44 = vld [vmem:[#allocation30_spill] sm:$0xff]  ;;  %v5996_v5 = vld [vmem:[#allocation2] sm:$0xff] }
 0xd22   :  { %3888 = vtanh.f32 %v5961_v26 }
 0xd28   :  { %v3889_v51 = vpop.eup %3888 }
 0xd29   :  { %v5964_v14 = vmul.f32 %v3889_v51, %v2899_v62 }
 0xd2b   :  { %2922 = vmatmul.f32.vlgmr.msra.gmra.mxu2 %v5964_v14  ;;  %3116 = vmatmul.f32.vlgmr.msrb.gmra.mxu0 %v5964_v14 }
 0xd2c   :  { %3401 = vmatpush.msra.mxu2 %v6679_v52  ;;  %3716 = vmatpush.msk.msrb.mxu0 %vm665_vm11, %v5528_v13  ;;  %v5981_v13 = vld [vmem:[#allocation2 + $0xa0] sm:$0xff] }
 0xd2e   :  { %3402 = vmatpush.msra.mxu2 %v6680_v44 }
 0xd30   :  { %3403 = vmatpush.msra.mxu2 %v6681_v27 }
 0xd32   :  { %3404 = vmatpush.msra.mxu2 %v6682_v12 }
 0xd33   :  { %3156 = vmatmul.f32.vlgmr.msrb.gmra.mxu2 %v5964_v14 }
 0xd34   :  { %3405 = vmatpush.msra.mxu2 %v6683_v63 }
 0xd36   :  { %3406 = vmatpush.msra.mxu2 %v6684_v9 }
 0xd38   :  { %3407 = vmatpush.msra.mxu2 %v6685_v50 }
 0xd3a   :  { %3408 = vmatpush.msra.mxu2 %v6686_v47 }
 0xd3c   :  { %3409 = vmatpush.msra.mxu2 %v6687_v34 }
 0xd3e   :  { %3410 = vmatpush.msra.mxu2 %v6688_v25 }
 0xd40   :  { %3411 = vmatpush.msra.mxu2 %v5981_v13 }
 0xd42   :  { %3412 = vmatpush.msra.mxu2 %v5984_v28 }
 0xd44   :  { %3413 = vmatpush.msra.mxu2 %v5987_v57 }
 0xd46   :  { %3414 = vmatpush.msra.mxu2 %v5990_v31 }
 0xd48   :  { %3415 = vmatpush.msra.mxu2 %v5993_v8 }
 0xd4a   :  { %3416 = vmatpush.msra.mxu2 %v5996_v5 }
 0xd4c   :  { %3548 = vmatpush.msrb.mxu2 %v5548_v41 }
 0xd4e   :  { %3549 = vmatpush.msrb.mxu2 %v5553_v32 }
 0xd50   :  { %3550 = vmatpush.msrb.mxu2 %v5559_v48 }
 0xd52   :  { %3551 = vmatpush.msrb.mxu2 %v5567_v39 }
 0xd54   :  { %3552 = vmatpush.msrb.mxu2 %v5573_v61 }
 0xd56   :  { %3553 = vmatpush.msrb.mxu2 %v5663_v29 }
 0xd58   :  { %3554 = vmatpush.msrb.mxu2 %v5669_v30 }
 0xd5a   :  { %3555 = vmatpush.msrb.mxu2 %v5675_v36 }
 0xd5c   :  { %3556 = vmatpush.msrb.mxu2 %v5681_v37 }
 0xd5e   :  { %3557 = vmatpush.msrb.mxu2 %v5687_v22 }
 0xd60   :  { %3558 = vmatpush.msrb.mxu2 %v5693_v38 }
 0xd62   :  { %3559 = vmatpush.msrb.mxu2 %v5699_v15 }
 0xd64   :  { %3560 = vmatpush.msrb.mxu2 %v5705_v49 }
 0xd66   :  { %3561 = vmatpush.msrb.mxu2 %v5711_v20 }
 0xd68   :  { %3562 = vmatpush.msrb.mxu2 %v5717_v43 }
 0xd6a   :  { %3563 = vmatpush.msrb.mxu2 %v5723_v42 }
 0xdae   :  { %v2923_v41 = vpop.f32.mrf.mxu2 }
 0xdaf   :  { %v6016_v32 = vadd.f32 %v5805_v21, %v2923_v41 }
 0xdb1   :  { %2934 = vperm.xlu0 %3741, %v6016_v32   ;;  %2929 = vperm.xlu1 %3744, %v6016_v32  }
 0xe23   :  { %v2935_v48 = vpop.permute.xlu0 %2934  ;;  %v2930_v39 = vpop.permute.xlu1 %2929 }
 0xe24   :  { %v2937_v61 = vsub.f32 %v5821_v1, %v2935_v48  ;;  %v2932_v23 = vsub.f32 %v5815_v59, %v2930_v39 }
 0xe26   :  { %v2939_v53 = vmul.f32 %v2937_v61, %v2937_v61  ;;  %v2938_v0 = vmul.f32 %v2932_v23, %v2932_v23 }
 0xe28   :  { %v2940_v10 = vadd.f32 %v2939_v53, %v2938_v0 }
 0xe2a   :  { %v2941_v6 = vsel %vm279_vm0, %v2940_v10, inf }
 0xe2b   :  { %2942 = vmin.xlane.f32.xlu2 %v2941_v6 }
 0xe9e   :  { %v2943_v4 = vpop.xlane.xlu2 %2942 }
 0xe9f   :  { %vm2944_vm1 = vcmp.le.f32.partialorder %v2940_v10, %v2943_v4 }
 0xea0   :  { %v2945_v45 = vsel %vm2944_vm1, %v6660_v11, 16 }
 0xea1   :  { %v2946_v19 = vsel %vm279_vm0, %v2945_v45, 2147483647 }
 0xea2   :  { %v2948_v51 = vshra.s32 %v2946_v19, 16  ;;  %v2947_v41 = vand.u32 65535, %v2946_v19 }
 0xea4   :  { %v2950_v62 = vcvt.s32.f32 %v2948_v51  ;;  %v2949_v48 = vcvt.s32.f32 %v2947_v41 }
 0xea6   :  { %2951 = vmin.xlane.f32.xlu1 %v2950_v62 }
 0xf19   :  { %v2952_v21 = vpop.xlane.xlu1 %2951 }
 0xf1a   :  { %vm2953_vm2 = vcmp.eq.f32.partialorder %v2950_v62, %v2952_v21  ;;  %v2958_v61 = vcvt.f32.s32 %v2952_v21 }
 0xf1b   :  { %v2954_v39 = vsel %vm2953_vm2, %v2949_v48, inf }
 0xf1c   :  { %2955 = vmin.xlane.f32.xlu0 %v2954_v39  ;;  %v2959_v53 = vshll.u32 %v2958_v61, 16 }
 0xf8f   :  { %v2956_v23 = vpop.xlane.xlu0 %2955 }
 0xf90   :  { %v2957_v0 = vcvt.f32.s32 %v2956_v23 }
 0xf92   :  { %v2960_v6 = vadd.s32 %v2959_v53, %v2957_v0 }
 0xf94   :  { %vm2961_vm3 = vcmp.eq.s32.totalorder %v6660_v11, %v2960_v6 }
 0xf95   :  { %v3699_v10 = vsel %vm2961_vm3, 1.0, %v6661_v54 }
 0xf96   :  { %v2976_v4 = vmul.f32 %v5832_v46, %v3699_v10  ;;  %v2972_v45 = vmul.f32 %v5838_v18, %v3699_v10  ;;  %v2964_v19 = vmul.f32 %v5815_v59, %v3699_v10  ;;  %v2968_v41 = vmul.f32 %v5821_v1, %v3699_v10 }
 0xf98   :  { %v2977_v51 = vsel %vm279_vm0, %v2976_v4, 0.0  ;;  %v2973_v62 = vsel %vm279_vm0, %v2972_v45, 0.0  ;;  %v2965_v21 = vsel %vm279_vm0, %v2964_v19, 0.0  ;;  %v2969_v48 = vsel %vm279_vm0, %v2968_v41, 0.0 }
 0xf99   :  { %2978 = vadd.xlane.f32.xlu1 %v2977_v51  ;;  %2974 = vadd.xlane.f32.xlu2 %v2973_v62 }
 0xf9a   :  { %2966 = vadd.xlane.f32.xlu0 %v2965_v21 }
 0xfa1   :  { %2970 = vadd.xlane.f32.xlu2 %v2969_v48 }
0x100c   :  { %v2975_v39 = vpop.xlane.xlu2 %2974  ;;  %v2979_v61 = vpop.xlane.xlu1 %2978 }
0x100d   :  { %v2981_v23 = vsel %vm592_vm10, %v2975_v39, %v2979_v61  ;;  %v2967_v0 = vpop.xlane.xlu0 %2966  ;;  %v6710_v39 = vld [vmem:[#allocation58_spill] sm:$0xff] }
0x100e   :  { %v2982_v53 = vmul.f32 0.5, %v2981_v23 }
0x1014   :  { %v2971_v6 = vpop.xlane.xlu2 %2970 }
0x1015   :  { %v2980_v4 = vsel %vm592_vm10, %v2967_v0, %v2971_v6  ;;  %v3157_v6 = vpop.f32.mrf.mxu2 }
0x1016   :  { %v2983_v45 = vsub.f32 %v2980_v4, %v2982_v53  ;;  %v2985_v18 = vadd.f32 %v2982_v53, %v2980_v4 }
0x1018   :  { %v2986_v19 = vsub.f32 %v2985_v18, %v5852_v2  ;;  %v2984_v51 = vsub.f32 %v2983_v45, %v5852_v2  ;;  %v6689_v18 = vld [vmem:[#allocation20_spill] sm:$0xff] }
0x101a   :  { %2992 = vrot.lane.b32.xlu0 %v2986_v19, %s4119_s29  ;;  %2988 = vrot.lane.b32.xlu1 %v2984_v51, %s4120_s30  ;;  %v6711_v19 = vld [vmem:[#allocation61_spill] sm:$0xff] }
0x108c   :  { %v2993_v10 = vpop.permute.xlu0 %2992  ;;  %v2989_v62 = vpop.permute.xlu1 %2988 }
0x108d   :  { %v2995_v21 = vsel %vm657_vm12, %v6016_v32, %v2989_v62 }
0x108e   :  { %v2996_v41 = vsel %vm659_vm13, %v2995_v21, %v2993_v10 }
0x108f   :  { %3701 = vmatmul.msk.f32.vlgmr.msra.gmra.mxu3 %vm661_vm14, %v2996_v41  ;;  %3703 = vmatmul.msk.f32.vlgmr.msra.gmra.mxu1 %vm661_vm14, %v2996_v41 }
0x1090   :  { %3080 = vmatpush.msra.mxu3 %v6679_v52  ;;  %3120 = vmatpush.msra.mxu1 %v5864_v7  ;;  %v6690_v52 = vld [vmem:[#allocation21_spill] sm:$0xff] }
0x1092   :  { %3081 = vmatpush.msra.mxu3 %v6680_v44  ;;  %3121 = vmatpush.msra.mxu1 %v5870_v35  ;;  %v6691_v44 = vld [vmem:[#allocation22_spill] sm:$0xff] }
0x1094   :  { %3082 = vmatpush.msra.mxu3 %v6681_v27  ;;  %3122 = vmatpush.msra.mxu1 %v5874_v24  ;;  %v6692_v27 = vld [vmem:[#allocation23_spill] sm:$0xff] }
0x1096   :  { %3083 = vmatpush.msra.mxu3 %v6682_v12  ;;  %3123 = vmatpush.msra.mxu1 %v5878_v16  ;;  %v4063_v12 = vld [vmem:[%s6227_s9 + $0x78] sm:$0xff] }
0x1097   :  { %3705 = vmatmul.msk.f32.vlgmr.msrb.gmra.mxu3 %vm661_vm14, %v2996_v41  ;;  %3707 = vmatmul.msk.f32.vlgmr.msrb.gmra.mxu1 %vm661_vm14, %v2996_v41 }
0x1098   :  { %3084 = vmatpush.msra.mxu3 %v6683_v63  ;;  %3124 = vmatpush.msra.mxu1 %v5884_v56  ;;  %v4064_v63 = vld [vmem:[%s6225_s7 + $0x8] sm:$0x3f] }
0x109a   :  { %3085 = vmatpush.msra.mxu3 %v6684_v9  ;;  %3125 = vmatpush.msra.mxu1 %v5890_v58  ;;  %v6693_v9 = vld [vmem:[#allocation34_spill] sm:$0xff] }
0x109c   :  { %3086 = vmatpush.msra.mxu3 %v6685_v50  ;;  %3126 = vmatpush.msra.mxu1 %v5894_v33  ;;  %v4065_v50 = vld [vmem:[%s6227_s9 + $0x70] sm:$0xff] }
0x109e   :  { %3087 = vmatpush.msra.mxu3 %v6686_v47  ;;  %3127 = vmatpush.msra.mxu1 %v5898_v17  ;;  %v4067_v47 = vld [vmem:[%s6227_s9 + $0x60] sm:$0xff] }
0x10a0   :  { %3088 = vmatpush.msra.mxu3 %v6687_v34  ;;  %3128 = vmatpush.msra.mxu1 %v5902_v3  ;;  %v4068_v34 = vld [vmem:[%s6227_s9 + $0x58] sm:$0xff] }
0x10a2   :  { %3089 = vmatpush.msra.mxu3 %v6688_v25  ;;  %3129 = vmatpush.msra.mxu1 %v5906_v40  ;;  %v6705_v25 = vld [vmem:[#allocation12_spill] sm:$0xff] }
0x10a4   :  { %3090 = vmatpush.msra.mxu3 %v5981_v13  ;;  %3130 = vmatpush.msra.mxu1 %v5910_v55  ;;  %v6706_v13 = vld [vmem:[#allocation13_spill] sm:$0xff] }
0x10a6   :  { %3091 = vmatpush.msra.mxu3 %v5984_v28  ;;  %3131 = vmatpush.msra.mxu1 %v5914_v60  ;;  %v6707_v28 = vld [vmem:[#allocation14_spill] sm:$0xff] }
0x10a8   :  { %3092 = vmatpush.msra.mxu3 %v5987_v57  ;;  %3132 = vmatpush.msra.mxu1 %v6689_v18  ;;  %v6708_v57 = vld [vmem:[#allocation15_spill] sm:$0xff] }
0x10aa   :  { %3093 = vmatpush.msra.mxu3 %v5990_v31  ;;  %3133 = vmatpush.msra.mxu1 %v6690_v52  ;;  %v6709_v31 = vld [vmem:[#allocation16_spill] sm:$0xff] }
0x10ac   :  { %3094 = vmatpush.msra.mxu3 %v5993_v8  ;;  %3134 = vmatpush.msra.mxu1 %v6691_v44 }
0x10ae   :  { %3095 = vmatpush.msra.mxu3 %v5996_v5  ;;  %3135 = vmatpush.msra.mxu1 %v6692_v27  ;;  %v3117_v5 = vpop.f32.mrf.mxu0 }
0x10af   :  { %3096 = vmatmul.f32.vlgmr.msra.gmra.mxu3 %v5964_v14  ;;  %3136 = vmatmul.f32.vlgmr.msra.gmra.mxu1 %v5964_v14  ;;  %v4066_v14 = vld [vmem:[%s6227_s9 + $0x68] sm:$0xff] }
0x10b0   :  { %3227 = vmatpush.msrb.mxu3 %v4063_v12  ;;  %3714 = vmatpush.msk.msrb.mxu1 %vm665_vm11, %v4064_v63  ;;  %v6712_v63 = vld [vmem:[#allocation57_spill] sm:$0xff] }
0x10b2   :  { %3718 = vmatpush.msk.msra.mxu1 %vm665_vm11, %v6693_v9  ;;  %3228 = vmatpush.msrb.mxu3 %v4065_v50 }
0x10b4   :  { %3229 = vmatpush.msrb.mxu3 %v4066_v14 }
0x10b6   :  { %3230 = vmatpush.msrb.mxu3 %v4067_v47 }
0x10b8   :  { %3231 = vmatpush.msrb.mxu3 %v4068_v34 }
0x10ba   :  { %3232 = vmatpush.msrb.mxu3 %v5663_v29  ;;  %v6694_v29 = vld [vmem:[#allocation45_spill] sm:$0xff] }
0x10bc   :  { %3233 = vmatpush.msrb.mxu3 %v5669_v30  ;;  %v6695_v30 = vld [vmem:[#allocation43_spill] sm:$0xff] }
0x10be   :  { %3234 = vmatpush.msrb.mxu3 %v5675_v36  ;;  %v6696_v36 = vld [vmem:[#allocation44_spill] sm:$0xff] }
0x10c0   :  { %3235 = vmatpush.msrb.mxu3 %v5681_v37  ;;  %v6697_v37 = vld [vmem:[#allocation46_spill] sm:$0xff] }
0x10c2   :  { %3236 = vmatpush.msrb.mxu3 %v5687_v22  ;;  %v6698_v22 = vld [vmem:[#allocation49_spill] sm:$0xff] }
0x10c4   :  { %3237 = vmatpush.msrb.mxu3 %v5693_v38  ;;  %v6699_v38 = vld [vmem:[#allocation6_spill] sm:$0xff] }
0x10c6   :  { %3238 = vmatpush.msrb.mxu3 %v5699_v15  ;;  %v6700_v15 = vld [vmem:[#allocation7_spill] sm:$0xff] }
0x10c8   :  { %3239 = vmatpush.msrb.mxu3 %v5705_v49  ;;  %v6701_v49 = vld [vmem:[#allocation8_spill] sm:$0xff] }
0x10ca   :  { %3240 = vmatpush.msrb.mxu3 %v5711_v20  ;;  %v6702_v20 = vld [vmem:[#allocation9_spill] sm:$0xff] }
0x10cc   :  { %3241 = vmatpush.msrb.mxu3 %v5717_v43  ;;  %v6703_v43 = vld [vmem:[#allocation10_spill] sm:$0xff] }
0x10ce   :  { %3242 = vmatpush.msrb.mxu3 %v5723_v42  ;;  %v6704_v42 = vld [vmem:[#allocation11_spill] sm:$0xff] }
0x10d0   :  { %3461 = vmatpush.msra.mxu3 %v6694_v29 }
0x10d2   :  { %3462 = vmatpush.msra.mxu3 %v6695_v30 }
0x10d4   :  { %3463 = vmatpush.msra.mxu3 %v6696_v36 }
0x10d6   :  { %3464 = vmatpush.msra.mxu3 %v6697_v37 }
0x10d8   :  { %3465 = vmatpush.msra.mxu3 %v6698_v22 }
0x10da   :  { %3466 = vmatpush.msra.mxu3 %v6699_v38 }
0x10dc   :  { %3467 = vmatpush.msra.mxu3 %v6700_v15 }
0x10de   :  { %3468 = vmatpush.msra.mxu3 %v6701_v49 }
0x10e0   :  { %3469 = vmatpush.msra.mxu3 %v6702_v20 }
0x10e2   :  { %3470 = vmatpush.msra.mxu3 %v6703_v43  ;;  %v6713_v43 = vld [vmem:[#allocation63_spill] sm:$0xff] }
0x10e4   :  { %3471 = vmatpush.msra.mxu3 %v6704_v42 }
0x10e6   :  { %3472 = vmatpush.msra.mxu3 %v6705_v25 }
0x10e8   :  { %3473 = vmatpush.msra.mxu3 %v6706_v13 }
0x10ea   :  { %3474 = vmatpush.msra.mxu3 %v6707_v28 }
0x10ec   :  { %3475 = vmatpush.msra.mxu3 %v6708_v57 }
0x10ee   :  { %3476 = vmatpush.msra.mxu3 %v6709_v31 }
0x110c   :  { %v3037_v8 = vpop.f32.mrf.mxu1 }
0x110d   :  { %v3118_v48 = vadd.f32 %v3117_v5, %v3037_v8 }
0x110f   :  { %v3161_v61 = vadd.f32 %v3118_v48, %v6710_v39 }
0x1111   :  { %v3709_v53 = vmul.f32 -1.442695, %v3161_v61 }
0x1112   :  { %v3017_v23 = vpop.f32.mrf.mxu3 }
0x1113   :  { %3890 = vpow2.f32 %v3709_v53 }
0x1114   :  { %v3077_v0 = vpop.f32.mrf.mxu1 }
0x1115   :  { %v3158_v4 = vadd.f32 %v3157_v6, %v3077_v0 }
0x1117   :  { %v3163_v51 = vadd.f32 %v3158_v4, %v6711_v19 }
0x1119   :  { %v3891_v10 = vpop.eup %3890  ;;  %v3710_v62 = vmul.f32 -1.442695, %v3163_v51 }
0x111a   :  { %v3057_v45 = vpop.f32.mrf.mxu3  ;;  %v3186_v21 = vadd.f32 1.0, %v3891_v10 }
0x111b   :  { %3892 = vpow2.f32 %v3710_v62 }
0x111c   :  { %3894 = vrcp.f32 %v3186_v21  ;;  %v3198_v28 = vand.u32 2147483648, %v3186_v21  ;;  %vm3192_vm4 = vweird.f32 %v3186_v21  ;;  %v3196_v31 = vand.u32 2147483647, %v3186_v21 }
0x111e   :  { %v3199_v53 = vor.u32 1.1754944e-38, %v3198_v28  ;;  %vm3197_vm7 = vcmp.eq.f32.partialorder %v3196_v31, 8.507059e+37 }
0x1121   :  { %v3893_v14 = vpop.eup %3892 }
0x1122   :  { %v3895_v47 = vpop.eup %3894  ;;  %v3206_v29 = vadd.f32 1.0, %v3893_v14 }
0x1123   :  { %v3188_v34 = vmul.f32 %v3895_v47, %v3186_v21  ;;  %vm3193_vm11 = vweird.f32 %v3895_v47 }
0x1124   :  { %vm3194_vm5 = vmor %vm3192_vm4, %vm3193_vm11  ;;  %v3218_v14 = vand.u32 2147483648, %v3206_v29  ;;  %vm3212_vm2 = vweird.f32 %v3206_v29 }
0x1125   :  { %v3189_v37 = vsub.f32 1.0, %v3188_v34 }
0x1127   :  { %v3190_v15 = vmul.f32 %v3895_v47, %v3189_v37 }
0x1129   :  { %v3191_v25 = vadd.f32 %v3895_v47, %v3190_v15 }
0x112b   :  { %v3195_v48 = vsel %vm3194_vm5, %v3895_v47, %v3191_v25  ;;  %v3216_v47 = vand.u32 2147483647, %v3206_v29 }
0x112c   :  { %v3137_v22 = vpop.f32.mrf.mxu1  ;;  %v3200_v4 = vsel %vm3197_vm7, %v3199_v53, %v3195_v48 }
0x112d   :  { %v3138_v38 = vadd.f32 %v3137_v22, %v3057_v45  ;;  %vm3217_vm11 = vcmp.eq.f32.partialorder %v3216_v47, 8.507059e+37 }
0x112f   :  { %v3162_v42 = vadd.f32 %v3138_v38, %v6713_v43  ;;  %v6714_v38 = vld [vmem:[#allocation17_spill] sm:$0xff] }
0x1132   :  { %v3097_v41 = vpop.f32.mrf.mxu3 }
0x1133   :  { %v3098_v12 = vadd.f32 %v3097_v41, %v3017_v23  ;;  %v3222_v41 = vmul.f32 %v3200_v4, %v5961_v26 }
0x1135   :  { %v3160_v9 = vadd.f32 %v3098_v12, %v6712_v63 }
0x1137   :  { %v3708_v50 = vmul.f32 -1.442695, %v3160_v9 }
0x1139   :  { %3896 = vpow2.f32 %v3708_v50 }
0x113a   :  { %3898 = vrcp.f32 %v3206_v29 }
0x113f   :  { %v3897_v30 = vpop.eup %3896 }
0x1140   :  { %v3167_v36 = vadd.f32 1.0, %v3897_v30  ;;  %v3899_v49 = vpop.eup %3898  ;;  %v3219_v30 = vor.u32 1.1754944e-38, %v3218_v14 }
0x1141   :  { %v3208_v57 = vmul.f32 %v3899_v49, %v3206_v29  ;;  %vm3213_vm1 = vweird.f32 %v3899_v49 }
0x1142   :  { %3900 = vrcp.f32 %v3167_v36  ;;  %v3179_v5 = vand.u32 2147483648, %v3167_v36  ;;  %v3177_v23 = vand.u32 2147483647, %v3167_v36  ;;  %vm3173_vm8 = vweird.f32 %v3167_v36  ;;  %vm3214_vm3 = vmor %vm3212_vm2, %vm3213_vm1 }
0x1143   :  { %3902 = vtanh.f32 %v3162_v42  ;;  %v3209_v0 = vsub.f32 1.0, %v3208_v57 }
0x1144   :  { %v3180_v45 = vor.u32 1.1754944e-38, %v3179_v5  ;;  %vm3178_vm15 = vcmp.eq.f32.partialorder %v3177_v23, 8.507059e+37 }
0x1145   :  { %v3210_v62 = vmul.f32 %v3899_v49, %v3209_v0 }
0x1147   :  { %v3211_v50 = vadd.f32 %v3899_v49, %v3210_v62 }
0x1148   :  { %v3901_v20 = vpop.eup %3900 }
0x1149   :  { %v3169_v13 = vmul.f32 %v3901_v20, %v3167_v36  ;;  %vm3174_vm6 = vweird.f32 %v3901_v20  ;;  %v3903_v10 = vpop.eup %3902  ;;  %v3215_v34 = vsel %vm3214_vm3, %v3899_v49, %v3211_v50 }
0x114a   :  { %vm3175_vm9 = vmor %vm3173_vm8, %vm3174_vm6  ;;  %v3220_v37 = vsel %vm3217_vm11, %v3219_v30, %v3215_v34 }
0x114b   :  { %v3170_v8 = vsub.f32 1.0, %v3169_v13 }
0x114d   :  { %v3171_v61 = vmul.f32 %v3901_v20, %v3170_v8 }
0x114f   :  { %v3172_v6 = vadd.f32 %v3901_v20, %v3171_v61 }
0x1151   :  { %v3176_v51 = vsel %vm3175_vm9, %v3901_v20, %v3172_v6 }
0x1152   :  { %v3181_v21 = vsel %vm3178_vm15, %v3180_v45, %v3176_v51 }
0x1153   :  { %v3223_v12 = vmul.f32 %v3903_v10, %v3181_v21 }
0x1155   :  { %v6135_v9 = vadd.f32 %v3223_v12, %v3222_v41  ;;  %v6715_v12 = vld [vmem:[#allocation19_spill] sm:$0xff] }
0x1157   :  { %3904 = vtanh.f32 %v6135_v9 }
0x115d   :  { %v3905_v36 = vpop.eup %3904 }
0x115e   :  { %v6138_v22 = vmul.f32 %v3905_v36, %v3220_v37 }
0x1160   :  { %3243 = vmatmul.f32.vlgmr.msrb.gmra.mxu3 %v6138_v22  ;;  %3417 = vmatmul.f32.vlgmr.msra.gmra.mxu2 %v6138_v22 }
0x1168   :  { %3477 = vmatmul.f32.vlgmr.msra.gmra.mxu3 %v6138_v22 }
0x11e3   :  { %v3244_v26 = vpop.f32.mrf.mxu3 }
0x11e4   :  { %v6144_v15 = vadd.f32 %v6714_v38, %v3244_v26 }
0x11e6   :  { %3255 = vperm.xlu0 %3741, %v6144_v15   ;;  %3250 = vperm.xlu2 %3742, %v6144_v15  }
0x1240   :  { %v3251_v29 = vpop.permute.xlu2 %3250 }
0x1241   :  { %v3253_v49 = vsub.f32 %v5815_v59, %v3251_v29 }
0x1243   :  { %v3259_v25 = vmul.f32 %v3253_v49, %v3253_v49 }
0x1258   :  { %v3256_v20 = vpop.permute.xlu0 %3255 }
0x1259   :  { %v3258_v42 = vsub.f32 %v5821_v1, %v3256_v20 }
0x125b   :  { %v3260_v13 = vmul.f32 %v3258_v42, %v3258_v42 }
0x125d   :  { %v3261_v28 = vadd.f32 %v3260_v13, %v3259_v25 }
0x125f   :  { %v3262_v57 = vsel %vm279_vm0, %v3261_v28, inf }
0x1260   :  { %3263 = vmin.xlane.f32.xlu1 %v3262_v57 }
0x12d3   :  { %v3264_v31 = vpop.xlane.xlu1 %3263 }
0x12d4   :  { %vm3265_vm4 = vcmp.le.f32.partialorder %v3261_v28, %v3264_v31 }
0x12d5   :  { %v3266_v8 = vsel %vm3265_vm4, %v6660_v11, 16 }
0x12d6   :  { %v3267_v5 = vsel %vm279_vm0, %v3266_v8, 2147483647  ;;  %v4069_v8 = vld [vmem:[#allocation2 + $0x1e8] sm:$0xff] }
0x12d7   :  { %v3269_v48 = vshra.s32 %v3267_v5, 16  ;;  %v3268_v23 = vand.u32 65535, %v3267_v5  ;;  %v4070_v5 = vld [vmem:[#allocation2 + $0x1c8] sm:$0xff] }
0x12d9   :  { %v3271_v61 = vcvt.s32.f32 %v3269_v48  ;;  %v3270_v0 = vcvt.s32.f32 %v3268_v23  ;;  %v4073_v48 = vld [vmem:[#allocation2 + $0x168] sm:$0xff]  ;;  %v3418_v23 = vpop.f32.mrf.mxu2 }
0x12db   :  { %3272 = vmin.xlane.f32.xlu2 %v3271_v61 }
0x134e   :  { %v3273_v53 = vpop.xlane.xlu2 %3272 }
0x134f   :  { %vm3274_vm5 = vcmp.eq.f32.partialorder %v3271_v61, %v3273_v53  ;;  %v3279_v4 = vcvt.f32.s32 %v3273_v53  ;;  %v4078_v61 = vld [vmem:[#allocation2 + $0xc8] sm:$0xff] }
0x1350   :  { %v3275_v6 = vsel %vm3274_vm5, %v3270_v0, inf }
0x1351   :  { %3276 = vmin.xlane.f32.xlu0 %v3275_v6  ;;  %v3280_v51 = vshll.u32 %v3279_v4, 16  ;;  %v3478_v6 = vpop.f32.mrf.mxu3 }
0x13c4   :  { %v3277_v45 = vpop.xlane.xlu0 %3276 }
0x13c5   :  { %v3278_v10 = vcvt.f32.s32 %v3277_v45 }
0x13c7   :  { %v3281_v62 = vadd.s32 %v3280_v51, %v3278_v10 }
0x13c9   :  { %vm3282_vm6 = vcmp.eq.s32.totalorder %v6660_v11, %v3281_v62 }
0x13ca   :  { %v3711_v21 = vsel %vm3282_vm6, 1.0, %v6661_v54  ;;  %v2926_v54 = vadd.f32 %v5852_v2, %v6016_v32  ;;  %v3247_v32 = vadd.f32 %v5852_v2, %v6144_v15  ;;  %vm3584_vm6 = vcmask 60416  }
0x13cb   :  { %v3297_v41 = vmul.f32 %v5832_v46, %v3711_v21  ;;  %v3293_v50 = vmul.f32 %v6715_v12, %v3711_v21  ;;  %v3285_v14 = vmul.f32 %v5815_v59, %v3711_v21  ;;  %v3289_v36 = vmul.f32 %v5821_v1, %v3711_v21 }
0x13cd   :  { %v3298_v47 = vsel %vm279_vm0, %v3297_v41, 0.0  ;;  %v3294_v34 = vsel %vm279_vm0, %v3293_v50, 0.0  ;;  %v3286_v30 = vsel %vm279_vm0, %v3285_v14, 0.0  ;;  %v3290_v11 = vsel %vm279_vm0, %v3289_v36, 0.0 }
0x13ce   :  { %3299 = vadd.xlane.f32.xlu2 %v3298_v47  ;;  %3295 = vadd.xlane.f32.xlu1 %v3294_v34 }
0x13cf   :  { %3287 = vadd.xlane.f32.xlu0 %v3286_v30 }
0x13d6   :  { %3291 = vadd.xlane.f32.xlu1 %v3290_v11 }
0x13ef   :  { %3570 = vrot.lane.b32.xlu1 %v2926_v54, %s4120_s30 }
0x1441   :  { %v3296_v59 = vpop.xlane.xlu1 %3295  ;;  %v3300_v46 = vpop.xlane.xlu2 %3299 }
0x1442   :  { %v3302_v37 = vsel %vm592_vm10, %v3296_v59, %v3300_v46  ;;  %v3288_v38 = vpop.xlane.xlu0 %3287 }
0x1443   :  { %v3303_v26 = vmul.f32 0.5, %v3302_v37 }
0x1449   :  { %v3292_v29 = vpop.xlane.xlu1 %3291 }
0x144a   :  { %v3301_v49 = vsel %vm592_vm10, %v3288_v38, %v3292_v29 }
0x144b   :  { %v3304_v20 = vsub.f32 %v3301_v49, %v3303_v26  ;;  %v3306_v42 = vadd.f32 %v3303_v26, %v3301_v49 }
0x144d   :  { %v3307_v1 = vsub.f32 %v3306_v42, %v5852_v2  ;;  %v3305_v25 = vsub.f32 %v3304_v20, %v5852_v2  ;;  %v4071_v2 = vld [vmem:[#allocation2 + $0x1a8] sm:$0xff] }
0x144f   :  { %3313 = vrot.lane.b32.xlu0 %v3307_v1, %s4119_s29  ;;  %3309 = vrot.lane.b32.xlu2 %v3305_v25, %s4120_s30 }
0x1457   :  { %3574 = vrot.lane.b32.xlu0 %v3247_v32, %s4119_s29 }
0x14a9   :  { %v3310_v13 = vpop.permute.xlu2 %3309 }
0x14aa   :  { %v3316_v28 = vsel %vm657_vm12, %v6144_v15, %v3310_v13  ;;  %v4072_v15 = vld [vmem:[#allocation2 + $0x188] sm:$0xff] }
0x14c1   :  { %v3314_v57 = vpop.permute.xlu0 %3313 }
0x14c2   :  { %v3317_v31 = vsel %vm659_vm13, %v3316_v28, %v3314_v57 }
0x14c3   :  { %3713 = vmatmul.msk.f32.vlgmr.msra.gmra.mxu0 %vm661_vm14, %v3317_v31  ;;  %3715 = vmatmul.msk.f32.vlgmr.msrb.gmra.mxu1 %vm661_vm14, %v3317_v31 }
0x14c4   :  { %3421 = vmatpush.msra.mxu0 %v4069_v8  ;;  %3441 = vmatpush.msrb.mxu1 %v5864_v7  ;;  %v4074_v7 = vld [vmem:[#allocation2 + $0x148] sm:$0xff] }
0x14c6   :  { %3422 = vmatpush.msra.mxu0 %v4070_v5  ;;  %3442 = vmatpush.msrb.mxu1 %v5870_v35  ;;  %v4075_v35 = vld [vmem:[#allocation2 + $0x128] sm:$0xff] }
0x14c8   :  { %3423 = vmatpush.msra.mxu0 %v4071_v2  ;;  %3443 = vmatpush.msrb.mxu1 %v5874_v24  ;;  %v4076_v24 = vld [vmem:[#allocation2 + $0x108] sm:$0xff] }
0x14ca   :  { %3424 = vmatpush.msra.mxu0 %v4072_v15  ;;  %3444 = vmatpush.msrb.mxu1 %v5878_v16  ;;  %v4077_v16 = vld [vmem:[#allocation2 + $0xe8] sm:$0xff] }
0x14cb   :  { %3717 = vmatmul.msk.f32.vlgmr.msrb.gmra.mxu0 %vm661_vm14, %v3317_v31  ;;  %3719 = vmatmul.msk.f32.vlgmr.msra.gmra.mxu1 %vm661_vm14, %v3317_v31 }
0x14cc   :  { %3425 = vmatpush.msra.mxu0 %v4073_v48  ;;  %3445 = vmatpush.msrb.mxu1 %v5884_v56  ;;  %v4079_v56 = vld [vmem:[#allocation2 + $0xa8] sm:$0xff] }
0x14ce   :  { %3426 = vmatpush.msra.mxu0 %v4074_v7  ;;  %3446 = vmatpush.msrb.mxu1 %v5890_v58  ;;  %v4080_v58 = vld [vmem:[#allocation2 + $0x88] sm:$0xff] }
0x14d0   :  { %3427 = vmatpush.msra.mxu0 %v4075_v35  ;;  %3447 = vmatpush.msrb.mxu1 %v5894_v33  ;;  %v4081_v33 = vld [vmem:[#allocation2 + $0x68] sm:$0xff] }
0x14d2   :  { %3428 = vmatpush.msra.mxu0 %v4076_v24  ;;  %3448 = vmatpush.msrb.mxu1 %v5898_v17  ;;  %v4082_v17 = vld [vmem:[#allocation2 + $0x48] sm:$0xff] }
0x14d4   :  { %3429 = vmatpush.msra.mxu0 %v4077_v16  ;;  %3449 = vmatpush.msrb.mxu1 %v5902_v3  ;;  %v4083_v3 = vld [vmem:[#allocation2 + $0x28] sm:$0xff] }
0x14d6   :  { %3430 = vmatpush.msra.mxu0 %v4078_v61  ;;  %3450 = vmatpush.msrb.mxu1 %v5906_v40  ;;  %v4084_v40 = vld [vmem:[#allocation2 + $0x8] sm:$0xff] }
0x14d8   :  { %3431 = vmatpush.msra.mxu0 %v4079_v56  ;;  %3451 = vmatpush.msrb.mxu1 %v5910_v55 }
0x14da   :  { %3432 = vmatpush.msra.mxu0 %v4080_v58  ;;  %3452 = vmatpush.msrb.mxu1 %v5914_v60 }
0x14dc   :  { %3433 = vmatpush.msra.mxu0 %v4081_v33  ;;  %3453 = vmatpush.msrb.mxu1 %v6689_v18 }
0x14de   :  { %3434 = vmatpush.msra.mxu0 %v4082_v17  ;;  %3454 = vmatpush.msrb.mxu1 %v6690_v52 }
0x14e0   :  { %3435 = vmatpush.msra.mxu0 %v4083_v3  ;;  %3455 = vmatpush.msrb.mxu1 %v6691_v44 }
0x14e2   :  { %3436 = vmatpush.msra.mxu0 %v4084_v40  ;;  %3456 = vmatpush.msrb.mxu1 %v6692_v27 }
0x14e3   :  { %3437 = vmatmul.f32.vlgmr.msra.gmra.mxu0 %v6138_v22  ;;  %3457 = vmatmul.f32.vlgmr.msrb.gmra.mxu1 %v6138_v22 }
0x1540   :  { %v3338_v55 = vpop.f32.mrf.mxu0  ;;  %v3358_v60 = vpop.f32.mrf.mxu1 }
0x1541   :  { %v3419_v18 = vadd.f32 %v3418_v23, %v3338_v55  ;;  %v4086_v55 = vld [vmem:[%s6219_s1] sm:$0xf]  ;;  %v3571_v23 = vpop.permute.xlu1 %3570 }
0x1543   :  { %v3481_v53 = vadd.f32 %v3419_v18, %v6712_v63  ;;  %v6716_v18 = vld [vmem:[#allocation18_spill] sm:$0xff] }
0x1545   :  { %v3720_v0 = vmul.f32 -1.442695, %v3481_v53  ;;  %v2605_v53 = vadd.f32 %v4086_v55, %v6716_v18 }
0x1547   :  { %3906 = vpow2.f32 %v3720_v0  ;;  %v3575_v0 = vpop.permute.xlu0 %3574 }
0x1548   :  { %v3398_v52 = vpop.f32.mrf.mxu1  ;;  %v3378_v44 = vpop.f32.mrf.mxu0 }
0x1549   :  { %v3479_v4 = vadd.f32 %v3478_v6, %v3398_v52  ;;  %v3581_v52 = vsel %vm657_vm12, %v2605_v53, %v3571_v23 }
0x154a   :  { %v3582_v6 = vsel %vm659_vm13, %v3581_v52, %v3575_v0 }
0x154b   :  { %v3484_v45 = vadd.f32 %v3479_v4, %v6711_v19 }
0x154d   :  { %v3907_v51 = vpop.eup %3906  ;;  %v3722_v27 = vmul.f32 -1.442695, %v3484_v45 }
0x154e   :  { %v3488_v10 = vadd.f32 1.0, %v3907_v51 }
0x154f   :  { %3908 = vpow2.f32 %v3722_v27 }
0x1550   :  { %3910 = vrcp.f32 %v3488_v10  ;;  %vm3494_vm10 = vweird.f32 %v3488_v10  ;;  %v3500_v49 = vand.u32 2147483648, %v3488_v10  ;;  %v3498_v42 = vand.u32 2147483647, %v3488_v10 }
0x1552   :  { %v3501_v57 = vor.u32 1.1754944e-38, %v3500_v49  ;;  %vm3499_vm1 = vcmp.eq.f32.partialorder %v3498_v42, 8.507059e+37 }
0x1555   :  { %v3909_v63 = vpop.eup %3908 }
0x1556   :  { %v3911_v12 = vpop.eup %3910  ;;  %v3527_v50 = vadd.f32 1.0, %v3909_v63 }
0x1557   :  { %v3490_v47 = vmul.f32 %v3911_v12, %v3488_v10  ;;  %vm3495_vm0 = vweird.f32 %v3911_v12 }
0x1558   :  { %vm3496_vm8 = vmor %vm3494_vm10, %vm3495_vm0  ;;  %v3539_v24 = vand.u32 2147483648, %v3527_v50  ;;  %vm3533_vm11 = vweird.f32 %v3527_v50  ;;  %v3537_v16 = vand.u32 2147483647, %v3527_v50 }
0x1559   :  { %v3491_v36 = vsub.f32 1.0, %v3490_v47 }
0x155a   :  { %v3540_v56 = vor.u32 1.1754944e-38, %v3539_v24  ;;  %vm3538_vm5 = vcmp.eq.f32.partialorder %v3537_v16, 8.507059e+37 }
0x155b   :  { %v3492_v59 = vmul.f32 %v3911_v12, %v3491_v36 }
0x155d   :  { %v3493_v38 = vadd.f32 %v3911_v12, %v3492_v59 }
0x1560   :  { %v3438_v62 = vpop.f32.mrf.mxu0  ;;  %v3458_v34 = vpop.f32.mrf.mxu1 }
0x1561   :  { %v3439_v21 = vadd.f32 %v3438_v62, %v3358_v60  ;;  %v3459_v19 = vadd.f32 %v3458_v34, %v3378_v44 }
0x1563   :  { %v3482_v22 = vadd.f32 %v3439_v21, %v6710_v39  ;;  %v3483_v11 = vadd.f32 %v3459_v19, %v6713_v43  ;;  %v3497_v43 = vsel %vm3496_vm8, %v3911_v12, %v3493_v38 }
0x1564   :  { %v3502_v8 = vsel %vm3499_vm1, %v3501_v57, %v3497_v43 }
0x1565   :  { %v3721_v41 = vmul.f32 -1.442695, %v3482_v22 }
0x1567   :  { %3912 = vpow2.f32 %v3721_v41 }
0x1568   :  { %3914 = vrcp.f32 %v3527_v50 }
0x156d   :  { %v3913_v14 = vpop.eup %3912 }
0x156e   :  { %v3507_v30 = vadd.f32 1.0, %v3913_v14  ;;  %v3915_v54 = vpop.eup %3914 }
0x156f   :  { %v3529_v37 = vmul.f32 %v3915_v54, %v3527_v50  ;;  %vm3534_vm3 = vweird.f32 %v3915_v54 }
0x1570   :  { %3916 = vrcp.f32 %v3507_v30  ;;  %v3519_v29 = vand.u32 2147483648, %v3507_v30  ;;  %v3517_v1 = vand.u32 2147483647, %v3507_v30  ;;  %vm3513_vm9 = vweird.f32 %v3507_v30  ;;  %vm3535_vm4 = vmor %vm3533_vm11, %vm3534_vm3 }
0x1571   :  { %3918 = vtanh.f32 %v3483_v11  ;;  %v3530_v25 = vsub.f32 1.0, %v3529_v37 }
0x1572   :  { %v3520_v28 = vor.u32 1.1754944e-38, %v3519_v29  ;;  %vm3518_vm2 = vcmp.eq.f32.partialorder %v3517_v1, 8.507059e+37 }
0x1573   :  { %v3531_v2 = vmul.f32 %v3915_v54, %v3530_v25 }
0x1575   :  { %v3532_v35 = vadd.f32 %v3915_v54, %v3531_v2 }
0x1576   :  { %v3917_v46 = vpop.eup %3916 }
0x1577   :  { %v3509_v39 = vmul.f32 %v3917_v46, %v3507_v30  ;;  %vm3514_vm7 = vweird.f32 %v3917_v46  ;;  %v3919_v13 = vpop.eup %3918  ;;  %v3536_v61 = vsel %vm3535_vm4, %v3915_v54, %v3532_v35 }
0x1578   :  { %vm3515_vm15 = vmor %vm3513_vm9, %vm3514_vm7  ;;  %v3544_v48 = vmul.f32 %v3919_v13, %v3502_v8  ;;  %v3541_v33 = vsel %vm3538_vm5, %v3540_v56, %v3536_v61 }
0x1579   :  { %v3510_v26 = vsub.f32 1.0, %v3509_v39 }
0x157b   :  { %v3511_v20 = vmul.f32 %v3917_v46, %v3510_v26 }
0x157d   :  { %v3512_v32 = vadd.f32 %v3917_v46, %v3511_v20 }
0x157f   :  { %v3516_v31 = vsel %vm3515_vm15, %v3917_v46, %v3512_v32 }
0x1580   :  { %v3521_v5 = vsel %vm3518_vm2, %v3520_v28, %v3516_v31 }
0x1581   :  { %v3543_v15 = vmul.f32 %v3521_v5, %v6135_v9  ;;  %v4085_v9 = vld [vmem:[%s6228_s10] ss:$0 sm:$0xff] }
0x1583   :  { %v3545_v7 = vadd.f32 %v3544_v48, %v3543_v15 }
0x1585   :  { %3920 = vtanh.f32 %v3545_v7 }
0x158b   :  { %v3921_v58 = vpop.eup %3920 }
0x158c   :  { %v3547_v17 = vmul.f32 %v3921_v58, %v3541_v33 }
0x158e   :  { %3564 = vmatmul.f32.vlgmr.msrb.gmra.mxu2 %v3547_v17 }
0x1611   :  { %v3565_v3 = vpop.f32.mrf.mxu2 }
0x1612   :  { %v3566_v40 = vadd.f32 %v4085_v9, %v3565_v3 }
0x1614   :  { %v3568_v60 = vadd.f32 %v4086_v55, %v3566_v40 }
0x1616   :  { %3578 = vrot.lane.b32.xlu2 %v3568_v60, %s4121_s8 }
0x1670   :  { %v3579_v4 = vpop.permute.xlu2 %3578 }
0x1671   :  { %v3583_v44 = vsel %vm661_vm14, %v3582_v6, %v3579_v4 }
0x1672   :  { %3585 = vst.msk [vmem:[%s6229_s11] sm:$0xf] %vm3584_vm6, %v3583_v44 }
0x1673   :  { %3590 = vsyncpa [#allocation3], 1 }

</bundles_post_ra>
